<compile_context>
chip_gen: v6e
topology: v6e:2x2x1
jax: 0.10.0
libtpu: 0.0.40
codegen_flags: <defaults>
</compile_context>

<pallas_src>
import functools
import math

import jax
import jax.numpy as jnp
from jax import lax
from jax.experimental import pallas as pl
from jax.experimental.pallas import tpu as pltpu

# Keep f32 matmuls exact so the kernel matches the pure-JAX reference tightly.
# (Perf note: could be relaxed to default precision; matmuls here are tiny.)
jax.config.update("jax_default_matmul_precision", "highest")

# ----------------------------- model hyper-params -----------------------------
BATCH = 2
SEQ_LEN = 8
INPUT_DIM = 4                      # module's input_dim
FEAT = 2 * INPUT_DIM               # x feature width (values || observation mask)
EMBED_TIME = 16
NUM_HEADS = 1
NHIDDEN = 16
NCLASS = 11


# ----------------------------- fused Pallas kernel -----------------------------
def _fused_kernel(ts_ref, x_ref,
                  lin_w_ref, lin_b_ref, per_w_ref, per_b_ref,
                  wq_ref, bq_ref, wk_ref, bk_ref,
                  wo_val_ref, wo_msk_ref, bo_ref,
                  wih_ref, bih_ref, whh_ref, bhh_ref,
                  wc_ref, bc_ref,
                  out_ref,
                  gi_scratch, hs_scratch,
                  *, batch, seq_len, input_dim, num_heads, embed_time, nhidden):
    B, T, D = batch, seq_len, input_dim
    E, H = embed_time, nhidden
    BT = B * T
    ek = E // num_heads
    scale = 1.0 / math.sqrt(ek)

    # ---- learned time embedding: col 0 = Linear(1,1)(t), cols 1.. = sin(Linear(1,E-1)(t))
    tt = ts_ref[...]                                                        # (BT, 1)
    periodic = jnp.sin(tt * per_w_ref[...] + per_b_ref[...])                # (BT, E), col 0 unused
    linear = jnp.broadcast_to(tt * lin_w_ref[...] + lin_b_ref[...], (BT, E))
    lane = lax.broadcasted_iota(jnp.int32, (BT, E), 1)
    key = jnp.where(lane == 0, linear, periodic)                            # (BT, E)

    # ---- query / key projections (query == key == time embedding here)
    q = jnp.dot(key, wq_ref[...], preferred_element_type=jnp.float32) + bq_ref[...]
    k = jnp.dot(key, wk_ref[...], preferred_element_type=jnp.float32) + bk_ref[...]

    xv = x_ref[...]                                                         # (BT, 2D)
    x_val = xv[:, :D]                                                       # observed values
    x_msk = xv[:, D:]                                                       # observation mask

    wih = wih_ref[...]
    bih = bih_ref[...]
    whh = whh_ref[...]
    bhh = bhh_ref[...]

    # ---- per-batch masked attention (matmul softmax) + hoisted GRU input projection
    for b in range(B):                                                      # static, B tiny
        r0, r1 = b * T, (b + 1) * T
        vb = x_val[r0:r1, :]                                                # (T, D)
        mb = x_msk[r0:r1, :]                                                # (T, D)
        mv = mb * vb
        mm = mb * mb
        att_out = None
        for hh in range(num_heads):                                         # static (1 head)
            qh = q[r0:r1, hh * ek:(hh + 1) * ek]
            kh = k[r0:r1, hh * ek:(hh + 1) * ek]
            scores = jnp.dot(qh, kh.T, preferred_element_type=jnp.float32) * scale   # (T, T)
            e = jnp.exp(scores - jnp.max(scores, axis=-1, keepdims=True))             # (T, T)
            den = jnp.dot(e, mb, preferred_element_type=jnp.float32)                  # (T, D)
            num_v = jnp.dot(e, mv, preferred_element_type=jnp.float32)                # (T, D)
            num_m = jnp.dot(e, mm, preferred_element_type=jnp.float32)                # (T, D)
            ok = den > 0.0                       # fully-unobserved channel -> att = 0
            safe = jnp.where(ok, den, 1.0)
            att_v = jnp.where(ok, num_v / safe, 0.0)
            att_m = jnp.where(ok, num_m / safe, 0.0)
            contrib = (jnp.dot(att_v, wo_val_ref[hh * D:(hh + 1) * D, :],
                               preferred_element_type=jnp.float32)
                       + jnp.dot(att_m, wo_msk_ref[hh * D:(hh + 1) * D, :],
                                 preferred_element_type=jnp.float32))
            att_out = contrib if att_out is None else att_out + contrib
        att_out = att_out + bo_ref[...]                                     # (T, H)
        # hoisted GRU input projection for this batch element (off the serial chain)
        gi_scratch[r0:r1, :] = (jnp.dot(att_out, wih, preferred_element_type=jnp.float32)
                                + bih)

    # ---- GRU recurrence: hidden state stays in vregs; only h @ W_hh is serial
    hidden = [jnp.zeros((1, H), jnp.float32) for _ in range(B)]
    for t in range(T):                                                      # static unroll
        for b in range(B):                                                  # independent chains
            row = b * T + t
            gi = gi_scratch[pl.ds(row, 1), :]                               # (1, 3H)
            h_prev = hidden[b]
            gh = jnp.dot(h_prev, whh, preferred_element_type=jnp.float32) + bhh
            r = jax.nn.sigmoid(gi[:, :H] + gh[:, :H])
            z = jax.nn.sigmoid(gi[:, H:2 * H] + gh[:, H:2 * H])
            n = jnp.tanh(gi[:, 2 * H:] + r * gh[:, 2 * H:])
            h_new = (1.0 - z) * n + z * h_prev
            hidden[b] = h_new
            hs_scratch[pl.ds(row, 1), :] = h_new

    # ---- classifier applied once to all hidden states, single store
    hs = hs_scratch[...]                                                    # (BT, H)
    logits = jnp.dot(hs, wc_ref[...], preferred_element_type=jnp.float32) + bc_ref[...]
    out_ref[...] = logits.astype(out_ref.dtype)


# ----------------------------- wrapper -----------------------------------------
def enc_mtan_forward(x, time_steps, params):
    B, T, C = x.shape
    D = C // 2
    E, H = EMBED_TIME, NHIDDEN

    x_flat = x.reshape(B * T, C).astype(jnp.float32)
    ts_flat = time_steps.reshape(B * T, 1).astype(jnp.float32)

    # tiny param reshapes (zero-ish cost): pad periodic params to width E so the
    # time embedding needs no in-kernel lane concat; split wo into value/mask halves.
    per_w_pad = jnp.pad(params["per_w"], ((0, 0), (1, 0)))
    per_b_pad = jnp.pad(params["per_b"].reshape(1, -1), ((0, 0), (1, 0)))
    wo3 = params["wo"].reshape(NUM_HEADS, C, H)
    wo_val = wo3[:, :D, :].reshape(NUM_HEADS * D, H)
    wo_msk = wo3[:, D:, :].reshape(NUM_HEADS * D, H)

    def _fs(*shape):
        return pl.BlockSpec(shape, lambda i: (0,) * len(shape))

    kernel = functools.partial(
        _fused_kernel, batch=B, seq_len=T, input_dim=D,
        num_heads=NUM_HEADS, embed_time=E, nhidden=H)

    out_flat = pl.pallas_call(
        kernel,
        out_shape=jax.ShapeDtypeStruct((B * T, NCLASS), jnp.float32),
        grid=(1,),
        in_specs=[
            _fs(B * T, 1),              # time steps
            _fs(B * T, C),              # x = [values || mask]
            _fs(1, 1), _fs(1, 1),       # linear(1,1) w, b
            _fs(1, E), _fs(1, E),       # periodic w, b (padded to E)
            _fs(E, E), _fs(1, E),       # wq, bq
            _fs(E, E), _fs(1, E),       # wk, bk
            _fs(NUM_HEADS * D, H),      # wo (value-channel rows)
            _fs(NUM_HEADS * D, H),      # wo (mask-channel rows)
            _fs(1, H),                  # bo
            _fs(H, 3 * H), _fs(1, 3 * H),   # GRU W_ih, b_ih
            _fs(H, 3 * H), _fs(1, 3 * H),   # GRU W_hh, b_hh
            _fs(H, NCLASS), _fs(1, NCLASS), # classifier
        ],
        out_specs=pl.BlockSpec((B * T, NCLASS), lambda i: (0, 0)),
        scratch_shapes=[
            pltpu.VMEM((B * T, 3 * H), jnp.float32),   # hoisted GRU gate inputs
            pltpu.VMEM((B * T, H), jnp.float32),       # hidden-state stack
        ],
        compiler_params=pltpu.CompilerParams(dimension_semantics=("arbitrary",)),
    )(ts_flat, x_flat,
      params["lin_w"], params["lin_b"].reshape(1, 1),
      per_w_pad, per_b_pad,
      params["wq"], params["bq"].reshape(1, -1),
      params["wk"], params["bk"].reshape(1, -1),
      wo_val, wo_msk, params["bo"].reshape(1, -1),
      params["wih"], params["bih"].reshape(1, -1),
      params["whh"], params["bhh"].reshape(1, -1),
      params["wc"], params["bc"].reshape(1, -1))

    return out_flat.reshape(B, T, NCLASS)


# ----------------------------- pure-JAX reference -------------------------------
def reference_forward(x, time_steps, params):
    D, C, E, H = INPUT_DIM, FEAT, EMBED_TIME, NHIDDEN
    B, T, _ = x.shape
    tt = time_steps[..., None].astype(jnp.float32)
    out1 = tt * params["lin_w"][0, 0] + params["lin_b"]
    out2 = jnp.sin(tt @ params["per_w"] + params["per_b"])
    key_emb = jnp.concatenate([out1, out2], axis=-1)

    mask = x[:, :, D:]
    mask = jnp.concatenate([mask, mask], axis=2)

    q = key_emb @ params["wq"] + params["bq"]
    k = key_emb @ params["wk"] + params["bk"]
    ek = E // NUM_HEADS
    qh = q.reshape(B, T, NUM_HEADS, ek).transpose(0, 2, 1, 3)
    kh = k.reshape(B, T, NUM_HEADS, ek).transpose(0, 2, 1, 3)
    scores = jnp.einsum("bhqe,bhke->bhqk", qh, kh) / math.sqrt(ek)
    s = jnp.broadcast_to(scores[..., None], scores.shape + (C,))
    m = mask[:, None, None, :, :]
    s = jnp.where(m == 0, -1.0e9, s)
    p = jax.nn.softmax(s, axis=-2)
    v = x[:, None, None, :, :]
    att = jnp.sum(p * v, axis=-2)                                          # (B, h, T, C)
    att = att.transpose(0, 2, 1, 3).reshape(B, T, NUM_HEADS * C)
    att_out = att @ params["wo"] + params["bo"]                            # (B, T, H)

    def step(h, xt):
        gi = xt @ params["wih"] + params["bih"]
        gh = h @ params["whh"] + params["bhh"]
        r = jax.nn.sigmoid(gi[:, :H] + gh[:, :H])
        z = jax.nn.sigmoid(gi[:, H:2 * H] + gh[:, H:2 * H])
        n = jnp.tanh(gi[:, 2 * H:] + r * gh[:, 2 * H:])
        h_new = (1.0 - z) * n + z * h
        return h_new, h_new

    h0 = jnp.zeros((B, H), jnp.float32)
    _, hs = lax.scan(step, h0, att_out.transpose(1, 0, 2))
    hs = hs.transpose(1, 0, 2)
    return hs @ params["wc"] + params["bc"]


# ----------------------------- main ---------------------------------------------
if __name__ == "__main__":
    root = jax.random.PRNGKey(0)
    ks = jax.random.split(root, 20)

    def init(k, shape, scale=0.2):
        return jax.random.normal(k, shape, jnp.float32) * scale

    E, H, C = EMBED_TIME, NHIDDEN, FEAT
    params = {
        # learn_time_embedding
        "per_w": init(ks[0], (1, E - 1)), "per_b": init(ks[1], (E - 1,)),
        "lin_w": init(ks[2], (1, 1)),     "lin_b": init(ks[3], (1,)),
        # multiTimeAttention (weights stored as (in, out))
        "wq": init(ks[4], (E, E)), "bq": init(ks[5], (E,)),
        "wk": init(ks[6], (E, E)), "bk": init(ks[7], (E,)),
        "wo": init(ks[8], (NUM_HEADS * C, H)), "bo": init(ks[9], (H,)),
        # GRU (gate order r, z, n — same as PyTorch)
        "wih": init(ks[10], (H, 3 * H)), "bih": init(ks[11], (3 * H,)),
        "whh": init(ks[12], (H, 3 * H)), "bhh": init(ks[13], (3 * H,)),
        # classifier
        "wc": init(ks[14], (H, NCLASS)), "bc": init(ks[15], (NCLASS,)),
    }

    # inputs: x = [values || 0/1 observation mask], time_steps in [0, 1)
    vals = jax.random.normal(ks[16], (BATCH, SEQ_LEN, INPUT_DIM), jnp.float32)
    obs_mask = (jax.random.uniform(ks[17], (BATCH, SEQ_LEN, INPUT_DIM)) > 0.3).astype(jnp.float32)
    x = jnp.concatenate([vals * obs_mask, obs_mask], axis=-1)              # (B, T, 2*D)
    time_steps = jnp.sort(jax.random.uniform(ks[18], (BATCH, SEQ_LEN)), axis=-1)

    out = enc_mtan_forward(x, time_steps, params)
    out = jax.block_until_ready(out)

    ref = reference_forward(x, time_steps, params)
    assert out.shape == (BATCH, SEQ_LEN, NCLASS), out.shape
    assert jnp.allclose(out, ref, atol=1e-3, rtol=1e-3), float(jnp.max(jnp.abs(out - ref)))

    print("KERNEL_OK")
</pallas_src>

<mosaic_0001>
module attributes {stable_mosaic.version = 11 : i64} {
  func.func @_fused_kernel(%arg0: i32, %arg1: memref<16x1xf32, #tpu.memory_space<vmem>>, %arg2: memref<16x8xf32, #tpu.memory_space<vmem>>, %arg3: memref<1x1xf32, #tpu.memory_space<vmem>>, %arg4: memref<1x1xf32, #tpu.memory_space<vmem>>, %arg5: memref<1x16xf32, #tpu.memory_space<vmem>>, %arg6: memref<1x16xf32, #tpu.memory_space<vmem>>, %arg7: memref<16x16xf32, #tpu.memory_space<vmem>>, %arg8: memref<1x16xf32, #tpu.memory_space<vmem>>, %arg9: memref<16x16xf32, #tpu.memory_space<vmem>>, %arg10: memref<1x16xf32, #tpu.memory_space<vmem>>, %arg11: memref<4x16xf32, #tpu.memory_space<vmem>>, %arg12: memref<4x16xf32, #tpu.memory_space<vmem>>, %arg13: memref<1x16xf32, #tpu.memory_space<vmem>>, %arg14: memref<16x48xf32, #tpu.memory_space<vmem>>, %arg15: memref<1x48xf32, #tpu.memory_space<vmem>>, %arg16: memref<16x48xf32, #tpu.memory_space<vmem>>, %arg17: memref<1x48xf32, #tpu.memory_space<vmem>>, %arg18: memref<16x11xf32, #tpu.memory_space<vmem>>, %arg19: memref<1x11xf32, #tpu.memory_space<vmem>>, %arg20: memref<16x11xf32, #tpu.memory_space<vmem>>, %arg21: memref<16x48xf32, #tpu.memory_space<vmem>>, %arg22: memref<16x16xf32, #tpu.memory_space<vmem>>) attributes {dimension_semantics = [#tpu.dimension_semantics<arbitrary>], iteration_bounds = array<i64: 1>, scalar_prefetch = 0 : i64, scratch_operands = 2 : i64, tpu.core_type = #tpu.core_type<tc>, window_params = [{pipeline_mode = #tpu.pipeline_mode<synchronous>, transform_indices = @transform_0, window_bounds = array<i64: 16, 1>}, {pipeline_mode = #tpu.pipeline_mode<synchronous>, transform_indices = @transform_1, window_bounds = array<i64: 16, 8>}, {pipeline_mode = #tpu.pipeline_mode<synchronous>, transform_indices = @transform_2, window_bounds = array<i64: 1, 1>}, {pipeline_mode = #tpu.pipeline_mode<synchronous>, transform_indices = @transform_3, window_bounds = array<i64: 1, 1>}, {pipeline_mode = #tpu.pipeline_mode<synchronous>, transform_indices = @transform_4, window_bounds = array<i64: 1, 16>}, {pipeline_mode = #tpu.pipeline_mode<synchronous>, transform_indices = @transform_5, window_bounds = array<i64: 1, 16>}, {pipeline_mode = #tpu.pipeline_mode<synchronous>, transform_indices = @transform_6, window_bounds = array<i64: 16, 16>}, {pipeline_mode = #tpu.pipeline_mode<synchronous>, transform_indices = @transform_7, window_bounds = array<i64: 1, 16>}, {pipeline_mode = #tpu.pipeline_mode<synchronous>, transform_indices = @transform_8, window_bounds = array<i64: 16, 16>}, {pipeline_mode = #tpu.pipeline_mode<synchronous>, transform_indices = @transform_9, window_bounds = array<i64: 1, 16>}, {pipeline_mode = #tpu.pipeline_mode<synchronous>, transform_indices = @transform_10, window_bounds = array<i64: 4, 16>}, {pipeline_mode = #tpu.pipeline_mode<synchronous>, transform_indices = @transform_11, window_bounds = array<i64: 4, 16>}, {pipeline_mode = #tpu.pipeline_mode<synchronous>, transform_indices = @transform_12, window_bounds = array<i64: 1, 16>}, {pipeline_mode = #tpu.pipeline_mode<synchronous>, transform_indices = @transform_13, window_bounds = array<i64: 16, 48>}, {pipeline_mode = #tpu.pipeline_mode<synchronous>, transform_indices = @transform_14, window_bounds = array<i64: 1, 48>}, {pipeline_mode = #tpu.pipeline_mode<synchronous>, transform_indices = @transform_15, window_bounds = array<i64: 16, 48>}, {pipeline_mode = #tpu.pipeline_mode<synchronous>, transform_indices = @transform_16, window_bounds = array<i64: 1, 48>}, {pipeline_mode = #tpu.pipeline_mode<synchronous>, transform_indices = @transform_17, window_bounds = array<i64: 16, 11>}, {pipeline_mode = #tpu.pipeline_mode<synchronous>, transform_indices = @transform_18, window_bounds = array<i64: 1, 11>}, {pipeline_mode = #tpu.pipeline_mode<synchronous>, transform_indices = @transform_19, window_bounds = array<i64: 16, 11>}]} {
    %c0 = arith.constant 0 : index
    %c0_0 = arith.constant 0 : index
    %0 = vector.load %arg1[%c0, %c0_0] : memref<16x1xf32, #tpu.memory_space<vmem>>, vector<16x1xf32>
    %c0_1 = arith.constant 0 : index
    %c0_2 = arith.constant 0 : index
    %1 = vector.load %arg5[%c0_1, %c0_2] : memref<1x16xf32, #tpu.memory_space<vmem>>, vector<1x16xf32>
    %2 = vector.broadcast %0 : vector<16x1xf32> to vector<16x16xf32>
    %3 = vector.broadcast %1 : vector<1x16xf32> to vector<16x16xf32>
    %4 = arith.mulf %2, %3 : vector<16x16xf32>
    %c0_3 = arith.constant 0 : index
    %c0_4 = arith.constant 0 : index
    %5 = vector.load %arg6[%c0_3, %c0_4] : memref<1x16xf32, #tpu.memory_space<vmem>>, vector<1x16xf32>
    %6 = vector.broadcast %5 : vector<1x16xf32> to vector<16x16xf32>
    %7 = arith.addf %4, %6 : vector<16x16xf32>
    %8 = math.sin %7 : vector<16x16xf32>
    %c0_5 = arith.constant 0 : index
    %c0_6 = arith.constant 0 : index
    %9 = vector.load %arg3[%c0_5, %c0_6] : memref<1x1xf32, #tpu.memory_space<vmem>>, vector<1x1xf32>
    %10 = vector.broadcast %9 : vector<1x1xf32> to vector<16x1xf32>
    %11 = arith.mulf %0, %10 : vector<16x1xf32>
    %c0_7 = arith.constant 0 : index
    %c0_8 = arith.constant 0 : index
    %12 = vector.load %arg4[%c0_7, %c0_8] : memref<1x1xf32, #tpu.memory_space<vmem>>, vector<1x1xf32>
    %13 = vector.broadcast %12 : vector<1x1xf32> to vector<16x1xf32>
    %14 = arith.addf %11, %13 : vector<16x1xf32>
    %15 = vector.shape_cast %14 : vector<16x1xf32> to vector<16x1xf32>
    %16 = vector.broadcast %15 : vector<16x1xf32> to vector<16x16xf32>
    %17 = tpu.iota {dimensions = array<i32: 1>} : vector<16x16xi32>
    %c0_i32 = arith.constant 0 : i32
    %18 = vector.broadcast %c0_i32 : i32 to vector<16x16xi32>
    %19 = arith.cmpi eq, %17, %18 : vector<16x16xi32>
    %20 = arith.select %19, %16, %8 : vector<16x16xi1>, vector<16x16xf32>
    %c0_9 = arith.constant 0 : index
    %c0_10 = arith.constant 0 : index
    %21 = vector.load %arg7[%c0_9, %c0_10] : memref<16x16xf32, #tpu.memory_space<vmem>>, vector<16x16xf32>
    %cst = arith.constant dense<0.000000e+00> : vector<16x16xf32>
    %22 = tpu.matmul %20, %21, %cst {dimension_numbers = #tpu.dot_dimension_numbers<[1], [0], [0], [1], [0, 0, 1, 1], [], []>, precision = #tpu.contract_precision<fp32>} : vector<16x16xf32>, vector<16x16xf32>, vector<16x16xf32> -> vector<16x16xf32>
    %c0_11 = arith.constant 0 : index
    %c0_12 = arith.constant 0 : index
    %23 = vector.load %arg8[%c0_11, %c0_12] : memref<1x16xf32, #tpu.memory_space<vmem>>, vector<1x16xf32>
    %24 = vector.broadcast %23 : vector<1x16xf32> to vector<16x16xf32>
    %25 = arith.addf %22, %24 : vector<16x16xf32>
    %c0_13 = arith.constant 0 : index
    %c0_14 = arith.constant 0 : index
    %26 = vector.load %arg9[%c0_13, %c0_14] : memref<16x16xf32, #tpu.memory_space<vmem>>, vector<16x16xf32>
    %cst_15 = arith.constant dense<0.000000e+00> : vector<16x16xf32>
    %27 = tpu.matmul %20, %26, %cst_15 {dimension_numbers = #tpu.dot_dimension_numbers<[1], [0], [0], [1], [0, 0, 1, 1], [], []>, precision = #tpu.contract_precision<fp32>} : vector<16x16xf32>, vector<16x16xf32>, vector<16x16xf32> -> vector<16x16xf32>
    %c0_16 = arith.constant 0 : index
    %c0_17 = arith.constant 0 : index
    %28 = vector.load %arg10[%c0_16, %c0_17] : memref<1x16xf32, #tpu.memory_space<vmem>>, vector<1x16xf32>
    %29 = vector.broadcast %28 : vector<1x16xf32> to vector<16x16xf32>
    %30 = arith.addf %27, %29 : vector<16x16xf32>
    %c0_18 = arith.constant 0 : index
    %c0_19 = arith.constant 0 : index
    %31 = vector.load %arg2[%c0_18, %c0_19] : memref<16x8xf32, #tpu.memory_space<vmem>>, vector<16x8xf32>
    %32 = vector.extract_strided_slice %31 {offsets = [0, 0], sizes = [16, 4], strides = [1, 1]} : vector<16x8xf32> to vector<16x4xf32>
    %33 = vector.extract_strided_slice %31 {offsets = [0, 4], sizes = [16, 4], strides = [1, 1]} : vector<16x8xf32> to vector<16x4xf32>
    %c0_20 = arith.constant 0 : index
    %c0_21 = arith.constant 0 : index
    %34 = vector.load %arg14[%c0_20, %c0_21] : memref<16x48xf32, #tpu.memory_space<vmem>>, vector<16x48xf32>
    %c0_22 = arith.constant 0 : index
    %c0_23 = arith.constant 0 : index
    %35 = vector.load %arg15[%c0_22, %c0_23] : memref<1x48xf32, #tpu.memory_space<vmem>>, vector<1x48xf32>
    %c0_24 = arith.constant 0 : index
    %c0_25 = arith.constant 0 : index
    %36 = vector.load %arg16[%c0_24, %c0_25] : memref<16x48xf32, #tpu.memory_space<vmem>>, vector<16x48xf32>
    %c0_26 = arith.constant 0 : index
    %c0_27 = arith.constant 0 : index
    %37 = vector.load %arg17[%c0_26, %c0_27] : memref<1x48xf32, #tpu.memory_space<vmem>>, vector<1x48xf32>
    %38 = vector.extract_strided_slice %32 {offsets = [0, 0], sizes = [8, 4], strides = [1, 1]} : vector<16x4xf32> to vector<8x4xf32>
    %39 = vector.extract_strided_slice %33 {offsets = [0, 0], sizes = [8, 4], strides = [1, 1]} : vector<16x4xf32> to vector<8x4xf32>
    %40 = arith.mulf %39, %38 : vector<8x4xf32>
    %41 = arith.mulf %39, %39 : vector<8x4xf32>
    %42 = vector.extract_strided_slice %25 {offsets = [0, 0], sizes = [8, 16], strides = [1, 1]} : vector<16x16xf32> to vector<8x16xf32>
    %43 = vector.extract_strided_slice %30 {offsets = [0, 0], sizes = [8, 16], strides = [1, 1]} : vector<16x16xf32> to vector<8x16xf32>
    %44 = tpu.transpose %43, [1, 0] : vector<8x16xf32> -> vector<16x8xf32>
    %cst_28 = arith.constant dense<0.000000e+00> : vector<8x8xf32>
    %45 = tpu.matmul %42, %44, %cst_28 {dimension_numbers = #tpu.dot_dimension_numbers<[1], [0], [0], [1], [0, 0, 1, 1], [], []>, precision = #tpu.contract_precision<fp32>} : vector<8x16xf32>, vector<16x8xf32>, vector<8x8xf32> -> vector<8x8xf32>
    %cst_29 = arith.constant 2.500000e-01 : f32
    %46 = vector.broadcast %cst_29 : f32 to vector<8x8xf32>
    %47 = arith.mulf %45, %46 : vector<8x8xf32>
    %cst_30 = arith.constant dense<0xFF800000> : vector<8xf32>
    %48 = vector.multi_reduction <maximumf>, %47, %cst_30 [1] : vector<8x8xf32> to vector<8xf32>
    %49 = vector.shape_cast %48 : vector<8xf32> to vector<8x1xf32>
    %50 = vector.broadcast %49 : vector<8x1xf32> to vector<8x8xf32>
    %51 = arith.subf %47, %50 : vector<8x8xf32>
    %52 = math.exp %51 : vector<8x8xf32>
    %cst_31 = arith.constant dense<0.000000e+00> : vector<8x4xf32>
    %53 = tpu.matmul %52, %39, %cst_31 {dimension_numbers = #tpu.dot_dimension_numbers<[1], [0], [0], [1], [0, 0, 1, 1], [], []>, precision = #tpu.contract_precision<fp32>} : vector<8x8xf32>, vector<8x4xf32>, vector<8x4xf32> -> vector<8x4xf32>
    %cst_32 = arith.constant dense<0.000000e+00> : vector<8x4xf32>
    %54 = tpu.matmul %52, %40, %cst_32 {dimension_numbers = #tpu.dot_dimension_numbers<[1], [0], [0], [1], [0, 0, 1, 1], [], []>, precision = #tpu.contract_precision<fp32>} : vector<8x8xf32>, vector<8x4xf32>, vector<8x4xf32> -> vector<8x4xf32>
    %cst_33 = arith.constant dense<0.000000e+00> : vector<8x4xf32>
    %55 = tpu.matmul %52, %41, %cst_33 {dimension_numbers = #tpu.dot_dimension_numbers<[1], [0], [0], [1], [0, 0, 1, 1], [], []>, precision = #tpu.contract_precision<fp32>} : vector<8x8xf32>, vector<8x4xf32>, vector<8x4xf32> -> vector<8x4xf32>
    %cst_34 = arith.constant 0.000000e+00 : f32
    %56 = vector.broadcast %cst_34 : f32 to vector<8x4xf32>
    %57 = arith.cmpf ogt, %53, %56 : vector<8x4xf32>
    %cst_35 = arith.constant 1.000000e+00 : f32
    %58 = vector.broadcast %cst_35 : f32 to vector<8x4xf32>
    %59 = arith.select %57, %53, %58 : vector<8x4xi1>, vector<8x4xf32>
    %60 = arith.divf %54, %59 : vector<8x4xf32>
    %cst_36 = arith.constant 0.000000e+00 : f32
    %61 = vector.broadcast %cst_36 : f32 to vector<8x4xf32>
    %62 = arith.select %57, %60, %61 : vector<8x4xi1>, vector<8x4xf32>
    %63 = arith.divf %55, %59 : vector<8x4xf32>
    %cst_37 = arith.constant 0.000000e+00 : f32
    %64 = vector.broadcast %cst_37 : f32 to vector<8x4xf32>
    %65 = arith.select %57, %63, %64 : vector<8x4xi1>, vector<8x4xf32>
    %c0_38 = arith.constant 0 : index
    %c0_39 = arith.constant 0 : index
    %66 = vector.load %arg11[%c0_38, %c0_39] : memref<4x16xf32, #tpu.memory_space<vmem>>, vector<4x16xf32>
    %cst_40 = arith.constant dense<0.000000e+00> : vector<8x16xf32>
    %67 = tpu.matmul %62, %66, %cst_40 {dimension_numbers = #tpu.dot_dimension_numbers<[1], [0], [0], [1], [0, 0, 1, 1], [], []>, precision = #tpu.contract_precision<fp32>} : vector<8x4xf32>, vector<4x16xf32>, vector<8x16xf32> -> vector<8x16xf32>
    %c0_41 = arith.constant 0 : index
    %c0_42 = arith.constant 0 : index
    %68 = vector.load %arg12[%c0_41, %c0_42] : memref<4x16xf32, #tpu.memory_space<vmem>>, vector<4x16xf32>
    %cst_43 = arith.constant dense<0.000000e+00> : vector<8x16xf32>
    %69 = tpu.matmul %65, %68, %cst_43 {dimension_numbers = #tpu.dot_dimension_numbers<[1], [0], [0], [1], [0, 0, 1, 1], [], []>, precision = #tpu.contract_precision<fp32>} : vector<8x4xf32>, vector<4x16xf32>, vector<8x16xf32> -> vector<8x16xf32>
    %70 = arith.addf %67, %69 : vector<8x16xf32>
    %c0_44 = arith.constant 0 : index
    %c0_45 = arith.constant 0 : index
    %71 = vector.load %arg13[%c0_44, %c0_45] : memref<1x16xf32, #tpu.memory_space<vmem>>, vector<1x16xf32>
    %72 = vector.broadcast %71 : vector<1x16xf32> to vector<8x16xf32>
    %73 = arith.addf %70, %72 : vector<8x16xf32>
    %cst_46 = arith.constant dense<0.000000e+00> : vector<8x48xf32>
    %74 = tpu.matmul %73, %34, %cst_46 {dimension_numbers = #tpu.dot_dimension_numbers<[1], [0], [0], [1], [0, 0, 1, 1], [], []>, precision = #tpu.contract_precision<fp32>} : vector<8x16xf32>, vector<16x48xf32>, vector<8x48xf32> -> vector<8x48xf32>
    %75 = vector.broadcast %35 : vector<1x48xf32> to vector<8x48xf32>
    %76 = arith.addf %74, %75 : vector<8x48xf32>
    %c0_47 = arith.constant 0 : index
    %c0_48 = arith.constant 0 : index
    %77 = vector.load %arg21[%c0_47, %c0_48] : memref<16x48xf32, #tpu.memory_space<vmem>>, vector<8x48xf32>
    tpu.vector_store %arg21[%c0_47, %c0_48], %76 {strides = array<i32>} : memref<16x48xf32, #tpu.memory_space<vmem>>, vector<8x48xf32>,
    %78 = vector.extract_strided_slice %32 {offsets = [8, 0], sizes = [8, 4], strides = [1, 1]} : vector<16x4xf32> to vector<8x4xf32>
    %79 = vector.extract_strided_slice %33 {offsets = [8, 0], sizes = [8, 4], strides = [1, 1]} : vector<16x4xf32> to vector<8x4xf32>
    %80 = arith.mulf %79, %78 : vector<8x4xf32>
    %81 = arith.mulf %79, %79 : vector<8x4xf32>
    %82 = vector.extract_strided_slice %25 {offsets = [8, 0], sizes = [8, 16], strides = [1, 1]} : vector<16x16xf32> to vector<8x16xf32>
    %83 = vector.extract_strided_slice %30 {offsets = [8, 0], sizes = [8, 16], strides = [1, 1]} : vector<16x16xf32> to vector<8x16xf32>
    %84 = tpu.transpose %83, [1, 0] : vector<8x16xf32> -> vector<16x8xf32>
    %cst_49 = arith.constant dense<0.000000e+00> : vector<8x8xf32>
    %85 = tpu.matmul %82, %84, %cst_49 {dimension_numbers = #tpu.dot_dimension_numbers<[1], [0], [0], [1], [0, 0, 1, 1], [], []>, precision = #tpu.contract_precision<fp32>} : vector<8x16xf32>, vector<16x8xf32>, vector<8x8xf32> -> vector<8x8xf32>
    %cst_50 = arith.constant 2.500000e-01 : f32
    %86 = vector.broadcast %cst_50 : f32 to vector<8x8xf32>
    %87 = arith.mulf %85, %86 : vector<8x8xf32>
    %cst_51 = arith.constant dense<0xFF800000> : vector<8xf32>
    %88 = vector.multi_reduction <maximumf>, %87, %cst_51 [1] : vector<8x8xf32> to vector<8xf32>
    %89 = vector.shape_cast %88 : vector<8xf32> to vector<8x1xf32>
    %90 = vector.broadcast %89 : vector<8x1xf32> to vector<8x8xf32>
    %91 = arith.subf %87, %90 : vector<8x8xf32>
    %92 = math.exp %91 : vector<8x8xf32>
    %cst_52 = arith.constant dense<0.000000e+00> : vector<8x4xf32>
    %93 = tpu.matmul %92, %79, %cst_52 {dimension_numbers = #tpu.dot_dimension_numbers<[1], [0], [0], [1], [0, 0, 1, 1], [], []>, precision = #tpu.contract_precision<fp32>} : vector<8x8xf32>, vector<8x4xf32>, vector<8x4xf32> -> vector<8x4xf32>
    %cst_53 = arith.constant dense<0.000000e+00> : vector<8x4xf32>
    %94 = tpu.matmul %92, %80, %cst_53 {dimension_numbers = #tpu.dot_dimension_numbers<[1], [0], [0], [1], [0, 0, 1, 1], [], []>, precision = #tpu.contract_precision<fp32>} : vector<8x8xf32>, vector<8x4xf32>, vector<8x4xf32> -> vector<8x4xf32>
    %cst_54 = arith.constant dense<0.000000e+00> : vector<8x4xf32>
    %95 = tpu.matmul %92, %81, %cst_54 {dimension_numbers = #tpu.dot_dimension_numbers<[1], [0], [0], [1], [0, 0, 1, 1], [], []>, precision = #tpu.contract_precision<fp32>} : vector<8x8xf32>, vector<8x4xf32>, vector<8x4xf32> -> vector<8x4xf32>
    %cst_55 = arith.constant 0.000000e+00 : f32
    %96 = vector.broadcast %cst_55 : f32 to vector<8x4xf32>
    %97 = arith.cmpf ogt, %93, %96 : vector<8x4xf32>
    %cst_56 = arith.constant 1.000000e+00 : f32
    %98 = vector.broadcast %cst_56 : f32 to vector<8x4xf32>
    %99 = arith.select %97, %93, %98 : vector<8x4xi1>, vector<8x4xf32>
    %100 = arith.divf %94, %99 : vector<8x4xf32>
    %cst_57 = arith.constant 0.000000e+00 : f32
    %101 = vector.broadcast %cst_57 : f32 to vector<8x4xf32>
    %102 = arith.select %97, %100, %101 : vector<8x4xi1>, vector<8x4xf32>
    %103 = arith.divf %95, %99 : vector<8x4xf32>
    %cst_58 = arith.constant 0.000000e+00 : f32
    %104 = vector.broadcast %cst_58 : f32 to vector<8x4xf32>
    %105 = arith.select %97, %103, %104 : vector<8x4xi1>, vector<8x4xf32>
    %c0_59 = arith.constant 0 : index
    %c0_60 = arith.constant 0 : index
    %106 = vector.load %arg11[%c0_59, %c0_60] : memref<4x16xf32, #tpu.memory_space<vmem>>, vector<4x16xf32>
    %cst_61 = arith.constant dense<0.000000e+00> : vector<8x16xf32>
    %107 = tpu.matmul %102, %106, %cst_61 {dimension_numbers = #tpu.dot_dimension_numbers<[1], [0], [0], [1], [0, 0, 1, 1], [], []>, precision = #tpu.contract_precision<fp32>} : vector<8x4xf32>, vector<4x16xf32>, vector<8x16xf32> -> vector<8x16xf32>
    %c0_62 = arith.constant 0 : index
    %c0_63 = arith.constant 0 : index
    %108 = vector.load %arg12[%c0_62, %c0_63] : memref<4x16xf32, #tpu.memory_space<vmem>>, vector<4x16xf32>
    %cst_64 = arith.constant dense<0.000000e+00> : vector<8x16xf32>
    %109 = tpu.matmul %105, %108, %cst_64 {dimension_numbers = #tpu.dot_dimension_numbers<[1], [0], [0], [1], [0, 0, 1, 1], [], []>, precision = #tpu.contract_precision<fp32>} : vector<8x4xf32>, vector<4x16xf32>, vector<8x16xf32> -> vector<8x16xf32>
    %110 = arith.addf %107, %109 : vector<8x16xf32>
    %c0_65 = arith.constant 0 : index
    %c0_66 = arith.constant 0 : index
    %111 = vector.load %arg13[%c0_65, %c0_66] : memref<1x16xf32, #tpu.memory_space<vmem>>, vector<1x16xf32>
    %112 = vector.broadcast %111 : vector<1x16xf32> to vector<8x16xf32>
    %113 = arith.addf %110, %112 : vector<8x16xf32>
    %cst_67 = arith.constant dense<0.000000e+00> : vector<8x48xf32>
    %114 = tpu.matmul %113, %34, %cst_67 {dimension_numbers = #tpu.dot_dimension_numbers<[1], [0], [0], [1], [0, 0, 1, 1], [], []>, precision = #tpu.contract_precision<fp32>} : vector<8x16xf32>, vector<16x48xf32>, vector<8x48xf32> -> vector<8x48xf32>
    %115 = vector.broadcast %35 : vector<1x48xf32> to vector<8x48xf32>
    %116 = arith.addf %114, %115 : vector<8x48xf32>
    %c8 = arith.constant 8 : index
    %c0_68 = arith.constant 0 : index
    %117 = vector.load %arg21[%c8, %c0_68] : memref<16x48xf32, #tpu.memory_space<vmem>>, vector<8x48xf32>
    tpu.vector_store %arg21[%c8, %c0_68], %116 {strides = array<i32>} : memref<16x48xf32, #tpu.memory_space<vmem>>, vector<8x48xf32>,
    %cst_69 = arith.constant 0.000000e+00 : f32
    %118 = vector.broadcast %cst_69 : f32 to vector<1x16xf32>
    %cst_70 = arith.constant 0.000000e+00 : f32
    %119 = vector.broadcast %cst_70 : f32 to vector<1x16xf32>
    %c0_71 = arith.constant 0 : index
    %c0_72 = arith.constant 0 : index
    %120 = vector.load %arg21[%c0_71, %c0_72] : memref<16x48xf32, #tpu.memory_space<vmem>>, vector<1x48xf32>
    %cst_73 = arith.constant dense<0.000000e+00> : vector<1x48xf32>
    %121 = tpu.matmul %118, %36, %cst_73 {dimension_numbers = #tpu.dot_dimension_numbers<[1], [0], [0], [1], [0, 0, 1, 1], [], []>, precision = #tpu.contract_precision<fp32>} : vector<1x16xf32>, vector<16x48xf32>, vector<1x48xf32> -> vector<1x48xf32>
    %122 = arith.addf %121, %37 : vector<1x48xf32>
    %123 = vector.extract_strided_slice %120 {offsets = [0, 0], sizes = [1, 16], strides = [1, 1]} : vector<1x48xf32> to vector<1x16xf32>
    %124 = vector.extract_strided_slice %122 {offsets = [0, 0], sizes = [1, 16], strides = [1, 1]} : vector<1x48xf32> to vector<1x16xf32>
    %125 = arith.addf %123, %124 : vector<1x16xf32>
    %126 = arith.negf %125 : vector<1x16xf32>
    %127 = math.exp %126 : vector<1x16xf32>
    %cst_74 = arith.constant 1.000000e+00 : f32
    %128 = vector.broadcast %cst_74 : f32 to vector<1x16xf32>
    %129 = arith.addf %128, %127 : vector<1x16xf32>
    %130 = arith.divf %128, %129 : vector<1x16xf32>
    %131 = vector.extract_strided_slice %120 {offsets = [0, 16], sizes = [1, 16], strides = [1, 1]} : vector<1x48xf32> to vector<1x16xf32>
    %132 = vector.extract_strided_slice %122 {offsets = [0, 16], sizes = [1, 16], strides = [1, 1]} : vector<1x48xf32> to vector<1x16xf32>
    %133 = arith.addf %131, %132 : vector<1x16xf32>
    %134 = arith.negf %133 : vector<1x16xf32>
    %135 = math.exp %134 : vector<1x16xf32>
    %cst_75 = arith.constant 1.000000e+00 : f32
    %136 = vector.broadcast %cst_75 : f32 to vector<1x16xf32>
    %137 = arith.addf %136, %135 : vector<1x16xf32>
    %138 = arith.divf %136, %137 : vector<1x16xf32>
    %139 = vector.extract_strided_slice %120 {offsets = [0, 32], sizes = [1, 16], strides = [1, 1]} : vector<1x48xf32> to vector<1x16xf32>
    %140 = vector.extract_strided_slice %122 {offsets = [0, 32], sizes = [1, 16], strides = [1, 1]} : vector<1x48xf32> to vector<1x16xf32>
    %141 = arith.mulf %130, %140 : vector<1x16xf32>
    %142 = arith.addf %139, %141 : vector<1x16xf32>
    %143 = math.tanh %142 : vector<1x16xf32>
    %cst_76 = arith.constant 1.000000e+00 : f32
    %144 = vector.broadcast %cst_76 : f32 to vector<1x16xf32>
    %145 = arith.subf %144, %138 : vector<1x16xf32>
    %146 = arith.mulf %145, %143 : vector<1x16xf32>
    %147 = arith.mulf %138, %118 : vector<1x16xf32>
    %148 = arith.addf %146, %147 : vector<1x16xf32>
    %c0_77 = arith.constant 0 : index
    %c0_78 = arith.constant 0 : index
    %149 = vector.load %arg22[%c0_77, %c0_78] : memref<16x16xf32, #tpu.memory_space<vmem>>, vector<1x16xf32>
    tpu.vector_store %arg22[%c0_77, %c0_78], %148 {strides = array<i32>} : memref<16x16xf32, #tpu.memory_space<vmem>>, vector<1x16xf32>,
    %c8_79 = arith.constant 8 : index
    %c0_80 = arith.constant 0 : index
    %150 = vector.load %arg21[%c8_79, %c0_80] : memref<16x48xf32, #tpu.memory_space<vmem>>, vector<1x48xf32>
    %cst_81 = arith.constant dense<0.000000e+00> : vector<1x48xf32>
    %151 = tpu.matmul %119, %36, %cst_81 {dimension_numbers = #tpu.dot_dimension_numbers<[1], [0], [0], [1], [0, 0, 1, 1], [], []>, precision = #tpu.contract_precision<fp32>} : vector<1x16xf32>, vector<16x48xf32>, vector<1x48xf32> -> vector<1x48xf32>
    %152 = arith.addf %151, %37 : vector<1x48xf32>
    %153 = vector.extract_strided_slice %150 {offsets = [0, 0], sizes = [1, 16], strides = [1, 1]} : vector<1x48xf32> to vector<1x16xf32>
    %154 = vector.extract_strided_slice %152 {offsets = [0, 0], sizes = [1, 16], strides = [1, 1]} : vector<1x48xf32> to vector<1x16xf32>
    %155 = arith.addf %153, %154 : vector<1x16xf32>
    %156 = arith.negf %155 : vector<1x16xf32>
    %157 = math.exp %156 : vector<1x16xf32>
    %cst_82 = arith.constant 1.000000e+00 : f32
    %158 = vector.broadcast %cst_82 : f32 to vector<1x16xf32>
    %159 = arith.addf %158, %157 : vector<1x16xf32>
    %160 = arith.divf %158, %159 : vector<1x16xf32>
    %161 = vector.extract_strided_slice %150 {offsets = [0, 16], sizes = [1, 16], strides = [1, 1]} : vector<1x48xf32> to vector<1x16xf32>
    %162 = vector.extract_strided_slice %152 {offsets = [0, 16], sizes = [1, 16], strides = [1, 1]} : vector<1x48xf32> to vector<1x16xf32>
    %163 = arith.addf %161, %162 : vector<1x16xf32>
    %164 = arith.negf %163 : vector<1x16xf32>
    %165 = math.exp %164 : vector<1x16xf32>
    %cst_83 = arith.constant 1.000000e+00 : f32
    %166 = vector.broadcast %cst_83 : f32 to vector<1x16xf32>
    %167 = arith.addf %166, %165 : vector<1x16xf32>
    %168 = arith.divf %166, %167 : vector<1x16xf32>
    %169 = vector.extract_strided_slice %150 {offsets = [0, 32], sizes = [1, 16], strides = [1, 1]} : vector<1x48xf32> to vector<1x16xf32>
    %170 = vector.extract_strided_slice %152 {offsets = [0, 32], sizes = [1, 16], strides = [1, 1]} : vector<1x48xf32> to vector<1x16xf32>
    %171 = arith.mulf %160, %170 : vector<1x16xf32>
    %172 = arith.addf %169, %171 : vector<1x16xf32>
    %173 = math.tanh %172 : vector<1x16xf32>
    %cst_84 = arith.constant 1.000000e+00 : f32
    %174 = vector.broadcast %cst_84 : f32 to vector<1x16xf32>
    %175 = arith.subf %174, %168 : vector<1x16xf32>
    %176 = arith.mulf %175, %173 : vector<1x16xf32>
    %177 = arith.mulf %168, %119 : vector<1x16xf32>
    %178 = arith.addf %176, %177 : vector<1x16xf32>
    %c8_85 = arith.constant 8 : index
    %c0_86 = arith.constant 0 : index
    %179 = vector.load %arg22[%c8_85, %c0_86] : memref<16x16xf32, #tpu.memory_space<vmem>>, vector<1x16xf32>
    tpu.vector_store %arg22[%c8_85, %c0_86], %178 {strides = array<i32>} : memref<16x16xf32, #tpu.memory_space<vmem>>, vector<1x16xf32>,
    %c1 = arith.constant 1 : index
    %c0_87 = arith.constant 0 : index
    %180 = vector.load %arg21[%c1, %c0_87] : memref<16x48xf32, #tpu.memory_space<vmem>>, vector<1x48xf32>
    %cst_88 = arith.constant dense<0.000000e+00> : vector<1x48xf32>
    %181 = tpu.matmul %148, %36, %cst_88 {dimension_numbers = #tpu.dot_dimension_numbers<[1], [0], [0], [1], [0, 0, 1, 1], [], []>, precision = #tpu.contract_precision<fp32>} : vector<1x16xf32>, vector<16x48xf32>, vector<1x48xf32> -> vector<1x48xf32>
    %182 = arith.addf %181, %37 : vector<1x48xf32>
    %183 = vector.extract_strided_slice %180 {offsets = [0, 0], sizes = [1, 16], strides = [1, 1]} : vector<1x48xf32> to vector<1x16xf32>
    %184 = vector.extract_strided_slice %182 {offsets = [0, 0], sizes = [1, 16], strides = [1, 1]} : vector<1x48xf32> to vector<1x16xf32>
    %185 = arith.addf %183, %184 : vector<1x16xf32>
    %186 = arith.negf %185 : vector<1x16xf32>
    %187 = math.exp %186 : vector<1x16xf32>
    %cst_89 = arith.constant 1.000000e+00 : f32
    %188 = vector.broadcast %cst_89 : f32 to vector<1x16xf32>
    %189 = arith.addf %188, %187 : vector<1x16xf32>
    %190 = arith.divf %188, %189 : vector<1x16xf32>
    %191 = vector.extract_strided_slice %180 {offsets = [0, 16], sizes = [1, 16], strides = [1, 1]} : vector<1x48xf32> to vector<1x16xf32>
    %192 = vector.extract_strided_slice %182 {offsets = [0, 16], sizes = [1, 16], strides = [1, 1]} : vector<1x48xf32> to vector<1x16xf32>
    %193 = arith.addf %191, %192 : vector<1x16xf32>
    %194 = arith.negf %193 : vector<1x16xf32>
    %195 = math.exp %194 : vector<1x16xf32>
    %cst_90 = arith.constant 1.000000e+00 : f32
    %196 = vector.broadcast %cst_90 : f32 to vector<1x16xf32>
    %197 = arith.addf %196, %195 : vector<1x16xf32>
    %198 = arith.divf %196, %197 : vector<1x16xf32>
    %199 = vector.extract_strided_slice %180 {offsets = [0, 32], sizes = [1, 16], strides = [1, 1]} : vector<1x48xf32> to vector<1x16xf32>
    %200 = vector.extract_strided_slice %182 {offsets = [0, 32], sizes = [1, 16], strides = [1, 1]} : vector<1x48xf32> to vector<1x16xf32>
    %201 = arith.mulf %190, %200 : vector<1x16xf32>
    %202 = arith.addf %199, %201 : vector<1x16xf32>
    %203 = math.tanh %202 : vector<1x16xf32>
    %cst_91 = arith.constant 1.000000e+00 : f32
    %204 = vector.broadcast %cst_91 : f32 to vector<1x16xf32>
    %205 = arith.subf %204, %198 : vector<1x16xf32>
    %206 = arith.mulf %205, %203 : vector<1x16xf32>
    %207 = arith.mulf %198, %148 : vector<1x16xf32>
    %208 = arith.addf %206, %207 : vector<1x16xf32>
    %c1_92 = arith.constant 1 : index
    %c0_93 = arith.constant 0 : index
    %209 = vector.load %arg22[%c1_92, %c0_93] : memref<16x16xf32, #tpu.memory_space<vmem>>, vector<1x16xf32>
    tpu.vector_store %arg22[%c1_92, %c0_93], %208 {strides = array<i32>} : memref<16x16xf32, #tpu.memory_space<vmem>>, vector<1x16xf32>,
    %c9 = arith.constant 9 : index
    %c0_94 = arith.constant 0 : index
    %210 = vector.load %arg21[%c9, %c0_94] : memref<16x48xf32, #tpu.memory_space<vmem>>, vector<1x48xf32>
    %cst_95 = arith.constant dense<0.000000e+00> : vector<1x48xf32>
    %211 = tpu.matmul %178, %36, %cst_95 {dimension_numbers = #tpu.dot_dimension_numbers<[1], [0], [0], [1], [0, 0, 1, 1], [], []>, precision = #tpu.contract_precision<fp32>} : vector<1x16xf32>, vector<16x48xf32>, vector<1x48xf32> -> vector<1x48xf32>
    %212 = arith.addf %211, %37 : vector<1x48xf32>
    %213 = vector.extract_strided_slice %210 {offsets = [0, 0], sizes = [1, 16], strides = [1, 1]} : vector<1x48xf32> to vector<1x16xf32>
    %214 = vector.extract_strided_slice %212 {offsets = [0, 0], sizes = [1, 16], strides = [1, 1]} : vector<1x48xf32> to vector<1x16xf32>
    %215 = arith.addf %213, %214 : vector<1x16xf32>
    %216 = arith.negf %215 : vector<1x16xf32>
    %217 = math.exp %216 : vector<1x16xf32>
    %cst_96 = arith.constant 1.000000e+00 : f32
    %218 = vector.broadcast %cst_96 : f32 to vector<1x16xf32>
    %219 = arith.addf %218, %217 : vector<1x16xf32>
    %220 = arith.divf %218, %219 : vector<1x16xf32>
    %221 = vector.extract_strided_slice %210 {offsets = [0, 16], sizes = [1, 16], strides = [1, 1]} : vector<1x48xf32> to vector<1x16xf32>
    %222 = vector.extract_strided_slice %212 {offsets = [0, 16], sizes = [1, 16], strides = [1, 1]} : vector<1x48xf32> to vector<1x16xf32>
    %223 = arith.addf %221, %222 : vector<1x16xf32>
    %224 = arith.negf %223 : vector<1x16xf32>
    %225 = math.exp %224 : vector<1x16xf32>
    %cst_97 = arith.constant 1.000000e+00 : f32
    %226 = vector.broadcast %cst_97 : f32 to vector<1x16xf32>
    %227 = arith.addf %226, %225 : vector<1x16xf32>
    %228 = arith.divf %226, %227 : vector<1x16xf32>
    %229 = vector.extract_strided_slice %210 {offsets = [0, 32], sizes = [1, 16], strides = [1, 1]} : vector<1x48xf32> to vector<1x16xf32>
    %230 = vector.extract_strided_slice %212 {offsets = [0, 32], sizes = [1, 16], strides = [1, 1]} : vector<1x48xf32> to vector<1x16xf32>
    %231 = arith.mulf %220, %230 : vector<1x16xf32>
    %232 = arith.addf %229, %231 : vector<1x16xf32>
    %233 = math.tanh %232 : vector<1x16xf32>
    %cst_98 = arith.constant 1.000000e+00 : f32
    %234 = vector.broadcast %cst_98 : f32 to vector<1x16xf32>
    %235 = arith.subf %234, %228 : vector<1x16xf32>
    %236 = arith.mulf %235, %233 : vector<1x16xf32>
    %237 = arith.mulf %228, %178 : vector<1x16xf32>
    %238 = arith.addf %236, %237 : vector<1x16xf32>
    %c9_99 = arith.constant 9 : index
    %c0_100 = arith.constant 0 : index
    %239 = vector.load %arg22[%c9_99, %c0_100] : memref<16x16xf32, #tpu.memory_space<vmem>>, vector<1x16xf32>
    tpu.vector_store %arg22[%c9_99, %c0_100], %238 {strides = array<i32>} : memref<16x16xf32, #tpu.memory_space<vmem>>, vector<1x16xf32>,
    %c2 = arith.constant 2 : index
    %c0_101 = arith.constant 0 : index
    %240 = vector.load %arg21[%c2, %c0_101] : memref<16x48xf32, #tpu.memory_space<vmem>>, vector<1x48xf32>
    %cst_102 = arith.constant dense<0.000000e+00> : vector<1x48xf32>
    %241 = tpu.matmul %208, %36, %cst_102 {dimension_numbers = #tpu.dot_dimension_numbers<[1], [0], [0], [1], [0, 0, 1, 1], [], []>, precision = #tpu.contract_precision<fp32>} : vector<1x16xf32>, vector<16x48xf32>, vector<1x48xf32> -> vector<1x48xf32>
    %242 = arith.addf %241, %37 : vector<1x48xf32>
    %243 = vector.extract_strided_slice %240 {offsets = [0, 0], sizes = [1, 16], strides = [1, 1]} : vector<1x48xf32> to vector<1x16xf32>
    %244 = vector.extract_strided_slice %242 {offsets = [0, 0], sizes = [1, 16], strides = [1, 1]} : vector<1x48xf32> to vector<1x16xf32>
    %245 = arith.addf %243, %244 : vector<1x16xf32>
    %246 = arith.negf %245 : vector<1x16xf32>
    %247 = math.exp %246 : vector<1x16xf32>
    %cst_103 = arith.constant 1.000000e+00 : f32
    %248 = vector.broadcast %cst_103 : f32 to vector<1x16xf32>
    %249 = arith.addf %248, %247 : vector<1x16xf32>
    %250 = arith.divf %248, %249 : vector<1x16xf32>
    %251 = vector.extract_strided_slice %240 {offsets = [0, 16], sizes = [1, 16], strides = [1, 1]} : vector<1x48xf32> to vector<1x16xf32>
    %252 = vector.extract_strided_slice %242 {offsets = [0, 16], sizes = [1, 16], strides = [1, 1]} : vector<1x48xf32> to vector<1x16xf32>
    %253 = arith.addf %251, %252 : vector<1x16xf32>
    %254 = arith.negf %253 : vector<1x16xf32>
    %255 = math.exp %254 : vector<1x16xf32>
    %cst_104 = arith.constant 1.000000e+00 : f32
    %256 = vector.broadcast %cst_104 : f32 to vector<1x16xf32>
    %257 = arith.addf %256, %255 : vector<1x16xf32>
    %258 = arith.divf %256, %257 : vector<1x16xf32>
    %259 = vector.extract_strided_slice %240 {offsets = [0, 32], sizes = [1, 16], strides = [1, 1]} : vector<1x48xf32> to vector<1x16xf32>
    %260 = vector.extract_strided_slice %242 {offsets = [0, 32], sizes = [1, 16], strides = [1, 1]} : vector<1x48xf32> to vector<1x16xf32>
    %261 = arith.mulf %250, %260 : vector<1x16xf32>
    %262 = arith.addf %259, %261 : vector<1x16xf32>
    %263 = math.tanh %262 : vector<1x16xf32>
    %cst_105 = arith.constant 1.000000e+00 : f32
    %264 = vector.broadcast %cst_105 : f32 to vector<1x16xf32>
    %265 = arith.subf %264, %258 : vector<1x16xf32>
    %266 = arith.mulf %265, %263 : vector<1x16xf32>
    %267 = arith.mulf %258, %208 : vector<1x16xf32>
    %268 = arith.addf %266, %267 : vector<1x16xf32>
    %c2_106 = arith.constant 2 : index
    %c0_107 = arith.constant 0 : index
    %269 = vector.load %arg22[%c2_106, %c0_107] : memref<16x16xf32, #tpu.memory_space<vmem>>, vector<1x16xf32>
    tpu.vector_store %arg22[%c2_106, %c0_107], %268 {strides = array<i32>} : memref<16x16xf32, #tpu.memory_space<vmem>>, vector<1x16xf32>,
    %c10 = arith.constant 10 : index
    %c0_108 = arith.constant 0 : index
    %270 = vector.load %arg21[%c10, %c0_108] : memref<16x48xf32, #tpu.memory_space<vmem>>, vector<1x48xf32>
    %cst_109 = arith.constant dense<0.000000e+00> : vector<1x48xf32>
    %271 = tpu.matmul %238, %36, %cst_109 {dimension_numbers = #tpu.dot_dimension_numbers<[1], [0], [0], [1], [0, 0, 1, 1], [], []>, precision = #tpu.contract_precision<fp32>} : vector<1x16xf32>, vector<16x48xf32>, vector<1x48xf32> -> vector<1x48xf32>
    %272 = arith.addf %271, %37 : vector<1x48xf32>
    %273 = vector.extract_strided_slice %270 {offsets = [0, 0], sizes = [1, 16], strides = [1, 1]} : vector<1x48xf32> to vector<1x16xf32>
    %274 = vector.extract_strided_slice %272 {offsets = [0, 0], sizes = [1, 16], strides = [1, 1]} : vector<1x48xf32> to vector<1x16xf32>
    %275 = arith.addf %273, %274 : vector<1x16xf32>
    %276 = arith.negf %275 : vector<1x16xf32>
    %277 = math.exp %276 : vector<1x16xf32>
    %cst_110 = arith.constant 1.000000e+00 : f32
    %278 = vector.broadcast %cst_110 : f32 to vector<1x16xf32>
    %279 = arith.addf %278, %277 : vector<1x16xf32>
    %280 = arith.divf %278, %279 : vector<1x16xf32>
    %281 = vector.extract_strided_slice %270 {offsets = [0, 16], sizes = [1, 16], strides = [1, 1]} : vector<1x48xf32> to vector<1x16xf32>
    %282 = vector.extract_strided_slice %272 {offsets = [0, 16], sizes = [1, 16], strides = [1, 1]} : vector<1x48xf32> to vector<1x16xf32>
    %283 = arith.addf %281, %282 : vector<1x16xf32>
    %284 = arith.negf %283 : vector<1x16xf32>
    %285 = math.exp %284 : vector<1x16xf32>
    %cst_111 = arith.constant 1.000000e+00 : f32
    %286 = vector.broadcast %cst_111 : f32 to vector<1x16xf32>
    %287 = arith.addf %286, %285 : vector<1x16xf32>
    %288 = arith.divf %286, %287 : vector<1x16xf32>
    %289 = vector.extract_strided_slice %270 {offsets = [0, 32], sizes = [1, 16], strides = [1, 1]} : vector<1x48xf32> to vector<1x16xf32>
    %290 = vector.extract_strided_slice %272 {offsets = [0, 32], sizes = [1, 16], strides = [1, 1]} : vector<1x48xf32> to vector<1x16xf32>
    %291 = arith.mulf %280, %290 : vector<1x16xf32>
    %292 = arith.addf %289, %291 : vector<1x16xf32>
    %293 = math.tanh %292 : vector<1x16xf32>
    %cst_112 = arith.constant 1.000000e+00 : f32
    %294 = vector.broadcast %cst_112 : f32 to vector<1x16xf32>
    %295 = arith.subf %294, %288 : vector<1x16xf32>
    %296 = arith.mulf %295, %293 : vector<1x16xf32>
    %297 = arith.mulf %288, %238 : vector<1x16xf32>
    %298 = arith.addf %296, %297 : vector<1x16xf32>
    %c10_113 = arith.constant 10 : index
    %c0_114 = arith.constant 0 : index
    %299 = vector.load %arg22[%c10_113, %c0_114] : memref<16x16xf32, #tpu.memory_space<vmem>>, vector<1x16xf32>
    tpu.vector_store %arg22[%c10_113, %c0_114], %298 {strides = array<i32>} : memref<16x16xf32, #tpu.memory_space<vmem>>, vector<1x16xf32>,
    %c3 = arith.constant 3 : index
    %c0_115 = arith.constant 0 : index
    %300 = vector.load %arg21[%c3, %c0_115] : memref<16x48xf32, #tpu.memory_space<vmem>>, vector<1x48xf32>
    %cst_116 = arith.constant dense<0.000000e+00> : vector<1x48xf32>
    %301 = tpu.matmul %268, %36, %cst_116 {dimension_numbers = #tpu.dot_dimension_numbers<[1], [0], [0], [1], [0, 0, 1, 1], [], []>, precision = #tpu.contract_precision<fp32>} : vector<1x16xf32>, vector<16x48xf32>, vector<1x48xf32> -> vector<1x48xf32>
    %302 = arith.addf %301, %37 : vector<1x48xf32>
    %303 = vector.extract_strided_slice %300 {offsets = [0, 0], sizes = [1, 16], strides = [1, 1]} : vector<1x48xf32> to vector<1x16xf32>
    %304 = vector.extract_strided_slice %302 {offsets = [0, 0], sizes = [1, 16], strides = [1, 1]} : vector<1x48xf32> to vector<1x16xf32>
    %305 = arith.addf %303, %304 : vector<1x16xf32>
    %306 = arith.negf %305 : vector<1x16xf32>
    %307 = math.exp %306 : vector<1x16xf32>
    %cst_117 = arith.constant 1.000000e+00 : f32
    %308 = vector.broadcast %cst_117 : f32 to vector<1x16xf32>
    %309 = arith.addf %308, %307 : vector<1x16xf32>
    %310 = arith.divf %308, %309 : vector<1x16xf32>
    %311 = vector.extract_strided_slice %300 {offsets = [0, 16], sizes = [1, 16], strides = [1, 1]} : vector<1x48xf32> to vector<1x16xf32>
    %312 = vector.extract_strided_slice %302 {offsets = [0, 16], sizes = [1, 16], strides = [1, 1]} : vector<1x48xf32> to vector<1x16xf32>
    %313 = arith.addf %311, %312 : vector<1x16xf32>
    %314 = arith.negf %313 : vector<1x16xf32>
    %315 = math.exp %314 : vector<1x16xf32>
    %cst_118 = arith.constant 1.000000e+00 : f32
    %316 = vector.broadcast %cst_118 : f32 to vector<1x16xf32>
    %317 = arith.addf %316, %315 : vector<1x16xf32>
    %318 = arith.divf %316, %317 : vector<1x16xf32>
    %319 = vector.extract_strided_slice %300 {offsets = [0, 32], sizes = [1, 16], strides = [1, 1]} : vector<1x48xf32> to vector<1x16xf32>
    %320 = vector.extract_strided_slice %302 {offsets = [0, 32], sizes = [1, 16], strides = [1, 1]} : vector<1x48xf32> to vector<1x16xf32>
    %321 = arith.mulf %310, %320 : vector<1x16xf32>
    %322 = arith.addf %319, %321 : vector<1x16xf32>
    %323 = math.tanh %322 : vector<1x16xf32>
    %cst_119 = arith.constant 1.000000e+00 : f32
    %324 = vector.broadcast %cst_119 : f32 to vector<1x16xf32>
    %325 = arith.subf %324, %318 : vector<1x16xf32>
    %326 = arith.mulf %325, %323 : vector<1x16xf32>
    %327 = arith.mulf %318, %268 : vector<1x16xf32>
    %328 = arith.addf %326, %327 : vector<1x16xf32>
    %c3_120 = arith.constant 3 : index
    %c0_121 = arith.constant 0 : index
    %329 = vector.load %arg22[%c3_120, %c0_121] : memref<16x16xf32, #tpu.memory_space<vmem>>, vector<1x16xf32>
    tpu.vector_store %arg22[%c3_120, %c0_121], %328 {strides = array<i32>} : memref<16x16xf32, #tpu.memory_space<vmem>>, vector<1x16xf32>,
    %c11 = arith.constant 11 : index
    %c0_122 = arith.constant 0 : index
    %330 = vector.load %arg21[%c11, %c0_122] : memref<16x48xf32, #tpu.memory_space<vmem>>, vector<1x48xf32>
    %cst_123 = arith.constant dense<0.000000e+00> : vector<1x48xf32>
    %331 = tpu.matmul %298, %36, %cst_123 {dimension_numbers = #tpu.dot_dimension_numbers<[1], [0], [0], [1], [0, 0, 1, 1], [], []>, precision = #tpu.contract_precision<fp32>} : vector<1x16xf32>, vector<16x48xf32>, vector<1x48xf32> -> vector<1x48xf32>
    %332 = arith.addf %331, %37 : vector<1x48xf32>
    %333 = vector.extract_strided_slice %330 {offsets = [0, 0], sizes = [1, 16], strides = [1, 1]} : vector<1x48xf32> to vector<1x16xf32>
    %334 = vector.extract_strided_slice %332 {offsets = [0, 0], sizes = [1, 16], strides = [1, 1]} : vector<1x48xf32> to vector<1x16xf32>
    %335 = arith.addf %333, %334 : vector<1x16xf32>
    %336 = arith.negf %335 : vector<1x16xf32>
    %337 = math.exp %336 : vector<1x16xf32>
    %cst_124 = arith.constant 1.000000e+00 : f32
    %338 = vector.broadcast %cst_124 : f32 to vector<1x16xf32>
    %339 = arith.addf %338, %337 : vector<1x16xf32>
    %340 = arith.divf %338, %339 : vector<1x16xf32>
    %341 = vector.extract_strided_slice %330 {offsets = [0, 16], sizes = [1, 16], strides = [1, 1]} : vector<1x48xf32> to vector<1x16xf32>
    %342 = vector.extract_strided_slice %332 {offsets = [0, 16], sizes = [1, 16], strides = [1, 1]} : vector<1x48xf32> to vector<1x16xf32>
    %343 = arith.addf %341, %342 : vector<1x16xf32>
    %344 = arith.negf %343 : vector<1x16xf32>
    %345 = math.exp %344 : vector<1x16xf32>
    %cst_125 = arith.constant 1.000000e+00 : f32
    %346 = vector.broadcast %cst_125 : f32 to vector<1x16xf32>
    %347 = arith.addf %346, %345 : vector<1x16xf32>
    %348 = arith.divf %346, %347 : vector<1x16xf32>
    %349 = vector.extract_strided_slice %330 {offsets = [0, 32], sizes = [1, 16], strides = [1, 1]} : vector<1x48xf32> to vector<1x16xf32>
    %350 = vector.extract_strided_slice %332 {offsets = [0, 32], sizes = [1, 16], strides = [1, 1]} : vector<1x48xf32> to vector<1x16xf32>
    %351 = arith.mulf %340, %350 : vector<1x16xf32>
    %352 = arith.addf %349, %351 : vector<1x16xf32>
    %353 = math.tanh %352 : vector<1x16xf32>
    %cst_126 = arith.constant 1.000000e+00 : f32
    %354 = vector.broadcast %cst_126 : f32 to vector<1x16xf32>
    %355 = arith.subf %354, %348 : vector<1x16xf32>
    %356 = arith.mulf %355, %353 : vector<1x16xf32>
    %357 = arith.mulf %348, %298 : vector<1x16xf32>
    %358 = arith.addf %356, %357 : vector<1x16xf32>
    %c11_127 = arith.constant 11 : index
    %c0_128 = arith.constant 0 : index
    %359 = vector.load %arg22[%c11_127, %c0_128] : memref<16x16xf32, #tpu.memory_space<vmem>>, vector<1x16xf32>
    tpu.vector_store %arg22[%c11_127, %c0_128], %358 {strides = array<i32>} : memref<16x16xf32, #tpu.memory_space<vmem>>, vector<1x16xf32>,
    %c4 = arith.constant 4 : index
    %c0_129 = arith.constant 0 : index
    %360 = vector.load %arg21[%c4, %c0_129] : memref<16x48xf32, #tpu.memory_space<vmem>>, vector<1x48xf32>
    %cst_130 = arith.constant dense<0.000000e+00> : vector<1x48xf32>
    %361 = tpu.matmul %328, %36, %cst_130 {dimension_numbers = #tpu.dot_dimension_numbers<[1], [0], [0], [1], [0, 0, 1, 1], [], []>, precision = #tpu.contract_precision<fp32>} : vector<1x16xf32>, vector<16x48xf32>, vector<1x48xf32> -> vector<1x48xf32>
    %362 = arith.addf %361, %37 : vector<1x48xf32>
    %363 = vector.extract_strided_slice %360 {offsets = [0, 0], sizes = [1, 16], strides = [1, 1]} : vector<1x48xf32> to vector<1x16xf32>
    %364 = vector.extract_strided_slice %362 {offsets = [0, 0], sizes = [1, 16], strides = [1, 1]} : vector<1x48xf32> to vector<1x16xf32>
    %365 = arith.addf %363, %364 : vector<1x16xf32>
    %366 = arith.negf %365 : vector<1x16xf32>
    %367 = math.exp %366 : vector<1x16xf32>
    %cst_131 = arith.constant 1.000000e+00 : f32
    %368 = vector.broadcast %cst_131 : f32 to vector<1x16xf32>
    %369 = arith.addf %368, %367 : vector<1x16xf32>
    %370 = arith.divf %368, %369 : vector<1x16xf32>
    %371 = vector.extract_strided_slice %360 {offsets = [0, 16], sizes = [1, 16], strides = [1, 1]} : vector<1x48xf32> to vector<1x16xf32>
    %372 = vector.extract_strided_slice %362 {offsets = [0, 16], sizes = [1, 16], strides = [1, 1]} : vector<1x48xf32> to vector<1x16xf32>
    %373 = arith.addf %371, %372 : vector<1x16xf32>
    %374 = arith.negf %373 : vector<1x16xf32>
    %375 = math.exp %374 : vector<1x16xf32>
    %cst_132 = arith.constant 1.000000e+00 : f32
    %376 = vector.broadcast %cst_132 : f32 to vector<1x16xf32>
    %377 = arith.addf %376, %375 : vector<1x16xf32>
    %378 = arith.divf %376, %377 : vector<1x16xf32>
    %379 = vector.extract_strided_slice %360 {offsets = [0, 32], sizes = [1, 16], strides = [1, 1]} : vector<1x48xf32> to vector<1x16xf32>
    %380 = vector.extract_strided_slice %362 {offsets = [0, 32], sizes = [1, 16], strides = [1, 1]} : vector<1x48xf32> to vector<1x16xf32>
    %381 = arith.mulf %370, %380 : vector<1x16xf32>
    %382 = arith.addf %379, %381 : vector<1x16xf32>
    %383 = math.tanh %382 : vector<1x16xf32>
    %cst_133 = arith.constant 1.000000e+00 : f32
    %384 = vector.broadcast %cst_133 : f32 to vector<1x16xf32>
    %385 = arith.subf %384, %378 : vector<1x16xf32>
    %386 = arith.mulf %385, %383 : vector<1x16xf32>
    %387 = arith.mulf %378, %328 : vector<1x16xf32>
    %388 = arith.addf %386, %387 : vector<1x16xf32>
    %c4_134 = arith.constant 4 : index
    %c0_135 = arith.constant 0 : index
    %389 = vector.load %arg22[%c4_134, %c0_135] : memref<16x16xf32, #tpu.memory_space<vmem>>, vector<1x16xf32>
    tpu.vector_store %arg22[%c4_134, %c0_135], %388 {strides = array<i32>} : memref<16x16xf32, #tpu.memory_space<vmem>>, vector<1x16xf32>,
    %c12 = arith.constant 12 : index
    %c0_136 = arith.constant 0 : index
    %390 = vector.load %arg21[%c12, %c0_136] : memref<16x48xf32, #tpu.memory_space<vmem>>, vector<1x48xf32>
    %cst_137 = arith.constant dense<0.000000e+00> : vector<1x48xf32>
    %391 = tpu.matmul %358, %36, %cst_137 {dimension_numbers = #tpu.dot_dimension_numbers<[1], [0], [0], [1], [0, 0, 1, 1], [], []>, precision = #tpu.contract_precision<fp32>} : vector<1x16xf32>, vector<16x48xf32>, vector<1x48xf32> -> vector<1x48xf32>
    %392 = arith.addf %391, %37 : vector<1x48xf32>
    %393 = vector.extract_strided_slice %390 {offsets = [0, 0], sizes = [1, 16], strides = [1, 1]} : vector<1x48xf32> to vector<1x16xf32>
    %394 = vector.extract_strided_slice %392 {offsets = [0, 0], sizes = [1, 16], strides = [1, 1]} : vector<1x48xf32> to vector<1x16xf32>
    %395 = arith.addf %393, %394 : vector<1x16xf32>
    %396 = arith.negf %395 : vector<1x16xf32>
    %397 = math.exp %396 : vector<1x16xf32>
    %cst_138 = arith.constant 1.000000e+00 : f32
    %398 = vector.broadcast %cst_138 : f32 to vector<1x16xf32>
    %399 = arith.addf %398, %397 : vector<1x16xf32>
    %400 = arith.divf %398, %399 : vector<1x16xf32>
    %401 = vector.extract_strided_slice %390 {offsets = [0, 16], sizes = [1, 16], strides = [1, 1]} : vector<1x48xf32> to vector<1x16xf32>
    %402 = vector.extract_strided_slice %392 {offsets = [0, 16], sizes = [1, 16], strides = [1, 1]} : vector<1x48xf32> to vector<1x16xf32>
    %403 = arith.addf %401, %402 : vector<1x16xf32>
    %404 = arith.negf %403 : vector<1x16xf32>
    %405 = math.exp %404 : vector<1x16xf32>
    %cst_139 = arith.constant 1.000000e+00 : f32
    %406 = vector.broadcast %cst_139 : f32 to vector<1x16xf32>
    %407 = arith.addf %406, %405 : vector<1x16xf32>
    %408 = arith.divf %406, %407 : vector<1x16xf32>
    %409 = vector.extract_strided_slice %390 {offsets = [0, 32], sizes = [1, 16], strides = [1, 1]} : vector<1x48xf32> to vector<1x16xf32>
    %410 = vector.extract_strided_slice %392 {offsets = [0, 32], sizes = [1, 16], strides = [1, 1]} : vector<1x48xf32> to vector<1x16xf32>
    %411 = arith.mulf %400, %410 : vector<1x16xf32>
    %412 = arith.addf %409, %411 : vector<1x16xf32>
    %413 = math.tanh %412 : vector<1x16xf32>
    %cst_140 = arith.constant 1.000000e+00 : f32
    %414 = vector.broadcast %cst_140 : f32 to vector<1x16xf32>
    %415 = arith.subf %414, %408 : vector<1x16xf32>
    %416 = arith.mulf %415, %413 : vector<1x16xf32>
    %417 = arith.mulf %408, %358 : vector<1x16xf32>
    %418 = arith.addf %416, %417 : vector<1x16xf32>
    %c12_141 = arith.constant 12 : index
    %c0_142 = arith.constant 0 : index
    %419 = vector.load %arg22[%c12_141, %c0_142] : memref<16x16xf32, #tpu.memory_space<vmem>>, vector<1x16xf32>
    tpu.vector_store %arg22[%c12_141, %c0_142], %418 {strides = array<i32>} : memref<16x16xf32, #tpu.memory_space<vmem>>, vector<1x16xf32>,
    %c5 = arith.constant 5 : index
    %c0_143 = arith.constant 0 : index
    %420 = vector.load %arg21[%c5, %c0_143] : memref<16x48xf32, #tpu.memory_space<vmem>>, vector<1x48xf32>
    %cst_144 = arith.constant dense<0.000000e+00> : vector<1x48xf32>
    %421 = tpu.matmul %388, %36, %cst_144 {dimension_numbers = #tpu.dot_dimension_numbers<[1], [0], [0], [1], [0, 0, 1, 1], [], []>, precision = #tpu.contract_precision<fp32>} : vector<1x16xf32>, vector<16x48xf32>, vector<1x48xf32> -> vector<1x48xf32>
    %422 = arith.addf %421, %37 : vector<1x48xf32>
    %423 = vector.extract_strided_slice %420 {offsets = [0, 0], sizes = [1, 16], strides = [1, 1]} : vector<1x48xf32> to vector<1x16xf32>
    %424 = vector.extract_strided_slice %422 {offsets = [0, 0], sizes = [1, 16], strides = [1, 1]} : vector<1x48xf32> to vector<1x16xf32>
    %425 = arith.addf %423, %424 : vector<1x16xf32>
    %426 = arith.negf %425 : vector<1x16xf32>
    %427 = math.exp %426 : vector<1x16xf32>
    %cst_145 = arith.constant 1.000000e+00 : f32
    %428 = vector.broadcast %cst_145 : f32 to vector<1x16xf32>
    %429 = arith.addf %428, %427 : vector<1x16xf32>
    %430 = arith.divf %428, %429 : vector<1x16xf32>
    %431 = vector.extract_strided_slice %420 {offsets = [0, 16], sizes = [1, 16], strides = [1, 1]} : vector<1x48xf32> to vector<1x16xf32>
    %432 = vector.extract_strided_slice %422 {offsets = [0, 16], sizes = [1, 16], strides = [1, 1]} : vector<1x48xf32> to vector<1x16xf32>
    %433 = arith.addf %431, %432 : vector<1x16xf32>
    %434 = arith.negf %433 : vector<1x16xf32>
    %435 = math.exp %434 : vector<1x16xf32>
    %cst_146 = arith.constant 1.000000e+00 : f32
    %436 = vector.broadcast %cst_146 : f32 to vector<1x16xf32>
    %437 = arith.addf %436, %435 : vector<1x16xf32>
    %438 = arith.divf %436, %437 : vector<1x16xf32>
    %439 = vector.extract_strided_slice %420 {offsets = [0, 32], sizes = [1, 16], strides = [1, 1]} : vector<1x48xf32> to vector<1x16xf32>
    %440 = vector.extract_strided_slice %422 {offsets = [0, 32], sizes = [1, 16], strides = [1, 1]} : vector<1x48xf32> to vector<1x16xf32>
    %441 = arith.mulf %430, %440 : vector<1x16xf32>
    %442 = arith.addf %439, %441 : vector<1x16xf32>
    %443 = math.tanh %442 : vector<1x16xf32>
    %cst_147 = arith.constant 1.000000e+00 : f32
    %444 = vector.broadcast %cst_147 : f32 to vector<1x16xf32>
    %445 = arith.subf %444, %438 : vector<1x16xf32>
    %446 = arith.mulf %445, %443 : vector<1x16xf32>
    %447 = arith.mulf %438, %388 : vector<1x16xf32>
    %448 = arith.addf %446, %447 : vector<1x16xf32>
    %c5_148 = arith.constant 5 : index
    %c0_149 = arith.constant 0 : index
    %449 = vector.load %arg22[%c5_148, %c0_149] : memref<16x16xf32, #tpu.memory_space<vmem>>, vector<1x16xf32>
    tpu.vector_store %arg22[%c5_148, %c0_149], %448 {strides = array<i32>} : memref<16x16xf32, #tpu.memory_space<vmem>>, vector<1x16xf32>,
    %c13 = arith.constant 13 : index
    %c0_150 = arith.constant 0 : index
    %450 = vector.load %arg21[%c13, %c0_150] : memref<16x48xf32, #tpu.memory_space<vmem>>, vector<1x48xf32>
    %cst_151 = arith.constant dense<0.000000e+00> : vector<1x48xf32>
    %451 = tpu.matmul %418, %36, %cst_151 {dimension_numbers = #tpu.dot_dimension_numbers<[1], [0], [0], [1], [0, 0, 1, 1], [], []>, precision = #tpu.contract_precision<fp32>} : vector<1x16xf32>, vector<16x48xf32>, vector<1x48xf32> -> vector<1x48xf32>
    %452 = arith.addf %451, %37 : vector<1x48xf32>
    %453 = vector.extract_strided_slice %450 {offsets = [0, 0], sizes = [1, 16], strides = [1, 1]} : vector<1x48xf32> to vector<1x16xf32>
    %454 = vector.extract_strided_slice %452 {offsets = [0, 0], sizes = [1, 16], strides = [1, 1]} : vector<1x48xf32> to vector<1x16xf32>
    %455 = arith.addf %453, %454 : vector<1x16xf32>
    %456 = arith.negf %455 : vector<1x16xf32>
    %457 = math.exp %456 : vector<1x16xf32>
    %cst_152 = arith.constant 1.000000e+00 : f32
    %458 = vector.broadcast %cst_152 : f32 to vector<1x16xf32>
    %459 = arith.addf %458, %457 : vector<1x16xf32>
    %460 = arith.divf %458, %459 : vector<1x16xf32>
    %461 = vector.extract_strided_slice %450 {offsets = [0, 16], sizes = [1, 16], strides = [1, 1]} : vector<1x48xf32> to vector<1x16xf32>
    %462 = vector.extract_strided_slice %452 {offsets = [0, 16], sizes = [1, 16], strides = [1, 1]} : vector<1x48xf32> to vector<1x16xf32>
    %463 = arith.addf %461, %462 : vector<1x16xf32>
    %464 = arith.negf %463 : vector<1x16xf32>
    %465 = math.exp %464 : vector<1x16xf32>
    %cst_153 = arith.constant 1.000000e+00 : f32
    %466 = vector.broadcast %cst_153 : f32 to vector<1x16xf32>
    %467 = arith.addf %466, %465 : vector<1x16xf32>
    %468 = arith.divf %466, %467 : vector<1x16xf32>
    %469 = vector.extract_strided_slice %450 {offsets = [0, 32], sizes = [1, 16], strides = [1, 1]} : vector<1x48xf32> to vector<1x16xf32>
    %470 = vector.extract_strided_slice %452 {offsets = [0, 32], sizes = [1, 16], strides = [1, 1]} : vector<1x48xf32> to vector<1x16xf32>
    %471 = arith.mulf %460, %470 : vector<1x16xf32>
    %472 = arith.addf %469, %471 : vector<1x16xf32>
    %473 = math.tanh %472 : vector<1x16xf32>
    %cst_154 = arith.constant 1.000000e+00 : f32
    %474 = vector.broadcast %cst_154 : f32 to vector<1x16xf32>
    %475 = arith.subf %474, %468 : vector<1x16xf32>
    %476 = arith.mulf %475, %473 : vector<1x16xf32>
    %477 = arith.mulf %468, %418 : vector<1x16xf32>
    %478 = arith.addf %476, %477 : vector<1x16xf32>
    %c13_155 = arith.constant 13 : index
    %c0_156 = arith.constant 0 : index
    %479 = vector.load %arg22[%c13_155, %c0_156] : memref<16x16xf32, #tpu.memory_space<vmem>>, vector<1x16xf32>
    tpu.vector_store %arg22[%c13_155, %c0_156], %478 {strides = array<i32>} : memref<16x16xf32, #tpu.memory_space<vmem>>, vector<1x16xf32>,
    %c6 = arith.constant 6 : index
    %c0_157 = arith.constant 0 : index
    %480 = vector.load %arg21[%c6, %c0_157] : memref<16x48xf32, #tpu.memory_space<vmem>>, vector<1x48xf32>
    %cst_158 = arith.constant dense<0.000000e+00> : vector<1x48xf32>
    %481 = tpu.matmul %448, %36, %cst_158 {dimension_numbers = #tpu.dot_dimension_numbers<[1], [0], [0], [1], [0, 0, 1, 1], [], []>, precision = #tpu.contract_precision<fp32>} : vector<1x16xf32>, vector<16x48xf32>, vector<1x48xf32> -> vector<1x48xf32>
    %482 = arith.addf %481, %37 : vector<1x48xf32>
    %483 = vector.extract_strided_slice %480 {offsets = [0, 0], sizes = [1, 16], strides = [1, 1]} : vector<1x48xf32> to vector<1x16xf32>
    %484 = vector.extract_strided_slice %482 {offsets = [0, 0], sizes = [1, 16], strides = [1, 1]} : vector<1x48xf32> to vector<1x16xf32>
    %485 = arith.addf %483, %484 : vector<1x16xf32>
    %486 = arith.negf %485 : vector<1x16xf32>
    %487 = math.exp %486 : vector<1x16xf32>
    %cst_159 = arith.constant 1.000000e+00 : f32
    %488 = vector.broadcast %cst_159 : f32 to vector<1x16xf32>
    %489 = arith.addf %488, %487 : vector<1x16xf32>
    %490 = arith.divf %488, %489 : vector<1x16xf32>
    %491 = vector.extract_strided_slice %480 {offsets = [0, 16], sizes = [1, 16], strides = [1, 1]} : vector<1x48xf32> to vector<1x16xf32>
    %492 = vector.extract_strided_slice %482 {offsets = [0, 16], sizes = [1, 16], strides = [1, 1]} : vector<1x48xf32> to vector<1x16xf32>
    %493 = arith.addf %491, %492 : vector<1x16xf32>
    %494 = arith.negf %493 : vector<1x16xf32>
    %495 = math.exp %494 : vector<1x16xf32>
    %cst_160 = arith.constant 1.000000e+00 : f32
    %496 = vector.broadcast %cst_160 : f32 to vector<1x16xf32>
    %497 = arith.addf %496, %495 : vector<1x16xf32>
    %498 = arith.divf %496, %497 : vector<1x16xf32>
    %499 = vector.extract_strided_slice %480 {offsets = [0, 32], sizes = [1, 16], strides = [1, 1]} : vector<1x48xf32> to vector<1x16xf32>
    %500 = vector.extract_strided_slice %482 {offsets = [0, 32], sizes = [1, 16], strides = [1, 1]} : vector<1x48xf32> to vector<1x16xf32>
    %501 = arith.mulf %490, %500 : vector<1x16xf32>
    %502 = arith.addf %499, %501 : vector<1x16xf32>
    %503 = math.tanh %502 : vector<1x16xf32>
    %cst_161 = arith.constant 1.000000e+00 : f32
    %504 = vector.broadcast %cst_161 : f32 to vector<1x16xf32>
    %505 = arith.subf %504, %498 : vector<1x16xf32>
    %506 = arith.mulf %505, %503 : vector<1x16xf32>
    %507 = arith.mulf %498, %448 : vector<1x16xf32>
    %508 = arith.addf %506, %507 : vector<1x16xf32>
    %c6_162 = arith.constant 6 : index
    %c0_163 = arith.constant 0 : index
    %509 = vector.load %arg22[%c6_162, %c0_163] : memref<16x16xf32, #tpu.memory_space<vmem>>, vector<1x16xf32>
    tpu.vector_store %arg22[%c6_162, %c0_163], %508 {strides = array<i32>} : memref<16x16xf32, #tpu.memory_space<vmem>>, vector<1x16xf32>,
    %c14 = arith.constant 14 : index
    %c0_164 = arith.constant 0 : index
    %510 = vector.load %arg21[%c14, %c0_164] : memref<16x48xf32, #tpu.memory_space<vmem>>, vector<1x48xf32>
    %cst_165 = arith.constant dense<0.000000e+00> : vector<1x48xf32>
    %511 = tpu.matmul %478, %36, %cst_165 {dimension_numbers = #tpu.dot_dimension_numbers<[1], [0], [0], [1], [0, 0, 1, 1], [], []>, precision = #tpu.contract_precision<fp32>} : vector<1x16xf32>, vector<16x48xf32>, vector<1x48xf32> -> vector<1x48xf32>
    %512 = arith.addf %511, %37 : vector<1x48xf32>
    %513 = vector.extract_strided_slice %510 {offsets = [0, 0], sizes = [1, 16], strides = [1, 1]} : vector<1x48xf32> to vector<1x16xf32>
    %514 = vector.extract_strided_slice %512 {offsets = [0, 0], sizes = [1, 16], strides = [1, 1]} : vector<1x48xf32> to vector<1x16xf32>
    %515 = arith.addf %513, %514 : vector<1x16xf32>
    %516 = arith.negf %515 : vector<1x16xf32>
    %517 = math.exp %516 : vector<1x16xf32>
    %cst_166 = arith.constant 1.000000e+00 : f32
    %518 = vector.broadcast %cst_166 : f32 to vector<1x16xf32>
    %519 = arith.addf %518, %517 : vector<1x16xf32>
    %520 = arith.divf %518, %519 : vector<1x16xf32>
    %521 = vector.extract_strided_slice %510 {offsets = [0, 16], sizes = [1, 16], strides = [1, 1]} : vector<1x48xf32> to vector<1x16xf32>
    %522 = vector.extract_strided_slice %512 {offsets = [0, 16], sizes = [1, 16], strides = [1, 1]} : vector<1x48xf32> to vector<1x16xf32>
    %523 = arith.addf %521, %522 : vector<1x16xf32>
    %524 = arith.negf %523 : vector<1x16xf32>
    %525 = math.exp %524 : vector<1x16xf32>
    %cst_167 = arith.constant 1.000000e+00 : f32
    %526 = vector.broadcast %cst_167 : f32 to vector<1x16xf32>
    %527 = arith.addf %526, %525 : vector<1x16xf32>
    %528 = arith.divf %526, %527 : vector<1x16xf32>
    %529 = vector.extract_strided_slice %510 {offsets = [0, 32], sizes = [1, 16], strides = [1, 1]} : vector<1x48xf32> to vector<1x16xf32>
    %530 = vector.extract_strided_slice %512 {offsets = [0, 32], sizes = [1, 16], strides = [1, 1]} : vector<1x48xf32> to vector<1x16xf32>
    %531 = arith.mulf %520, %530 : vector<1x16xf32>
    %532 = arith.addf %529, %531 : vector<1x16xf32>
    %533 = math.tanh %532 : vector<1x16xf32>
    %cst_168 = arith.constant 1.000000e+00 : f32
    %534 = vector.broadcast %cst_168 : f32 to vector<1x16xf32>
    %535 = arith.subf %534, %528 : vector<1x16xf32>
    %536 = arith.mulf %535, %533 : vector<1x16xf32>
    %537 = arith.mulf %528, %478 : vector<1x16xf32>
    %538 = arith.addf %536, %537 : vector<1x16xf32>
    %c14_169 = arith.constant 14 : index
    %c0_170 = arith.constant 0 : index
    %539 = vector.load %arg22[%c14_169, %c0_170] : memref<16x16xf32, #tpu.memory_space<vmem>>, vector<1x16xf32>
    tpu.vector_store %arg22[%c14_169, %c0_170], %538 {strides = array<i32>} : memref<16x16xf32, #tpu.memory_space<vmem>>, vector<1x16xf32>,
    %c7 = arith.constant 7 : index
    %c0_171 = arith.constant 0 : index
    %540 = vector.load %arg21[%c7, %c0_171] : memref<16x48xf32, #tpu.memory_space<vmem>>, vector<1x48xf32>
    %cst_172 = arith.constant dense<0.000000e+00> : vector<1x48xf32>
    %541 = tpu.matmul %508, %36, %cst_172 {dimension_numbers = #tpu.dot_dimension_numbers<[1], [0], [0], [1], [0, 0, 1, 1], [], []>, precision = #tpu.contract_precision<fp32>} : vector<1x16xf32>, vector<16x48xf32>, vector<1x48xf32> -> vector<1x48xf32>
    %542 = arith.addf %541, %37 : vector<1x48xf32>
    %543 = vector.extract_strided_slice %540 {offsets = [0, 0], sizes = [1, 16], strides = [1, 1]} : vector<1x48xf32> to vector<1x16xf32>
    %544 = vector.extract_strided_slice %542 {offsets = [0, 0], sizes = [1, 16], strides = [1, 1]} : vector<1x48xf32> to vector<1x16xf32>
    %545 = arith.addf %543, %544 : vector<1x16xf32>
    %546 = arith.negf %545 : vector<1x16xf32>
    %547 = math.exp %546 : vector<1x16xf32>
    %cst_173 = arith.constant 1.000000e+00 : f32
    %548 = vector.broadcast %cst_173 : f32 to vector<1x16xf32>
    %549 = arith.addf %548, %547 : vector<1x16xf32>
    %550 = arith.divf %548, %549 : vector<1x16xf32>
    %551 = vector.extract_strided_slice %540 {offsets = [0, 16], sizes = [1, 16], strides = [1, 1]} : vector<1x48xf32> to vector<1x16xf32>
    %552 = vector.extract_strided_slice %542 {offsets = [0, 16], sizes = [1, 16], strides = [1, 1]} : vector<1x48xf32> to vector<1x16xf32>
    %553 = arith.addf %551, %552 : vector<1x16xf32>
    %554 = arith.negf %553 : vector<1x16xf32>
    %555 = math.exp %554 : vector<1x16xf32>
    %cst_174 = arith.constant 1.000000e+00 : f32
    %556 = vector.broadcast %cst_174 : f32 to vector<1x16xf32>
    %557 = arith.addf %556, %555 : vector<1x16xf32>
    %558 = arith.divf %556, %557 : vector<1x16xf32>
    %559 = vector.extract_strided_slice %540 {offsets = [0, 32], sizes = [1, 16], strides = [1, 1]} : vector<1x48xf32> to vector<1x16xf32>
    %560 = vector.extract_strided_slice %542 {offsets = [0, 32], sizes = [1, 16], strides = [1, 1]} : vector<1x48xf32> to vector<1x16xf32>
    %561 = arith.mulf %550, %560 : vector<1x16xf32>
    %562 = arith.addf %559, %561 : vector<1x16xf32>
    %563 = math.tanh %562 : vector<1x16xf32>
    %cst_175 = arith.constant 1.000000e+00 : f32
    %564 = vector.broadcast %cst_175 : f32 to vector<1x16xf32>
    %565 = arith.subf %564, %558 : vector<1x16xf32>
    %566 = arith.mulf %565, %563 : vector<1x16xf32>
    %567 = arith.mulf %558, %508 : vector<1x16xf32>
    %568 = arith.addf %566, %567 : vector<1x16xf32>
    %c7_176 = arith.constant 7 : index
    %c0_177 = arith.constant 0 : index
    %569 = vector.load %arg22[%c7_176, %c0_177] : memref<16x16xf32, #tpu.memory_space<vmem>>, vector<1x16xf32>
    tpu.vector_store %arg22[%c7_176, %c0_177], %568 {strides = array<i32>} : memref<16x16xf32, #tpu.memory_space<vmem>>, vector<1x16xf32>,
    %c15 = arith.constant 15 : index
    %c0_178 = arith.constant 0 : index
    %570 = vector.load %arg21[%c15, %c0_178] : memref<16x48xf32, #tpu.memory_space<vmem>>, vector<1x48xf32>
    %cst_179 = arith.constant dense<0.000000e+00> : vector<1x48xf32>
    %571 = tpu.matmul %538, %36, %cst_179 {dimension_numbers = #tpu.dot_dimension_numbers<[1], [0], [0], [1], [0, 0, 1, 1], [], []>, precision = #tpu.contract_precision<fp32>} : vector<1x16xf32>, vector<16x48xf32>, vector<1x48xf32> -> vector<1x48xf32>
    %572 = arith.addf %571, %37 : vector<1x48xf32>
    %573 = vector.extract_strided_slice %570 {offsets = [0, 0], sizes = [1, 16], strides = [1, 1]} : vector<1x48xf32> to vector<1x16xf32>
    %574 = vector.extract_strided_slice %572 {offsets = [0, 0], sizes = [1, 16], strides = [1, 1]} : vector<1x48xf32> to vector<1x16xf32>
    %575 = arith.addf %573, %574 : vector<1x16xf32>
    %576 = arith.negf %575 : vector<1x16xf32>
    %577 = math.exp %576 : vector<1x16xf32>
    %cst_180 = arith.constant 1.000000e+00 : f32
    %578 = vector.broadcast %cst_180 : f32 to vector<1x16xf32>
    %579 = arith.addf %578, %577 : vector<1x16xf32>
    %580 = arith.divf %578, %579 : vector<1x16xf32>
    %581 = vector.extract_strided_slice %570 {offsets = [0, 16], sizes = [1, 16], strides = [1, 1]} : vector<1x48xf32> to vector<1x16xf32>
    %582 = vector.extract_strided_slice %572 {offsets = [0, 16], sizes = [1, 16], strides = [1, 1]} : vector<1x48xf32> to vector<1x16xf32>
    %583 = arith.addf %581, %582 : vector<1x16xf32>
    %584 = arith.negf %583 : vector<1x16xf32>
    %585 = math.exp %584 : vector<1x16xf32>
    %cst_181 = arith.constant 1.000000e+00 : f32
    %586 = vector.broadcast %cst_181 : f32 to vector<1x16xf32>
    %587 = arith.addf %586, %585 : vector<1x16xf32>
    %588 = arith.divf %586, %587 : vector<1x16xf32>
    %589 = vector.extract_strided_slice %570 {offsets = [0, 32], sizes = [1, 16], strides = [1, 1]} : vector<1x48xf32> to vector<1x16xf32>
    %590 = vector.extract_strided_slice %572 {offsets = [0, 32], sizes = [1, 16], strides = [1, 1]} : vector<1x48xf32> to vector<1x16xf32>
    %591 = arith.mulf %580, %590 : vector<1x16xf32>
    %592 = arith.addf %589, %591 : vector<1x16xf32>
    %593 = math.tanh %592 : vector<1x16xf32>
    %cst_182 = arith.constant 1.000000e+00 : f32
    %594 = vector.broadcast %cst_182 : f32 to vector<1x16xf32>
    %595 = arith.subf %594, %588 : vector<1x16xf32>
    %596 = arith.mulf %595, %593 : vector<1x16xf32>
    %597 = arith.mulf %588, %538 : vector<1x16xf32>
    %598 = arith.addf %596, %597 : vector<1x16xf32>
    %c15_183 = arith.constant 15 : index
    %c0_184 = arith.constant 0 : index
    %599 = vector.load %arg22[%c15_183, %c0_184] : memref<16x16xf32, #tpu.memory_space<vmem>>, vector<1x16xf32>
    tpu.vector_store %arg22[%c15_183, %c0_184], %598 {strides = array<i32>} : memref<16x16xf32, #tpu.memory_space<vmem>>, vector<1x16xf32>,
    %c0_185 = arith.constant 0 : index
    %c0_186 = arith.constant 0 : index
    %600 = vector.load %arg22[%c0_185, %c0_186] : memref<16x16xf32, #tpu.memory_space<vmem>>, vector<16x16xf32>
    %c0_187 = arith.constant 0 : index
    %c0_188 = arith.constant 0 : index
    %601 = vector.load %arg18[%c0_187, %c0_188] : memref<16x11xf32, #tpu.memory_space<vmem>>, vector<16x11xf32>
    %cst_189 = arith.constant dense<0.000000e+00> : vector<16x11xf32>
    %602 = tpu.matmul %600, %601, %cst_189 {dimension_numbers = #tpu.dot_dimension_numbers<[1], [0], [0], [1], [0, 0, 1, 1], [], []>, precision = #tpu.contract_precision<fp32>} : vector<16x16xf32>, vector<16x11xf32>, vector<16x11xf32> -> vector<16x11xf32>
    %c0_190 = arith.constant 0 : index
    %c0_191 = arith.constant 0 : index
    %603 = vector.load %arg19[%c0_190, %c0_191] : memref<1x11xf32, #tpu.memory_space<vmem>>, vector<1x11xf32>
    %604 = vector.broadcast %603 : vector<1x11xf32> to vector<16x11xf32>
    %605 = arith.addf %602, %604 : vector<16x11xf32>
    %c0_192 = arith.constant 0 : index
    %c0_193 = arith.constant 0 : index
    %606 = vector.load %arg20[%c0_192, %c0_193] : memref<16x11xf32, #tpu.memory_space<vmem>>, vector<16x11xf32>
    tpu.vector_store %arg20[%c0_192, %c0_193], %605 {strides = array<i32>} : memref<16x11xf32, #tpu.memory_space<vmem>>, vector<16x11xf32>,
    return
  }
  func.func @transform_0(%arg0: i32) -> (i32, i32) {
    %c0_i32 = arith.constant 0 : i32
    %c0_i32_0 = arith.constant 0 : i32
    %c0_i32_1 = arith.constant 0 : i32
    return %c0_i32, %c0_i32_0 : i32, i32
  }
  func.func @transform_1(%arg0: i32) -> (i32, i32) {
    %c0_i32 = arith.constant 0 : i32
    %c0_i32_0 = arith.constant 0 : i32
    %c0_i32_1 = arith.constant 0 : i32
    return %c0_i32, %c0_i32_0 : i32, i32
  }
  func.func @transform_2(%arg0: i32) -> (i32, i32) {
    %c0_i32 = arith.constant 0 : i32
    %c0_i32_0 = arith.constant 0 : i32
    %c0_i32_1 = arith.constant 0 : i32
    return %c0_i32, %c0_i32_0 : i32, i32
  }
  func.func @transform_3(%arg0: i32) -> (i32, i32) {
    %c0_i32 = arith.constant 0 : i32
    %c0_i32_0 = arith.constant 0 : i32
    %c0_i32_1 = arith.constant 0 : i32
    return %c0_i32, %c0_i32_0 : i32, i32
  }
  func.func @transform_4(%arg0: i32) -> (i32, i32) {
    %c0_i32 = arith.constant 0 : i32
    %c0_i32_0 = arith.constant 0 : i32
    %c0_i32_1 = arith.constant 0 : i32
    return %c0_i32, %c0_i32_0 : i32, i32
  }
  func.func @transform_5(%arg0: i32) -> (i32, i32) {
    %c0_i32 = arith.constant 0 : i32
    %c0_i32_0 = arith.constant 0 : i32
    %c0_i32_1 = arith.constant 0 : i32
    return %c0_i32, %c0_i32_0 : i32, i32
  }
  func.func @transform_6(%arg0: i32) -> (i32, i32) {
    %c0_i32 = arith.constant 0 : i32
    %c0_i32_0 = arith.constant 0 : i32
    %c0_i32_1 = arith.constant 0 : i32
    return %c0_i32, %c0_i32_0 : i32, i32
  }
  func.func @transform_7(%arg0: i32) -> (i32, i32) {
    %c0_i32 = arith.constant 0 : i32
    %c0_i32_0 = arith.constant 0 : i32
    %c0_i32_1 = arith.constant 0 : i32
    return %c0_i32, %c0_i32_0 : i32, i32
  }
  func.func @transform_8(%arg0: i32) -> (i32, i32) {
    %c0_i32 = arith.constant 0 : i32
    %c0_i32_0 = arith.constant 0 : i32
    %c0_i32_1 = arith.constant 0 : i32
    return %c0_i32, %c0_i32_0 : i32, i32
  }
  func.func @transform_9(%arg0: i32) -> (i32, i32) {
    %c0_i32 = arith.constant 0 : i32
    %c0_i32_0 = arith.constant 0 : i32
    %c0_i32_1 = arith.constant 0 : i32
    return %c0_i32, %c0_i32_0 : i32, i32
  }
  func.func @transform_10(%arg0: i32) -> (i32, i32) {
    %c0_i32 = arith.constant 0 : i32
    %c0_i32_0 = arith.constant 0 : i32
    %c0_i32_1 = arith.constant 0 : i32
    return %c0_i32, %c0_i32_0 : i32, i32
  }
  func.func @transform_11(%arg0: i32) -> (i32, i32) {
    %c0_i32 = arith.constant 0 : i32
    %c0_i32_0 = arith.constant 0 : i32
    %c0_i32_1 = arith.constant 0 : i32
    return %c0_i32, %c0_i32_0 : i32, i32
  }
  func.func @transform_12(%arg0: i32) -> (i32, i32) {
    %c0_i32 = arith.constant 0 : i32
    %c0_i32_0 = arith.constant 0 : i32
    %c0_i32_1 = arith.constant 0 : i32
    return %c0_i32, %c0_i32_0 : i32, i32
  }
  func.func @transform_13(%arg0: i32) -> (i32, i32) {
    %c0_i32 = arith.constant 0 : i32
    %c0_i32_0 = arith.constant 0 : i32
    %c0_i32_1 = arith.constant 0 : i32
    return %c0_i32, %c0_i32_0 : i32, i32
  }
  func.func @transform_14(%arg0: i32) -> (i32, i32) {
    %c0_i32 = arith.constant 0 : i32
    %c0_i32_0 = arith.constant 0 : i32
    %c0_i32_1 = arith.constant 0 : i32
    return %c0_i32, %c0_i32_0 : i32, i32
  }
  func.func @transform_15(%arg0: i32) -> (i32, i32) {
    %c0_i32 = arith.constant 0 : i32
    %c0_i32_0 = arith.constant 0 : i32
    %c0_i32_1 = arith.constant 0 : i32
    return %c0_i32, %c0_i32_0 : i32, i32
  }
  func.func @transform_16(%arg0: i32) -> (i32, i32) {
    %c0_i32 = arith.constant 0 : i32
    %c0_i32_0 = arith.constant 0 : i32
    %c0_i32_1 = arith.constant 0 : i32
    return %c0_i32, %c0_i32_0 : i32, i32
  }
  func.func @transform_17(%arg0: i32) -> (i32, i32) {
    %c0_i32 = arith.constant 0 : i32
    %c0_i32_0 = arith.constant 0 : i32
    %c0_i32_1 = arith.constant 0 : i32
    return %c0_i32, %c0_i32_0 : i32, i32
  }
  func.func @transform_18(%arg0: i32) -> (i32, i32) {
    %c0_i32 = arith.constant 0 : i32
    %c0_i32_0 = arith.constant 0 : i32
    %c0_i32_1 = arith.constant 0 : i32
    return %c0_i32, %c0_i32_0 : i32, i32
  }
  func.func @transform_19(%arg0: i32) -> (i32, i32) {
    %c0_i32 = arith.constant 0 : i32
    %c0_i32_0 = arith.constant 0 : i32
    %c0_i32_1 = arith.constant 0 : i32
    return %c0_i32, %c0_i32_0 : i32, i32
  }
}

</mosaic_0001>

<bundles_post_ra>
// kernel: tpu_custom_call.1
= control target key start
LH: loop header
LB: loop body
LE: loop exit
PB: predicated region body
PF: predicated region fallthrough
CT: control target
= control target key end

     0   :  { %s19486_s0 = inlined_call_operand.vmem [shape: f32[16,1], index: 0, kind: input, shape index: {}]   ;;  %s19487_s1 = inlined_call_operand.vmem [shape: f32[16,8], index: 1, kind: input, shape index: {}]   ;;  %s19488_s2 = inlined_call_operand.<no memory space> [shape: f32[1,1], index: 2, kind: input, shape index: {}]   ;;  %s19489_s4 = inlined_call_operand.hbm [shape: f32[1,16], index: 4, kind: input, shape index: {}]   ;;  %s19490_s5 = inlined_call_operand.vmem [shape: f32[1,16], index: 5, kind: input, shape index: {}]   ;;  %s19491_s6 = inlined_call_operand.vmem [shape: f32[16,16], index: 6, kind: input, shape index: {}]   ;;  %s19492_s7 = inlined_call_operand.hbm [shape: f32[1,16], index: 7, kind: input, shape index: {}]   ;;  %s19493_s8 = inlined_call_operand.vmem [shape: f32[16,16], index: 8, kind: input, shape index: {}]   ;;  %s19494_s9 = inlined_call_operand.hbm [shape: f32[1,16], index: 9, kind: input, shape index: {}]   ;;  %s19495_s10 = inlined_call_operand.hbm [shape: f32[4,16], index: 10, kind: input, shape index: {}]   ;;  %s19496_s11 = inlined_call_operand.hbm [shape: f32[4,16], index: 11, kind: input, shape index: {}]   ;;  %s19497_s12 = inlined_call_operand.hbm [shape: f32[1,16], index: 12, kind: input, shape index: {}]   ;;  %s19498_s13 = inlined_call_operand.vmem [shape: f32[16,48], index: 13, kind: input, shape index: {}]   ;;  %s19499_s14 = inlined_call_operand.vmem [shape: f32[1,48], index: 14, kind: input, shape index: {}]   ;;  %s19500_s15 = inlined_call_operand.vmem [shape: f32[16,48], index: 15, kind: input, shape index: {}]   ;;  %s19501_s16 = inlined_call_operand.vmem [shape: f32[1,48], index: 16, kind: input, shape index: {}]   ;;  %s19502_s17 = inlined_call_operand.hbm [shape: f32[16,11], index: 17, kind: input, shape index: {}]   ;;  %s19503_s18 = inlined_call_operand.vmem [shape: f32[1,11], index: 18, kind: input, shape index: {}]   ;;  %s19504_s19 = inlined_call_operand.hbm [shape: f32[16,11], index: 19, kind: output, shape index: {}]   ;;  %s19505_s3 = inlined_call_operand.<no memory space> [shape: f32[1,1], index: 3, kind: input, shape index: {}]  }
   0x1   :  { %19508 = sst [smem:[#allocation24_spill]] %s19486_s0  ;;  %v26_v1 = vstv %s19505_s3 }
   0x2   :  { %19509 = sst [smem:[#allocation25_spill]] %s19487_s1  ;;  %27 = vst [vmem:[#allocation5] sm:$0x1] %v26_v1 }
   0x3   :  { %19510 = sst [smem:[#allocation26_spill]] %s19488_s2 }
   0x4   :  { %19511 = sst [smem:[#allocation27_spill]] %s19489_s4 }
   0x5   :  { %s19512_s20 = sld [smem:[#allocation26_spill]] }
   0xb   :  { %v24_v0 = vstv %s19512_s20 }
   0xc   :  { %25 = vst [vmem:[#allocation4] sm:$0x1] %v24_v0 }
   0xd   :  { %28 = vsyncpa [#allocation7], 0 }
   0xe   :  { %29 = vsyncpa [#allocation10], 0 }
   0xf   :  { %30 = vsyncpa [#allocation13], 0 }
  0x10   :  { %31 = vsyncpa [#allocation16], 0 }
  0x11   :  { %32 = vsyncpa [#allocation8], 0  ;;  %s17911_s22 = smov [#allocation9]   ;;  %s17912_s23 = smov [#allocation12]  }
  0x12   :  { %s61_s2 = sshll.u32 %s17911_s22, 4  ;;  %s83_s24 = sshll.u32 %s17912_s23, 4  ;;  %s62_s2 = int_to_ptr.vmem [resolvable:$true] %s61_s2  ;;  %s84_s24 = int_to_ptr.vmem [resolvable:$true] %s83_s24 }
  0x13   :  { %s17749_s25 = scalar_lea.vmem %s62_s2, 16  ;;  %s17753_s4 = scalar_lea.vmem %s62_s2, 32 }
  0x14   :  { %p17750_p0 = scmp.ne.s32.totalorder %s62_s2, %s17749_s25  ;;  %p17754_p1 = scmp.lt.s32.totalorder %s62_s2, %s62_s2 }
  0x15   :  { %p17755_p2 = scmp.lt.s32.totalorder %s17753_s4, %s17749_s25 }
  0x17   :  { %p17756_p3 = por %p17755_p2, %p17754_p1 }
  0x19   :  { %p17757_p4 = pnand %p17756_p3, %p17750_p0 }
  0x1b   :  { %17760 = shalt.err (!%p17757_p4)
}
  0x1c   :  { %64 = dma.hbm_to_vmem [thread:$0]  %s19492_s7, 16, %s62_s2, [#allocation10]  }
  0x1d   :  { %s17769_s27 = scalar_lea.vmem %s84_s24, 64  ;;  %p17774_p6 = scmp.lt.s32.totalorder %s84_s24, %s84_s24 }
  0x1e   :  { %p17770_p5 = scmp.ne.s32.totalorder %s84_s24, %s17769_s27  ;;  %p17775_p7 = scmp.lt.s32.totalorder %s17769_s27, %s17769_s27 }
  0x20   :  { %p17776_p8 = por %p17775_p7, %p17774_p6 }
  0x22   :  { %p17777_p9 = pnand %p17776_p8, %p17770_p5 }
  0x24   :  { %17780 = shalt.err (!%p17777_p9)
}
  0x25   :  { %86 = dma.hbm_to_vmem [thread:$0]  %s19495_s10, 64, %s84_s24, [#allocation13]  }
  0x26   :  { %s17913_s0 = smov [#allocation15]   ;;  %s17914_s20 = smov [#allocation6]  }
  0x27   :  { %s103_s30 = sshll.u32 %s17913_s0, 4  ;;  %s47_s21 = sshll.u32 %s17914_s20, 4  ;;  %s104_s30 = int_to_ptr.vmem [resolvable:$true] %s103_s30  ;;  %s48_s21 = int_to_ptr.vmem [resolvable:$true] %s47_s21 }
  0x28   :  { %s17789_s1 = scalar_lea.vmem %s104_s30, 16  ;;  %s17793_s7 = scalar_lea.vmem %s104_s30, 32 }
  0x29   :  { %p17790_p10 = scmp.ne.s32.totalorder %s104_s30, %s17789_s1  ;;  %p17794_p11 = scmp.lt.s32.totalorder %s104_s30, %s104_s30 }
  0x2a   :  { %p17795_p12 = scmp.lt.s32.totalorder %s17793_s7, %s17789_s1 }
  0x2c   :  { %p17796_p13 = por %p17795_p12, %p17794_p11 }
  0x2e   :  { %p17797_p0 = pnand %p17796_p13, %p17790_p10 }
  0x30   :  { %17800 = shalt.err (!%p17797_p0)
}
  0x31   :  { %106 = dma.hbm_to_vmem [thread:$0]  %s19497_s12, 16, %s104_s30, [#allocation16]  }
  0x32   :  { %s17809_s23 = scalar_lea.vmem %s48_s21, 16  ;;  %s17813_s10 = scalar_lea.vmem %s48_s21, 32 }
  0x33   :  { %p17810_p1 = scmp.ne.s32.totalorder %s48_s21, %s17809_s23  ;;  %p17814_p2 = scmp.lt.s32.totalorder %s48_s21, %s48_s21 }
  0x34   :  { %p17815_p3 = scmp.lt.s32.totalorder %s17813_s10, %s17809_s23 }
  0x36   :  { %p17816_p4 = por %p17815_p3, %p17814_p2 }
  0x38   :  { %p17817_p5 = pnand %p17816_p4, %p17810_p1 }
  0x3a   :  { %17820 = shalt.err (!%p17817_p5)
}
  0x3b   :  { %s19513_s4 = sld [smem:[#allocation27_spill]]  ;;  %s17915_s3 = smov [#allocation11]  }
  0x3c   :  { %s73_s26 = sshll.u32 %s17915_s3, 4  ;;  %s17916_s27 = smov [#allocation14]   ;;  %s74_s26 = int_to_ptr.vmem [resolvable:$true] %s73_s26 }
  0x3d   :  { %s93_s28 = sshll.u32 %s17916_s27, 4  ;;  %s17829_s29 = scalar_lea.vmem %s74_s26, 16  ;;  %s94_s28 = int_to_ptr.vmem [resolvable:$true] %s93_s28 }
  0x3e   :  { %p17830_p6 = scmp.ne.s32.totalorder %s74_s26, %s17829_s29  ;;  %s17833_s12 = scalar_lea.vmem %s74_s26, 32 }
  0x3f   :  { %p17834_p7 = scmp.lt.s32.totalorder %s74_s26, %s74_s26  ;;  %p17835_p8 = scmp.lt.s32.totalorder %s17833_s12, %s17829_s29 }
  0x41   :  { %50 = dma.hbm_to_vmem [thread:$0]  %s19513_s4, 16, %s48_s21, [#allocation7]  }
  0x42   :  { %p17836_p9 = por %p17835_p8, %p17834_p7 }
  0x44   :  { %p17837_p10 = pnand %p17836_p9, %p17830_p6 }
  0x46   :  { %17840 = shalt.err (!%p17837_p10)
}
  0x47   :  { %76 = dma.hbm_to_vmem [thread:$0]  %s19494_s9, 16, %s74_s26, [#allocation10]  }
  0x48   :  { %s17849_s20 = scalar_lea.vmem %s94_s28, 64  ;;  %p17854_p12 = scmp.lt.s32.totalorder %s94_s28, %s94_s28 }
  0x49   :  { %p17850_p11 = scmp.ne.s32.totalorder %s94_s28, %s17849_s20  ;;  %p17855_p13 = scmp.lt.s32.totalorder %s17849_s20, %s17849_s20 }
  0x4b   :  { %p17856_p0 = por %p17855_p13, %p17854_p12 }
  0x4d   :  { %p17857_p1 = pnand %p17856_p0, %p17850_p11 }
  0x4f   :  { %17860 = shalt.err (!%p17857_p1)
}
  0x50   :  { %96 = dma.hbm_to_vmem [thread:$0]  %s19496_s11, 64, %s94_s28, [#allocation13]  }
  0x51   :  { %s17917_s7 = smov [#allocation17]  }
  0x52   :  { %s120_s22 = sshll.u32 %s17917_s7, 4  ;;  %s121_s22 = int_to_ptr.vmem [resolvable:$true] %s120_s22 }
  0x53   :  { %s17869_s2 = scalar_lea.vmem %s121_s22, 256  ;;  %p17874_p3 = scmp.lt.s32.totalorder %s121_s22, %s121_s22 }
  0x54   :  { %p17870_p2 = scmp.ne.s32.totalorder %s121_s22, %s17869_s2  ;;  %p17875_p4 = scmp.lt.s32.totalorder %s17869_s2, %s17869_s2 }
  0x56   :  { %p17876_p5 = por %p17875_p4, %p17874_p3 }
  0x58   :  { %p17877_p6 = pnand %p17876_p5, %p17870_p2 }
  0x5a   :  { %17880 = shalt.err (!%p17877_p6)
}
  0x5b   :  { %s17918_s9 = smov 128   ;;  %s17919_s23 = smov 8  }
  0x5c   :  { %126 = dma.hbm_to_vmem [thread:$0]  %s19502_s17, 256, %s121_s22, [#allocation16], %s17918_s9, %s17918_s9, %s17919_s23  }
  0x5d   :  { %17901 = dma.done.wait [#allocation7], 16  }
  0x5e   :  { %17902 = vsyncadd [#allocation7], 4294967280 }
  0x5f   :  { %17903 = dma.done.wait [#allocation10], 32  }
  0x60   :  { %17904 = vsyncadd [#allocation10], 4294967264 }
  0x61   :  { %17905 = dma.done.wait [#allocation13], 128  }
  0x62   :  { %17906 = vsyncadd [#allocation13], 4294967168 }
  0x63   :  { %17907 = dma.done.wait [#allocation16], 272  }
  0x64   :  { %17908 = vsyncadd [#allocation16], 4294967024  ;;  %v17920_v2 = vmov 0   ;;  %s19514_s4 = sld [smem:[#allocation24_spill]]  ;;  %v15847_v4 = vld [vmem:[#allocation4] ss:$0 sm:$0xff] }
  0x65   :  { %17625 = vset.pattern.permute.xlu0 %v17920_v2  ;;  %17626 = vset.pattern.permute.xlu1 %v17920_v2  ;;  %v15848_v8 = vld [vmem:[#allocation5] ss:$0 sm:$0xff]  ;;  %v422_v11 = vld [vmem:[%s19491_s6 + $0x8] sm:$0xff]  ;;  %v15837_v23 = vld [vmem:[#allocation6] ss:$0 sm:$0xff]  ;;  %s19517_s1 = sld [smem:[#allocation25_spill]] }
  0x66   :  { %v18074_v12 = vand.u32 4294901760, %v422_v11  ;;  %v421_v13 = vld [vmem:[%s19491_s6] sm:$0xff]  ;;  %v17921_v47 = vmov 683565275   ;;  %v17922_v51 = vmov 2475754826  }
  0x67   :  { %v18082_v15 = vand.u32 4294901760, %v421_v13  ;;  %v15838_v24 = vld [vmem:[%s19490_s5] ss:$0 sm:$0xff]  ;;  %v17923_v53 = vmov 2131351028   ;;  %s17929_s7 = smov 4  }
  0x68   :  { %v18080_v14 = vsub.f32 %v422_v11, %v18074_v12  ;;  %16393 = vmatprep.subr.mxu0 %v18074_v12  ;;  %v17924_v55 = vmov 2102212464   ;;  %v17925_v57 = vmov 920167782   ;;  %v17926_v0 = vmov 1326507024  }
  0x69   :  { %16394 = vmatpush3.msra.mxu0 %v18074_v12  ;;  %v18090_v17 = vsub.f32 %v421_v13, %v18082_v15  ;;  %s17930_s22 = smov 124   ;;  %s17931_s29 = smov 96  }
  0x6a   :  { %v150_v3 = vld [vmem:[%s19514_s4] sm:$0xff]  ;;  %v151_v5 = vld [vmem:[%s19514_s4 + $0x8] sm:$0xff]  ;;  %v18087_v16 = vand.u32 4294901760, %v18080_v14  ;;  %16395 = vmatprep.subr.mxu0 %v18082_v15  ;;  %s17932_s6 = smov 32   ;;  %s17933_s12 = smov 112  }
  0x6b   :  { %155 = vperm.xlu0 %17625, %v150_v3   ;;  %v395_v6 = vmul.f32 %v15847_v4, %v150_v3  ;;  %v396_v7 = vmul.f32 %v15847_v4, %v151_v5  ;;  %16396 = vmatpush3.msra.mxu0 %v18082_v15  ;;  %v18097_v19 = vand.u32 4294901760, %v18090_v17 }
  0x6c   :  { %v556_v18 = vsub.f32 %v18080_v14, %v18087_v16  ;;  %16407 = vmatprep.subr.mxu0 %v18080_v14 }
  0x6d   :  { %v404_v9 = vadd.f32 %v15848_v8, %v395_v6  ;;  %v405_v10 = vadd.f32 %v15848_v8, %v396_v7  ;;  %v563_v21 = vsub.f32 %v18090_v17, %v18097_v19 }
  0x6e   :  { %v557_v20 = vand.u32 4294901760, %v556_v18 }
  0x6f   :  { %160 = vperm.xlu0 %17625, %v151_v5   ;;  %408 = vperm.xlu1 %17626, %v404_v9   ;;  %v564_v22 = vand.u32 4294901760, %v563_v21 }
  0x70   :  { %16400 = vmatprep.subr.mxu1 %v557_v20 }
  0x71   :  { %16401 = vmatpush3.msra.mxu1 %v557_v20 }
  0x72   :  { %16402 = vmatprep.subr.mxu1 %v564_v22 }
  0x73   :  { %413 = vperm.xlu1 %17626, %v405_v10   ;;  %16403 = vmatpush3.msra.mxu1 %v564_v22 }
  0x74   :  { %16414 = vmatprep.subr.mxu1 %v18074_v12 }
  0xe6   :  { %v156_v25 = vpop.permute.xlu0 %155 }
  0xe7   :  { %v169_v26 = vmul.f32 %v15837_v23, %v156_v25 }
  0xe9   :  { %v18106_v27 = vadd.f32 %v15838_v24, %v169_v26 }
  0xea   :  { %v161_v28 = vpop.permute.xlu0 %160 }
  0xeb   :  { %v180_v29 = vand.u32 2147483647, %v18106_v27  ;;  %v183_v30 = vand.u32 2139095040, %v18106_v27  ;;  %v170_v31 = vmul.f32 %v15837_v23, %v161_v28  ;;  %vm182_vm14 = vcmp.lt.s32.totalorder %v18106_v27, 0 }
  0xed   :  { %v184_v32 = vshrl.u32 %v183_v30, 23  ;;  %v18110_v33 = vadd.f32 %v15838_v24, %v170_v31  ;;  %v187_v34 = vand.u32 8388607, %v180_v29  ;;  %vm181_vm15 = vcmp.le.f32.partialorder %v180_v29, 0.7853982 }
  0xef   :  { %v15839_v35 = vadd.s32 4294967169, %v184_v32  ;;  %v287_v36 = vand.u32 2139095040, %v18110_v33  ;;  %v188_v38 = vor.u32 8388608, %v187_v34  ;;  %v284_v40 = vand.u32 2147483647, %v18110_v33 }
  0xf1   :  { %v190_v37 = vadd.s32 1, %v15839_v35  ;;  %v288_v39 = vshrl.u32 %v287_v36, 23  ;;  %v18116_v45 = vshll.u32 %v188_v38, 8  ;;  %v291_v49 = vand.u32 8388607, %v284_v40 }
  0xf3   :  { %vm191_vm0 = vcmp.gt.s32.totalorder %v190_v37, 0  ;;  %v15843_v42 = vadd.s32 4294967169, %v288_v39  ;;  %v292_v21 = vor.u32 8388608, %v291_v49 }
  0xf4   :  { %v192_v41 = vsel %vm191_vm0, %v190_v37, 0  ;;  %vm286_vm0 = vcmp.lt.s32.totalorder %v18110_v33, 0 }
  0xf5   :  { %v193_v43 = vshrl.u32 %v192_v41, 5  ;;  %v194_v44 = vand.u32 31, %v192_v41  ;;  %v294_v50 = vadd.s32 1, %v15843_v42  ;;  %v332_v37 = vshll.u32 %v292_v21, 8 }
  0xf7   :  { %v195_v46 = vsub.s32 32, %v194_v44  ;;  %v197_v48 = vshll.u32 %v17921_v47, %v194_v44  ;;  %v200_v52 = vshll.u32 %v17922_v51, %v194_v44  ;;  %v203_v54 = vshll.u32 %v17923_v53, %v194_v44 }
  0xf8   :  { %v206_v56 = vshll.u32 %v17924_v55, %v194_v44  ;;  %v209_v58 = vshll.u32 %v17925_v57, %v194_v44  ;;  %vm212_vm1 = vcmp.lt.s32.totalorder %v193_v43, 1  ;;  %vm214_vm2 = vcmp.lt.s32.totalorder %v193_v43, 3 }
  0xf9   :  { %v198_v59 = vshrl.u32 %v17922_v51, %v195_v46  ;;  %v201_v60 = vshrl.u32 %v17923_v53, %v195_v46  ;;  %v204_v61 = vshrl.u32 %v17924_v55, %v195_v46  ;;  %v196_v62 = vshrl.u32 %v17921_v47, %v195_v46 }
  0xfa   :  { %v207_v63 = vshrl.u32 %v17925_v57, %v195_v46  ;;  %v210_v1 = vshrl.u32 %v17926_v0, %v195_v46  ;;  %vm295_vm3 = vcmp.gt.s32.totalorder %v294_v50, 0  ;;  %vm215_vm4 = vcmp.lt.s32.totalorder %v193_v43, 4 }
  0xfb   :  { %v199_v2 = vor.u32 %v198_v59, %v197_v48  ;;  %v202_v3 = vor.u32 %v201_v60, %v200_v52  ;;  %v205_v4 = vor.u32 %v204_v61, %v203_v54  ;;  %v296_v7 = vsel %vm295_vm3, %v294_v50, 0 }
  0xfc   :  { %v208_v5 = vor.u32 %v207_v63, %v206_v56  ;;  %v211_v6 = vor.u32 %v210_v1, %v209_v58  ;;  %vm213_vm5 = vcmp.lt.s32.totalorder %v193_v43, 2  ;;  %v298_v24 = vand.u32 31, %v296_v7 }
  0xfd   :  { %v216_v8 = vsel %vm212_vm1, %v196_v62, %v199_v2  ;;  %v217_v9 = vsel %vm215_vm4, %v205_v4, 2102212464  ;;  %v220_v10 = vsel %vm212_vm1, %v199_v2, %v202_v3  ;;  %v224_v11 = vsel %vm212_vm1, %v202_v3, %v205_v4 }
  0xfe   :  { %v218_v13 = vsel %vm214_vm2, %v202_v3, %v217_v9  ;;  %v221_v18 = vsel %vm215_vm4, %v208_v5, 920167782  ;;  %v225_v20 = vsel %vm215_vm4, %v211_v6, 1326507024  ;;  %v297_v35 = vshrl.u32 %v296_v7, 5 }
  0xff   :  { %v222_v22 = vsel %vm214_vm2, %v205_v4, %v221_v18  ;;  %v226_v23 = vsel %vm214_vm2, %v208_v5, %v225_v20  ;;  %v219_v25 = vsel %vm213_vm5, %v216_v8, %v218_v13  ;;  %v299_v36 = vsub.s32 32, %v298_v24 }
 0x100   :  { %v223_v26 = vsel %vm213_vm5, %v220_v10, %v222_v22  ;;  %v227_v28 = vsel %vm213_vm5, %v224_v11, %v226_v23  ;;  %v235_v38 = vmul.u32 %v18116_v45, %v219_v25  ;;  %v301_v39 = vshll.u32 %v17921_v47, %v298_v24 }
 0x101   :  { %v18129_v30 = vmul.u32.u64.low %v18116_v45, %v227_v28  ;;  %v18130_v31 = vmul.u32.u64.high %v18116_v45, %v227_v28, %v18129_v30  ;;  %v18133_v32 = vmul.u32.u64.low %v18116_v45, %v223_v26  ;;  %v18134_v34 = vmul.u32.u64.high %v18116_v45, %v223_v26, %v18133_v32 }
 0x102   :  { %v304_v41 = vshll.u32 %v17922_v51, %v298_v24  ;;  %v307_v42 = vshll.u32 %v17923_v53, %v298_v24  ;;  %v302_v43 = vshrl.u32 %v17922_v51, %v299_v36  ;;  %v305_v44 = vshrl.u32 %v17923_v53, %v299_v36 }
 0x103   :  { %v308_v46 = vshrl.u32 %v17924_v55, %v299_v36  ;;  %v310_v48 = vshll.u32 %v17924_v55, %v298_v24  ;;  %vm237_vm6 = vc.u32 %v18130_v31, %v18133_v32  ;;  %v238_v49 = vadd.s32 1, %v18134_v34 }
 0x104   :  { %v311_v50 = vshrl.u32 %v17925_v57, %v299_v36  ;;  %v313_v52 = vshll.u32 %v17925_v57, %v298_v24  ;;  %v303_v54 = vor.u32 %v302_v43, %v301_v39  ;;  %v306_v56 = vor.u32 %v305_v44, %v304_v41 }
 0x105   :  { %v309_v58 = vor.u32 %v308_v46, %v307_v42  ;;  %v314_v59 = vshrl.u32 %v17926_v0, %v299_v36  ;;  %v239_v45 = vsel %vm237_vm6, %v238_v49, %v18134_v34  ;;  %vm316_vm7 = vcmp.lt.s32.totalorder %v297_v35, 1 }
 0x106   :  { %v312_v60 = vor.u32 %v311_v50, %v310_v48  ;;  %vm319_vm8 = vcmp.lt.s32.totalorder %v297_v35, 4  ;;  %v240_v51 = vadd.s32 %v239_v45, %v235_v38  ;;  %vm318_vm9 = vcmp.lt.s32.totalorder %v297_v35, 3 }
 0x107   :  { %v315_v53 = vor.u32 %v314_v59, %v313_v52  ;;  %v321_v55 = vsel %vm319_vm8, %v309_v58, 2102212464  ;;  %v300_v61 = vshrl.u32 %v17921_v47, %v299_v36  ;;  %v324_v62 = vsel %vm316_vm7, %v303_v54, %v306_v56 }
 0x108   :  { %v325_v63 = vsel %vm319_vm8, %v312_v60, 920167782  ;;  %v328_v1 = vsel %vm316_vm7, %v306_v56, %v309_v58  ;;  %v241_v2 = vadd.s32 536870912, %v240_v51  ;;  %vm317_vm10 = vcmp.lt.s32.totalorder %v297_v35, 2 }
 0x109   :  { %v326_v57 = vsel %vm318_vm9, %v309_v58, %v325_v63  ;;  %v329_v3 = vsel %vm319_vm8, %v315_v53, 1326507024  ;;  %v320_v4 = vsel %vm316_vm7, %v300_v61, %v303_v54  ;;  %v322_v0 = vsel %vm318_vm9, %v306_v56, %v321_v55 }
 0x10a   :  { %v327_v5 = vsel %vm317_vm10, %v324_v62, %v326_v57  ;;  %v330_v6 = vsel %vm318_vm9, %v312_v60, %v329_v3  ;;  %v242_v7 = vshrl.u32 %v241_v2, 30  ;;  %v323_v18 = vsel %vm317_vm10, %v320_v4, %v322_v0 }
 0x10b   :  { %v331_v8 = vsel %vm317_vm10, %v328_v1, %v330_v6  ;;  %v18144_v9 = vmul.u32.u64.low %v332_v37, %v327_v5  ;;  %v18145_v10 = vmul.u32.u64.high %v332_v37, %v327_v5, %v18144_v9  ;;  %v339_v22 = vmul.u32 %v332_v37, %v323_v18 }
 0x10c   :  { %v18147_v11 = vmul.u32.u64.low %v332_v37, %v331_v8  ;;  %v18148_v13 = vmul.u32.u64.high %v332_v37, %v331_v8, %v18147_v11  ;;  %v243_v47 = vshll.u32 %v242_v7, 30  ;;  %v236_v41 = vadd.s32 %v18133_v32, %v18130_v31 }
 0x10d   :  { %v342_v21 = vadd.s32 1, %v18145_v10  ;;  %v266_v1 = vsub.s32 4, %v242_v7  ;;  %vm18163_vm1 = vcmp.le.f32.partialorder %v284_v40, 0.7853982  ;;  %vm272_vm6 = vweird.f32 %v18106_v27 }
 0x10e   :  { %v244_v20 = vsub.s32 %v240_v51, %v243_v47  ;;  %vm341_vm11 = vc.u32 %v18148_v13, %v18144_v9  ;;  %v340_v53 = vadd.s32 %v18144_v9, %v18148_v13  ;;  %vm430_vm7 = vcmask 130048  }
 0x10f   :  { %v343_v24 = vsel %vm341_vm11, %v342_v21, %v18145_v10  ;;  %v267_v5 = vsel %vm182_vm14, %v266_v1, %v242_v7  ;;  %vm376_vm11 = vweird.f32 %v18110_v33 }
 0x110   :  { %v246_v23 = vsub.s32 0, %v244_v20  ;;  %v344_v25 = vadd.s32 %v343_v24, %v339_v22  ;;  %v269_v9 = vsel %vm181_vm15, 0, %v267_v5 }
 0x111   :  { %v273_v13 = vadd.s32 3, %v269_v9 }
 0x112   :  { %v15840_v26 = vmin.u32 %v246_v23, %v244_v20  ;;  %v345_v28 = vadd.s32 536870912, %v344_v25 }
 0x113   :  { %v274_v21 = vand.u32 3, %v273_v13 }
 0x114   :  { %v248_v30 = vclz %v15840_v26  ;;  %v346_v34 = vshrl.u32 %v345_v28, 30 }
 0x115   :  { %vm279_vm2 = vcmp.eq.s32.totalorder %v274_v21, 2  ;;  %vm276_vm3 = vcmp.eq.s32.totalorder %v274_v21, 0  ;;  %vm275_vm4 = vcmp.lt.s32.totalorder %v274_v21, 2 }
 0x116   :  { %v15841_v35 = vadd.s32 4294967294, %v248_v30  ;;  %v347_v36 = vshll.u32 %v346_v34, 30  ;;  %v370_v47 = vsub.s32 4, %v346_v34 }
 0x118   :  { %vm15842_vm12 = vcmp.lt.s32.totalorder %v15841_v35, 0  ;;  %v348_v39 = vsub.s32 %v344_v25, %v347_v36  ;;  %v371_v22 = vsel %vm286_vm0, %v370_v47, %v346_v34 }
 0x119   :  { %v251_v38 = vsel %vm15842_vm12, 0, %v15841_v35  ;;  %v373_v40 = vsel %vm18163_vm1, 0, %v371_v22  ;;  %vm17928_vm12 = vmmov 0  }
 0x11a   :  { %v252_v42 = vsub.s32 32, %v251_v38  ;;  %v256_v37 = vsub.s32 4294967266, %v251_v38  ;;  %v350_v43 = vsub.s32 0, %v348_v39  ;;  %v253_v44 = vshll.u32 %v244_v20, %v251_v38 }
 0x11b   :  { %v416_v20 = vlaneseq  ;;  %v377_v34 = vadd.s32 3, %v373_v40 }
 0x11c   :  { %v254_v46 = vshrl.u32 %v236_v41, %v252_v42  ;;  %v257_v48 = vadd.s32 127, %v256_v37  ;;  %v15844_v49 = vmin.u32 %v350_v43, %v348_v39  ;;  %v940_v37 = vld [vmem:[%s19493_s8 + $0x8] sm:$0xff] }
 0x11d   :  { %v417_v24 = vand.u32 127, %v416_v20 }
 0x11e   :  { %v255_v50 = vor.u32 %v254_v46, %v253_v44  ;;  %v258_v52 = vshll.u32 %v257_v48, 23  ;;  %v352_v54 = vclz %v15844_v49  ;;  %v378_v44 = vand.u32 3, %v377_v34  ;;  %v939_v49 = vld [vmem:[%s19493_s8] sm:$0xff] }
 0x11f   :  { %vm418_vm5 = vcmp.eq.s32.totalorder %v417_v24, 0 }
 0x120   :  { %v259_v56 = vor.u32 4788187, %v258_v52  ;;  %v15845_v58 = vadd.s32 4294967294, %v352_v54  ;;  %v262_v45 = vcvt.s32.f32 %v255_v50  ;;  %vm383_vm8 = vcmp.eq.s32.totalorder %v378_v44, 2 }
 0x121   :  { %vm380_vm9 = vcmp.eq.s32.totalorder %v378_v44, 0  ;;  %vm379_vm10 = vcmp.lt.s32.totalorder %v378_v44, 2 }
 0x122   :  { %v260_v59 = vand.u32 2147483647, %v259_v56  ;;  %vm15846_vm13 = vcmp.lt.s32.totalorder %v15845_v58, 0 }
 0x123   :  { %v355_v51 = vsel %vm15846_vm13, 0, %v15845_v58  ;;  %vm1917_vm13 = vcmask 64512  }
 0x124   :  { %v263_v60 = vmul.f32 %v262_v45, %v260_v59  ;;  %v356_v31 = vsub.s32 32, %v355_v51  ;;  %v360_v32 = vsub.s32 4294967266, %v355_v51  ;;  %v357_v61 = vshll.u32 %v348_v39, %v355_v51  ;;  %v409_v39 = vpop.permute.xlu1 %408 }
 0x125   :  { %v18190_v59 = vand.u32 4294901760, %v939_v49 }
 0x126   :  { %v264_v55 = vxor.u32 2147483648, %v263_v60  ;;  %v358_v62 = vshrl.u32 %v340_v53, %v356_v31  ;;  %v361_v63 = vadd.s32 127, %v360_v32 }
 0x128   :  { %v265_v2 = vsel %vm182_vm14, %v264_v55, %v263_v60  ;;  %v359_v57 = vor.u32 %v358_v62, %v357_v61  ;;  %v362_v3 = vshll.u32 %v361_v63, 23  ;;  %v414_v32 = vpop.permute.xlu1 %413  ;;  %v18199_v62 = vsub.f32 %v939_v49, %v18190_v59 }
 0x129   :  { %v268_v4 = vsel %vm181_vm15, %v18106_v27, %v265_v2  ;;  %v18184_v27 = vand.u32 4294901760, %v940_v37  ;;  %vm3289_vm14 = vcmask 1043456  }
 0x12a   :  { %17627 = vcosq.f32 %v268_v4  ;;  %v363_v0 = vor.u32 4788187, %v362_v3  ;;  %v366_v8 = vcvt.s32.f32 %v359_v57 }
 0x12b   :  { %17629 = vsinq.f32 %v268_v4  ;;  %v18194_v51 = vsub.f32 %v940_v37, %v18184_v27 }
 0x12c   :  { %v364_v6 = vand.u32 2147483647, %v363_v0 }
 0x12d   :  { %v18203_v1 = vand.u32 4294901760, %v18194_v51 }
 0x12e   :  { %v367_v10 = vmul.f32 %v366_v8, %v364_v6 }
 0x12f   :  { %v1067_v3 = vsub.f32 %v18194_v51, %v18203_v1 }
 0x130   :  { %v368_v11 = vxor.u32 2147483648, %v367_v10 }
 0x131   :  { %v1068_v6 = vand.u32 4294901760, %v1067_v3 }
 0x132   :  { %v369_v18 = vsel %vm286_vm0, %v368_v11, %v367_v10  ;;  %v15849_v10 = vld [vmem:[#allocation9] ss:$0 sm:$0xff]  ;;  %vm3285_vm0 = vcmask 31744  }
 0x133   :  { %v372_v7 = vsel %vm18163_vm1, %v18110_v33, %v369_v18  ;;  %v18210_v33 = vand.u32 4294901760, %v18199_v62  ;;  %vm4667_vm1 = vcmask 392192  }
 0x134   :  { %17631 = vcosq.f32 %v372_v7 }
 0x135   :  { %17633 = vsinq.f32 %v372_v7  ;;  %v1074_v5 = vsub.f32 %v18199_v62, %v18210_v33 }
 0x137   :  { %v17628_v23 = vpop.eup %17627  ;;  %v1075_v9 = vand.u32 4294901760, %v1074_v5 }
 0x138   :  { %v17630_v25 = vpop.eup %17629  ;;  %v280_v26 = vxor.u32 2147483648, %v17628_v23 }
 0x139   :  { %v277_v28 = vxor.u32 2147483648, %v17630_v25 }
 0x13a   :  { %v281_v30 = vsel %vm279_vm2, %v280_v26, %v17630_v25 }
 0x13b   :  { %v278_v35 = vsel %vm276_vm3, %v17628_v23, %v277_v28  ;;  %vm8363_vm3 = vcmask 122880  }
 0x13c   :  { %v282_v36 = vsel %vm275_vm4, %v278_v35, %v281_v30  ;;  %vm15814_vm4 = vcmask 89088  }
 0x13d   :  { %v283_v38 = vsel %vm272_vm6, nan, %v282_v36 }
 0x13e   :  { %v419_v41 = vsel %vm418_vm5, %v409_v39, %v283_v38 }
 0x13f   :  { %v432_v42 = vsel %vm430_vm7, %v419_v41, 0  ;;  %v15850_v41 = vld [vmem:[#allocation11] ss:$0 sm:$0xff] }
 0x140   :  { %v18178_v43 = vand.u32 4294901760, %v432_v42 }
 0x141   :  { %v17632_v46 = vpop.eup %17631 }
 0x142   :  { %v18181_v48 = vsub.f32 %v432_v42, %v18178_v43  ;;  %16404 = vmatprep.mubr.f32.mxu1 %v18178_v43  ;;  %v17634_v50 = vpop.eup %17633  ;;  %v384_v52 = vxor.u32 2147483648, %v17632_v46 }
 0x143   :  { %v381_v54 = vxor.u32 2147483648, %v17634_v50 }
 0x144   :  { %v506_v56 = vand.u32 4294901760, %v18181_v48  ;;  %v385_v58 = vsel %vm383_vm8, %v384_v52, %v17634_v50 }
 0x145   :  { %v382_v45 = vsel %vm380_vm9, %v17632_v46, %v381_v54 }
 0x146   :  { %v507_v60 = vsub.f32 %v18181_v48, %v506_v56  ;;  %v386_v53 = vsel %vm379_vm10, %v382_v45, %v385_v58 }
 0x147   :  { %v387_v31 = vsel %vm376_vm11, nan, %v386_v53 }
 0x148   :  { %v508_v55 = vand.u32 4294901760, %v507_v60  ;;  %v420_v61 = vsel %vm418_vm5, %v414_v32, %v387_v31 }
 0x149   :  { %v435_v63 = vsel %vm430_vm7, %v420_v61, 0 }
 0x14a   :  { %16397 = vmatprep.mubr.f32.mxu0 %v508_v55  ;;  %v18205_v2 = vand.u32 4294901760, %v435_v63 }
 0x14c   :  { %v515_v57 = vsub.f32 %v435_v63, %v18205_v2  ;;  %16405 = vmatmul.mubr.f32.vlgmr.msra.gmra.mxu1 %v18205_v2 }
 0x14d   :  { %16415 = vmatpush3.msra.mxu1 %v18074_v12  ;;  %16418 = vmatprep.mubr.f32.mxu1 %v506_v56 }
 0x14e   :  { %16416 = vmatprep.subr.mxu1 %v18082_v15  ;;  %v516_v4 = vand.u32 4294901760, %v515_v57 }
 0x14f   :  { %16417 = vmatpush3.msra.mxu1 %v18082_v15 }
 0x150   :  { %16419 = vmatmul.mubr.f32.vlgmr.msra.gmra.mxu1 %v516_v4  ;;  %16428 = vmatprep.subr.mxu1 %v18074_v12  ;;  %v517_v0 = vsub.f32 %v515_v57, %v516_v4 }
 0x151   :  { %16429 = vmatpush3.msra.mxu1 %v18074_v12  ;;  %16432 = vmatprep.mubr.f32.mxu1 %v18178_v43  ;;  %v17927_v12 = vmov 0.0  }
 0x152   :  { %16430 = vmatprep.subr.mxu1 %v18082_v15  ;;  %v518_v8 = vand.u32 4294901760, %v517_v0 }
 0x153   :  { %16431 = vmatpush3.msra.mxu1 %v18082_v15 }
 0x154   :  { %16398 = vmatmul.mubr.f32.vlgmr.msra.gmra.mxu0 %v518_v8  ;;  %16433 = vmatmul.mubr.f32.vlgmr.msra.gmra.mxu1 %v18205_v2 }
 0x155   :  { %16442 = vmatprep.subr.mxu1 %v1068_v6  ;;  %16408 = vmatpush3.msra.mxu0 %v18080_v14  ;;  %v18271_v14 = vld [vmem:[%s19517_s1] sm:$0xff] }
 0x156   :  { %16411 = vmatprep.mubr.f32.mxu0 %v18181_v48  ;;  %16443 = vmatpush3.msra.mxu1 %v1068_v6 }
 0x157   :  { %16446 = vmatprep.mubr.f32.mxu1 %v18178_v43  ;;  %16409 = vmatprep.subr.mxu0 %v18090_v17 }
 0x158   :  { %16444 = vmatprep.subr.mxu1 %v1075_v9  ;;  %16410 = vmatpush3.msra.mxu0 %v18090_v17 }
 0x159   :  { %16445 = vmatpush3.msra.mxu1 %v1075_v9  ;;  %16412 = vmatmul.mubr.f32.vlgmr.msra.gmra.mxu0 %v515_v57 }
 0x15a   :  { %16421 = vmatprep.subr.mxu0 %v18087_v16  ;;  %16447 = vmatmul.mubr.f32.vlgmr.msra.gmra.mxu1 %v18205_v2 }
 0x15b   :  { %16456 = vmatprep.subr.mxu1 %v18184_v27  ;;  %16422 = vmatpush3.msra.mxu0 %v18087_v16 }
 0x15c   :  { %16425 = vmatprep.mubr.f32.mxu0 %v18178_v43  ;;  %16457 = vmatpush3.msra.mxu1 %v18184_v27 }
 0x15d   :  { %16460 = vmatprep.mubr.f32.mxu1 %v506_v56  ;;  %16423 = vmatprep.subr.mxu0 %v18097_v19 }
 0x15e   :  { %16458 = vmatprep.subr.mxu1 %v18190_v59  ;;  %16424 = vmatpush3.msra.mxu0 %v18097_v19 }
 0x15f   :  { %16459 = vmatpush3.msra.mxu1 %v18190_v59  ;;  %16426 = vmatmul.mubr.f32.vlgmr.msra.gmra.mxu0 %v18205_v2 }
 0x160   :  { %16435 = vmatprep.subr.mxu0 %v18184_v27  ;;  %16461 = vmatmul.mubr.f32.vlgmr.msra.gmra.mxu1 %v516_v4 }
 0x161   :  { %16470 = vmatprep.subr.mxu1 %v18184_v27  ;;  %16436 = vmatpush3.msra.mxu0 %v18184_v27 }
 0x162   :  { %16439 = vmatprep.mubr.f32.mxu0 %v508_v55  ;;  %16471 = vmatpush3.msra.mxu1 %v18184_v27 }
 0x163   :  { %16474 = vmatprep.mubr.f32.mxu1 %v18178_v43  ;;  %16437 = vmatprep.subr.mxu0 %v18190_v59 }
 0x164   :  { %16472 = vmatprep.subr.mxu1 %v18190_v59  ;;  %16438 = vmatpush3.msra.mxu0 %v18190_v59 }
 0x165   :  { %16473 = vmatpush3.msra.mxu1 %v18190_v59  ;;  %16440 = vmatmul.mubr.f32.vlgmr.msra.gmra.mxu0 %v518_v8 }
 0x166   :  { %16449 = vmatprep.subr.mxu0 %v18194_v51  ;;  %16475 = vmatmul.mubr.f32.vlgmr.msra.gmra.mxu1 %v18205_v2 }
 0x167   :  { %16450 = vmatpush3.msra.mxu0 %v18194_v51  ;;  %16453 = vmatprep.mubr.f32.mxu0 %v18181_v48 }
 0x168   :  { %16451 = vmatprep.subr.mxu0 %v18199_v62  ;;  %16482 = vmatprep.subr.mxu1 %v17927_v12 }
 0x169   :  { %16452 = vmatpush3.msra.mxu0 %v18199_v62  ;;  %16484 = vmatprep.mubr.msk.f32.mxu1 %vm17928_vm12, %v17927_v12 }
 0x16a   :  { %16454 = vmatmul.mubr.f32.vlgmr.msra.gmra.mxu0 %v515_v57  ;;  %16463 = vmatprep.subr.mxu0 %v18203_v1 }
 0x16b   :  { %16464 = vmatpush3.msra.mxu0 %v18203_v1  ;;  %16467 = vmatprep.mubr.f32.mxu0 %v18178_v43 }
 0x16c   :  { %16465 = vmatprep.subr.mxu0 %v18210_v33  ;;  %1459 = vrot.lane.b32.xlu0 %v18271_v14, %s17929_s7 }
 0x16d   :  { %16466 = vmatpush3.msra.mxu0 %v18210_v33 }
 0x16e   :  { %16468 = vmatmul.mubr.f32.vlgmr.msra.gmra.mxu0 %v18205_v2  ;;  %16477 = vmatprep.subr.mxu0 %v17927_v12 }
 0x16f   :  { %16479 = vmatprep.mubr.msk.f32.mxu0 %vm17928_vm12, %v17927_v12 }
 0x170   :  { %1924 = vrot.lane.b32.xlu0 %v18271_v14, %s17930_s22 }
 0x20c   :  { %v16406_v15 = vpop.f32.mrf.mxu1 }
 0x20e   :  { %v601_v16 = vpop.f32.mrf.mxu1 }
 0x210   :  { %v16420_v17 = vpop.f32.mrf.mxu1 }
 0x212   :  { %v765_v19 = vpop.f32.mrf.mxu1 }
 0x214   :  { %v16399_v11 = vpop.f32.mrf.mxu0  ;;  %v16434_v47 = vpop.f32.mrf.mxu1 }
 0x215   :  { %v521_v13 = vadd.f32 %v16399_v11, %v15849_v10 }
 0x216   :  { %v510_v18 = vpop.f32.mrf.mxu0  ;;  %v929_v22 = vpop.f32.mrf.mxu1 }
 0x217   :  { %v511_v20 = vadd.f32 %v15849_v10, %v510_v18  ;;  %v608_v29 = vadd.f32 %v16406_v15, %v521_v13  ;;  %v1460_v15 = vpop.permute.xlu0 %1459 }
 0x219   :  { %v16413_v7 = vpop.f32.mrf.mxu0  ;;  %v602_v21 = vadd.f32 %v601_v16, %v511_v20  ;;  %v1462_v16 = vmul.f32 %v1460_v15, %v18271_v14 }
 0x21a   :  { %v691_v23 = vadd.f32 %v16413_v7, %v608_v29  ;;  %v16448_v28 = vpop.f32.mrf.mxu1 }
 0x21b   :  { %v683_v24 = vpop.f32.mrf.mxu0  ;;  %2377 = vrot.lane.b32.xlu0 %v1462_v16, %s17930_s22 }
 0x21c   :  { %v684_v25 = vadd.f32 %v683_v24, %v602_v21  ;;  %v774_v26 = vadd.f32 %v16420_v17, %v691_v23  ;;  %v1112_v34 = vpop.f32.mrf.mxu1  ;;  %v1463_v17 = vmul.f32 %v18271_v14, %v18271_v14 }
 0x21e   :  { %v766_v40 = vadd.f32 %v765_v19, %v684_v25 }
 0x21f   :  { %v16427_v30 = vpop.f32.mrf.mxu0  ;;  %2827 = vrot.lane.b32.xlu0 %v1463_v17, %s17930_s22 }
 0x220   :  { %v857_v35 = vadd.f32 %v16427_v30, %v774_v26  ;;  %v16462_v43 = vpop.f32.mrf.mxu1 }
 0x221   :  { %v850_v36 = vpop.f32.mrf.mxu0 }
 0x222   :  { %v18275_v38 = vadd.f32 %v16434_v47, %v857_v35  ;;  %v851_v39 = vadd.f32 %v850_v36, %v766_v40  ;;  %v1276_v52 = vpop.f32.mrf.mxu1  ;;  %v1925_v35 = vpop.permute.xlu0 %1924 }
 0x223   :  { %v1961_v36 = vand.u32 4294901760, %v1925_v35 }
 0x224   :  { %v930_v42 = vadd.f32 %v929_v22, %v851_v39 }
 0x225   :  { %v16441_v37 = vpop.f32.mrf.mxu0 }
 0x226   :  { %v1465_v44 = vsel %vm430_vm7, %v930_v42, 0  ;;  %v1032_v46 = vadd.f32 %v16441_v37, %v15850_v41  ;;  %v16476_v53 = vpop.f32.mrf.mxu1 }
 0x227   :  { %v1021_v48 = vpop.f32.mrf.mxu0  ;;  %v1536_v50 = vand.u32 4294901760, %v1465_v44 }
 0x228   :  { %v1022_v27 = vadd.f32 %v15850_v41, %v1021_v48  ;;  %v1119_v49 = vadd.f32 %v16448_v28, %v1032_v46  ;;  %v1440_v2 = vpop.f32.mrf.mxu1 }
 0x229   :  { %v1537_v45 = vsub.f32 %v1465_v44, %v1536_v50 }
 0x22a   :  { %v16455_v54 = vpop.f32.mrf.mxu0  ;;  %v1113_v56 = vadd.f32 %v1112_v34, %v1022_v27  ;;  %v2038_v34 = vsub.f32 %v1925_v35, %v1961_v36 }
 0x22b   :  { %v1202_v58 = vadd.f32 %v16455_v54, %v1119_v49  ;;  %v1538_v1 = vand.u32 4294901760, %v1537_v45 }
 0x22c   :  { %v1194_v59 = vpop.f32.mrf.mxu0  ;;  %v2039_v39 = vand.u32 4294901760, %v2038_v34 }
 0x22d   :  { %v1195_v60 = vadd.f32 %v1194_v59, %v1113_v56  ;;  %v1285_v51 = vadd.f32 %v16462_v43, %v1202_v58  ;;  %v1539_v3 = vsub.f32 %v1537_v45, %v1538_v1 }
 0x22e   :  { %v16469_v31 = vpop.f32.mrf.mxu0  ;;  %v2040_v41 = vsub.f32 %v2038_v34, %v2039_v39 }
 0x22f   :  { %v1368_v32 = vadd.f32 %v16469_v31, %v1285_v51  ;;  %v1277_v55 = vadd.f32 %v1276_v52, %v1195_v60  ;;  %v1540_v5 = vand.u32 4294901760, %v1539_v3 }
 0x230   :  { %v1361_v61 = vpop.f32.mrf.mxu0  ;;  %v2041_v42 = vand.u32 4294901760, %v2040_v41 }
 0x231   :  { %v18278_v62 = vadd.f32 %v16476_v53, %v1368_v32  ;;  %v1362_v63 = vadd.f32 %v1361_v61, %v1277_v55 }
 0x233   :  { %v1441_v57 = vadd.f32 %v1440_v2, %v1362_v63 }
 0x235   :  { %v1468_v33 = vsel %vm430_vm7, %v1441_v57, 0 }
 0x236   :  { %v1501_v4 = vand.u32 4294901760, %v1468_v33 }
 0x238   :  { %v1578_v0 = vsub.f32 %v1468_v33, %v1501_v4  ;;  %16478 = vmatpush3.xpose.msra.mxu0 %v1501_v4 }
 0x239   :  { %16487 = vmatprep.subr.mxu0 %v17927_v12 }
 0x23a   :  { %v1579_v6 = vand.u32 4294901760, %v1578_v0 }
 0x23b   :  { %16480 = vmatmul.mubr.f32.vlgmr.msra.gmra.mxu0 %v1540_v5 }
 0x23c   :  { %16488 = vmatpush3.xpose.msra.mxu0 %v1578_v0  ;;  %16489 = vmatprep.mubr.msk.f32.mxu0 %vm17928_vm12, %v17927_v12  ;;  %v1580_v8 = vsub.f32 %v1578_v0, %v1579_v6 }
 0x23d   :  { %16497 = vmatprep.subr.mxu0 %v17927_v12 }
 0x23e   :  { %v1581_v9 = vand.u32 4294901760, %v1580_v8 }
 0x23f   :  { %16490 = vmatmul.mubr.f32.vlgmr.msra.gmra.mxu0 %v1537_v45 }
 0x240   :  { %16483 = vmatpush3.xpose.msra.mxu1 %v1581_v9  ;;  %16498 = vmatpush3.xpose.msra.mxu0 %v1579_v6 }
 0x241   :  { %16499 = vmatprep.mubr.msk.f32.mxu0 %vm17928_vm12, %v17927_v12  ;;  %16492 = vmatprep.subr.mxu1 %v17927_v12 }
 0x242   :  { %16507 = vmatprep.subr.mxu0 %v17927_v12 }
 0x243   :  { %16485 = vmatmul.mubr.f32.vlgmr.msra.gmra.mxu1 %v1536_v50  ;;  %16500 = vmatmul.mubr.f32.vlgmr.msra.gmra.mxu0 %v1536_v50 }
 0x244   :  { %16493 = vmatpush3.xpose.msra.mxu1 %v1501_v4  ;;  %16494 = vmatprep.mubr.msk.f32.mxu1 %vm17928_vm12, %v17927_v12 }
 0x245   :  { %16502 = vmatprep.subr.mxu1 %v17927_v12  ;;  %16509 = vmatprep.mubr.msk.f32.mxu0 %vm17928_vm12, %v17927_v12 }
 0x246   :  { %16508 = vmatpush3.msra.mxu0 %v1961_v36 }
 0x247   :  { %16495 = vmatmul.mubr.f32.vlgmr.msra.gmra.mxu1 %v1538_v1  ;;  %16517 = vmatprep.subr.mxu0 %v17927_v12  ;;  %v3284_v1 = vld [vmem:[#allocation14] sm:$0xf] }
 0x248   :  { %16503 = vmatpush3.xpose.msra.mxu1 %v1501_v4  ;;  %16504 = vmatprep.mubr.msk.f32.mxu1 %vm17928_vm12, %v17927_v12  ;;  %v3291_v2 = vsel %vm3289_vm14, %v3284_v1, 0 }
 0x249   :  { %16512 = vmatprep.subr.mxu1 %v17927_v12  ;;  %v18382_v57 = vand.u32 4294901760, %v3291_v2 }
 0x24b   :  { %16505 = vmatmul.mubr.f32.vlgmr.msra.gmra.mxu1 %v1536_v50  ;;  %v18385_v33 = vsub.f32 %v3291_v2, %v18382_v57 }
 0x24c   :  { %16514 = vmatprep.mubr.msk.f32.mxu1 %vm17928_vm12, %v17927_v12  ;;  %16513 = vmatpush3.msra.mxu1 %v2041_v42 }
 0x24d   :  { %16522 = vmatprep.subr.mxu1 %v17927_v12  ;;  %v3402_v3 = vand.u32 4294901760, %v18385_v33 }
 0x24f   :  { %v3403_v4 = vsub.f32 %v18385_v33, %v3402_v3 }
 0x251   :  { %v3404_v0 = vand.u32 4294901760, %v3403_v4 }
 0x28d   :  { %v2378_v46 = vpop.permute.xlu0 %2377 }
 0x28e   :  { %v2411_v48 = vand.u32 4294901760, %v2378_v46 }
 0x290   :  { %v2488_v27 = vsub.f32 %v2378_v46, %v2411_v48 }
 0x291   :  { %v2828_v56 = vpop.permute.xlu0 %2827 }
 0x292   :  { %v2489_v52 = vand.u32 4294901760, %v2488_v27  ;;  %v2861_v45 = vand.u32 4294901760, %v2828_v56 }
 0x294   :  { %v2490_v59 = vsub.f32 %v2488_v27, %v2489_v52  ;;  %v2938_v31 = vsub.f32 %v2828_v56, %v2861_v45  ;;  %v3283_v56 = vld [vmem:[#allocation12] sm:$0xf] }
 0x296   :  { %v2491_v53 = vand.u32 4294901760, %v2490_v59  ;;  %v2939_v55 = vand.u32 4294901760, %v2938_v31 }
 0x298   :  { %v2940_v61 = vsub.f32 %v2938_v31, %v2939_v55 }
 0x29a   :  { %v2941_v63 = vand.u32 4294901760, %v2940_v61 }
 0x2fb   :  { %v1542_v19 = vpop.f32.mrf.mxu0 }
 0x2fd   :  { %v16481_v10 = vpop.f32.mrf.mxu0 }
 0x2ff   :  { %v1692_v11 = vpop.f32.mrf.mxu0 }
 0x301   :  { %v16491_v13 = vpop.f32.mrf.mxu0 }
 0x303   :  { %v1618_v47 = vpop.f32.mrf.mxu1  ;;  %v1840_v18 = vpop.f32.mrf.mxu0 }
 0x304   :  { %v1619_v20 = vadd.f32 %v1618_v47, %v1542_v19 }
 0x305   :  { %v16486_v29 = vpop.f32.mrf.mxu1  ;;  %v16501_v7 = vpop.f32.mrf.mxu0 }
 0x306   :  { %v1693_v21 = vadd.f32 %v1692_v11, %v1619_v20 }
 0x307   :  { %v1766_v22 = vpop.f32.mrf.mxu1 }
 0x308   :  { %v1767_v23 = vadd.f32 %v1766_v22, %v1693_v21 }
 0x309   :  { %v16496_v24 = vpop.f32.mrf.mxu1 }
 0x30a   :  { %v1841_v25 = vadd.f32 %v1840_v18, %v1767_v23 }
 0x30b   :  { %v1912_v26 = vpop.f32.mrf.mxu1 }
 0x30c   :  { %v1913_v28 = vadd.f32 %v1912_v26, %v1841_v25 }
 0x30d   :  { %v16506_v40 = vpop.f32.mrf.mxu1 }
 0x30e   :  { %v1916_v14 = vmul.f32 0.25, %v1913_v28 }
 0x310   :  { %v1918_v30 = vsel %vm1917_vm13, %v1916_v14, -inf }
 0x311   :  { %1919 = vmax.xlane.f32.xlu1 %v1918_v30 }
 0x39a   :  { %v1920_v37 = vpop.xlane.xlu1 %1919 }
 0x39b   :  { %v1921_v43 = vsub.f32 %v1916_v14, %v1920_v37 }
 0x39d   :  { %v1922_v44 = vmul.f32 1.442695, %v1921_v43 }
 0x39f   :  { %17635 = vpow2.f32 %v1922_v44 }
 0x3ac   :  { %v17636_v49 = vpop.eup %17635 }
 0x3ad   :  { %v1928_v50 = vsel %vm1917_vm13, %v17636_v49, 0 }
 0x3ae   :  { %v18310_v54 = vand.u32 4294901760, %v1928_v50 }
 0x3b0   :  { %v18313_v58 = vsub.f32 %v1928_v50, %v18310_v54  ;;  %16515 = vmatmul.mubr.f32.vlgmr.msra.gmra.mxu1 %v18310_v54 }
 0x3b1   :  { %16523 = vmatpush3.msra.mxu1 %v1961_v36  ;;  %16524 = vmatprep.mubr.msk.f32.mxu1 %vm17928_vm12, %v17927_v12 }
 0x3b2   :  { %16532 = vmatprep.subr.mxu1 %v17927_v12  ;;  %v1998_v60 = vand.u32 4294901760, %v18313_v58 }
 0x3b4   :  { %16525 = vmatmul.mubr.f32.vlgmr.msra.gmra.mxu1 %v1998_v60  ;;  %v1999_v51 = vsub.f32 %v18313_v58, %v1998_v60 }
 0x3b5   :  { %16533 = vmatpush3.msra.mxu1 %v1961_v36  ;;  %16534 = vmatprep.mubr.msk.f32.mxu1 %vm17928_vm12, %v17927_v12 }
 0x3b6   :  { %v2000_v32 = vand.u32 4294901760, %v1999_v51  ;;  %16542 = vmatprep.subr.mxu1 %v17927_v12  ;;  %v3743_v51 = vsel %vm3289_vm14, %v3283_v56, 0 }
 0x3b8   :  { %16510 = vmatmul.mubr.f32.vlgmr.msra.gmra.mxu0 %v2000_v32  ;;  %16535 = vmatmul.mubr.f32.vlgmr.msra.gmra.mxu1 %v18310_v54 }
 0x3b9   :  { %16518 = vmatpush3.msra.mxu0 %v2038_v34  ;;  %16543 = vmatpush3.msra.mxu1 %v2491_v53 }
 0x3ba   :  { %16519 = vmatprep.mubr.msk.f32.mxu0 %vm17928_vm12, %v17927_v12  ;;  %16527 = vmatprep.subr.mxu0 %v17927_v12 }
 0x3bb   :  { %16544 = vmatprep.mubr.msk.f32.mxu1 %vm17928_vm12, %v17927_v12  ;;  %16552 = vmatprep.subr.mxu1 %v17927_v12 }
 0x3bc   :  { %16520 = vmatmul.mubr.f32.vlgmr.msra.gmra.mxu0 %v18313_v58  ;;  %16545 = vmatmul.mubr.f32.vlgmr.msra.gmra.mxu1 %v18310_v54 }
 0x3bd   :  { %16528 = vmatpush3.msra.mxu0 %v2039_v39  ;;  %16553 = vmatpush3.msra.mxu1 %v2411_v48 }
 0x3be   :  { %16529 = vmatprep.mubr.msk.f32.mxu0 %vm17928_vm12, %v17927_v12  ;;  %16537 = vmatprep.subr.mxu0 %v17927_v12 }
 0x3bf   :  { %16554 = vmatprep.mubr.msk.f32.mxu1 %vm17928_vm12, %v17927_v12  ;;  %16562 = vmatprep.subr.mxu1 %v17927_v12 }
 0x3c0   :  { %16530 = vmatmul.mubr.f32.vlgmr.msra.gmra.mxu0 %v18310_v54  ;;  %16555 = vmatmul.mubr.f32.vlgmr.msra.gmra.mxu1 %v1998_v60 }
 0x3c1   :  { %16538 = vmatpush3.msra.mxu0 %v2411_v48  ;;  %16563 = vmatpush3.msra.mxu1 %v2411_v48 }
 0x3c2   :  { %16539 = vmatprep.mubr.msk.f32.mxu0 %vm17928_vm12, %v17927_v12  ;;  %16547 = vmatprep.subr.mxu0 %v17927_v12 }
 0x3c3   :  { %16564 = vmatprep.mubr.msk.f32.mxu1 %vm17928_vm12, %v17927_v12  ;;  %16572 = vmatprep.subr.mxu1 %v17927_v12 }
 0x3c4   :  { %16540 = vmatmul.mubr.f32.vlgmr.msra.gmra.mxu0 %v2000_v32  ;;  %16565 = vmatmul.mubr.f32.vlgmr.msra.gmra.mxu1 %v18310_v54 }
 0x3c5   :  { %16548 = vmatpush3.msra.mxu0 %v2488_v27  ;;  %16573 = vmatpush3.msra.mxu1 %v2941_v63  ;;  %v3776_v63 = vand.u32 4294901760, %v3743_v51 }
 0x3c6   :  { %16549 = vmatprep.mubr.msk.f32.mxu0 %vm17928_vm12, %v17927_v12  ;;  %16557 = vmatprep.subr.mxu0 %v17927_v12 }
 0x3c7   :  { %16574 = vmatprep.mubr.msk.f32.mxu1 %vm17928_vm12, %v17927_v12  ;;  %16582 = vmatprep.subr.mxu1 %v17927_v12 }
 0x3c8   :  { %16550 = vmatmul.mubr.f32.vlgmr.msra.gmra.mxu0 %v18313_v58  ;;  %16575 = vmatmul.mubr.f32.vlgmr.msra.gmra.mxu1 %v18310_v54 }
 0x3c9   :  { %16558 = vmatpush3.msra.mxu0 %v2489_v52  ;;  %16583 = vmatpush3.msra.mxu1 %v2861_v45 }
 0x3ca   :  { %16559 = vmatprep.mubr.msk.f32.mxu0 %vm17928_vm12, %v17927_v12  ;;  %16567 = vmatprep.subr.mxu0 %v17927_v12 }
 0x3cb   :  { %16584 = vmatprep.mubr.msk.f32.mxu1 %vm17928_vm12, %v17927_v12  ;;  %16592 = vmatprep.subr.mxu1 %v17927_v12 }
 0x3cc   :  { %16560 = vmatmul.mubr.f32.vlgmr.msra.gmra.mxu0 %v18310_v54  ;;  %16585 = vmatmul.mubr.f32.vlgmr.msra.gmra.mxu1 %v1998_v60 }
 0x3cd   :  { %16568 = vmatpush3.msra.mxu0 %v2861_v45  ;;  %16593 = vmatpush3.msra.mxu1 %v2861_v45 }
 0x3ce   :  { %16569 = vmatprep.mubr.msk.f32.mxu0 %vm17928_vm12, %v17927_v12  ;;  %16577 = vmatprep.subr.mxu0 %v17927_v12 }
 0x3cf   :  { %16594 = vmatprep.mubr.msk.f32.mxu1 %vm17928_vm12, %v17927_v12  ;;  %16602 = vmatprep.subr.mxu1 %v17927_v12 }
 0x3d0   :  { %16570 = vmatmul.mubr.f32.vlgmr.msra.gmra.mxu0 %v2000_v32  ;;  %16595 = vmatmul.mubr.f32.vlgmr.msra.gmra.mxu1 %v18310_v54 }
 0x3d1   :  { %16578 = vmatpush3.msra.mxu0 %v2938_v31  ;;  %16579 = vmatprep.mubr.msk.f32.mxu0 %vm17928_vm12, %v17927_v12 }
 0x3d2   :  { %16587 = vmatprep.subr.mxu0 %v17927_v12  ;;  %16604 = vmatprep.mubr.msk.f32.mxu1 %vm17928_vm12, %v17927_v12 }
 0x3d3   :  { %16603 = vmatpush3.msra.mxu1 %v3404_v0 }
 0x3d4   :  { %16580 = vmatmul.mubr.f32.vlgmr.msra.gmra.mxu0 %v18313_v58  ;;  %16612 = vmatprep.subr.mxu1 %v17927_v12 }
 0x3d5   :  { %16588 = vmatpush3.msra.mxu0 %v2939_v55  ;;  %16589 = vmatprep.mubr.msk.f32.mxu0 %vm17928_vm12, %v17927_v12 }
 0x3d6   :  { %16597 = vmatprep.subr.mxu0 %v17927_v12 }
 0x3d8   :  { %16590 = vmatmul.mubr.f32.vlgmr.msra.gmra.mxu0 %v18310_v54 }
 0x3d9   :  { %16599 = vmatprep.mubr.msk.f32.mxu0 %vm17928_vm12, %v17927_v12  ;;  %16598 = vmatpush3.msra.mxu0 %v18382_v57 }
 0x3da   :  { %16607 = vmatprep.subr.mxu0 %v17927_v12 }
 0x470   :  { %v2078_v5 = vpop.f32.mrf.mxu1 }
 0x472   :  { %v16516_v6 = vpop.f32.mrf.mxu1 }
 0x474   :  { %v2226_v8 = vpop.f32.mrf.mxu1 }
 0x476   :  { %v16526_v9 = vpop.f32.mrf.mxu1 }
 0x478   :  { %v2002_v15 = vpop.f32.mrf.mxu0  ;;  %v2372_v16 = vpop.f32.mrf.mxu1 }
 0x479   :  { %v2079_v10 = vadd.f32 %v2078_v5, %v2002_v15  ;;  %v3853_v5 = vsub.f32 %v3743_v51, %v3776_v63 }
 0x47a   :  { %v16511_v17 = vpop.f32.mrf.mxu0  ;;  %v16536_v19 = vpop.f32.mrf.mxu1 }
 0x47c   :  { %v2152_v11 = vpop.f32.mrf.mxu0  ;;  %v2528_v13 = vpop.f32.mrf.mxu1 }
 0x47d   :  { %v2153_v47 = vadd.f32 %v2152_v11, %v2079_v10 }
 0x47e   :  { %v16521_v18 = vpop.f32.mrf.mxu0  ;;  %v16546_v20 = vpop.f32.mrf.mxu1 }
 0x47f   :  { %v2227_v29 = vadd.f32 %v2226_v8, %v2153_v47 }
 0x480   :  { %v2300_v7 = vpop.f32.mrf.mxu0  ;;  %v2676_v21 = vpop.f32.mrf.mxu1 }
 0x481   :  { %v2301_v22 = vadd.f32 %v2300_v7, %v2227_v29 }
 0x482   :  { %v16531_v23 = vpop.f32.mrf.mxu0  ;;  %v16556_v24 = vpop.f32.mrf.mxu1 }
 0x483   :  { %v2373_v25 = vadd.f32 %v2372_v16, %v2301_v22  ;;  %v3854_v16 = vand.u32 4294901760, %v3853_v5  ;;  %v1452_v22 = vld [vmem:[%s19498_s13] sm:$0xff] }
 0x484   :  { %v2452_v26 = vpop.f32.mrf.mxu0  ;;  %v2822_v28 = vpop.f32.mrf.mxu1  ;;  %v18450_v24 = vand.u32 4294901760, %v1452_v22 }
 0x485   :  { %vm3276_vm15 = vcmp.gt.f32.partialorder %v2373_v25, 0.0  ;;  %v2529_v41 = vadd.f32 %v2528_v13, %v2452_v26  ;;  %v3855_v11 = vsub.f32 %v3853_v5, %v3854_v16 }
 0x486   :  { %v16541_v40 = vpop.f32.mrf.mxu0  ;;  %v16566_v14 = vpop.f32.mrf.mxu1  ;;  %v3277_v30 = vsel %vm3276_vm15, %v2373_v25, 1.0  ;;  %v18458_v26 = vsub.f32 %v1452_v22, %v18450_v24 }
 0x487   :  { %17637 = vrcp.f32 %v3277_v30  ;;  %v3856_v20 = vand.u32 4294901760, %v3855_v11 }
 0x488   :  { %v2602_v35 = vpop.f32.mrf.mxu0  ;;  %v2978_v36 = vpop.f32.mrf.mxu1  ;;  %v18465_v40 = vand.u32 4294901760, %v18458_v26 }
 0x489   :  { %v2603_v43 = vadd.f32 %v2602_v35, %v2529_v41 }
 0x48a   :  { %v16551_v34 = vpop.f32.mrf.mxu0  ;;  %v16576_v39 = vpop.f32.mrf.mxu1  ;;  %v4324_v30 = vsub.f32 %v18458_v26, %v18465_v40 }
 0x48b   :  { %v2677_v49 = vadd.f32 %v2676_v21, %v2603_v43 }
 0x48c   :  { %v2750_v42 = vpop.f32.mrf.mxu0  ;;  %v3126_v37 = vpop.f32.mrf.mxu1  ;;  %v18472_v35 = vand.u32 4294901760, %v4324_v30 }
 0x48d   :  { %v2751_v59 = vadd.f32 %v2750_v42, %v2677_v49 }
 0x48e   :  { %v16561_v44 = vpop.f32.mrf.mxu0  ;;  %v16586_v46 = vpop.f32.mrf.mxu1 }
 0x48f   :  { %v2823_v55 = vadd.f32 %v2822_v28, %v2751_v59 }
 0x490   :  { %v2902_v48 = vpop.f32.mrf.mxu0  ;;  %v3272_v27 = vpop.f32.mrf.mxu1 }
 0x491   :  { %v2979_v54 = vadd.f32 %v2978_v36, %v2902_v48  ;;  %v18480_v36 = vld [vmem:[%s19517_s1 + $0x8] sm:$0xff] }
 0x492   :  { %v16571_v50 = vpop.f32.mrf.mxu0  ;;  %v16596_v52 = vpop.f32.mrf.mxu1  ;;  %4670 = vrot.lane.b32.xlu0 %v18480_v36, %s17929_s7  ;;  %5134 = vrot.lane.b32.xlu1 %v18480_v36, %s17930_s22 }
 0x494   :  { %v3052_v58 = vpop.f32.mrf.mxu0  ;;  %v17638_v31 = vpop.eup %17637 }
 0x495   :  { %v3053_v45 = vadd.f32 %v3052_v58, %v2979_v54  ;;  %v3279_v2 = vmul.f32 %v17638_v31, %v2823_v55 }
 0x496   :  { %v16581_v60 = vpop.f32.mrf.mxu0 }
 0x497   :  { %v3127_v53 = vadd.f32 %v3126_v37, %v3053_v45  ;;  %v3280_v6 = vsel %vm3276_vm15, %v3279_v2, 0.0 }
 0x498   :  { %v3200_v32 = vpop.f32.mrf.mxu0  ;;  %v3740_v17 = vsel %vm3285_vm0, %v3280_v6, 0 }
 0x499   :  { %v3201_v61 = vadd.f32 %v3200_v32, %v3127_v53  ;;  %v3811_v13 = vand.u32 4294901760, %v3740_v17 }
 0x49a   :  { %v16591_v1 = vpop.f32.mrf.mxu0 }
 0x49b   :  { %v3273_v4 = vadd.f32 %v3272_v27, %v3201_v61  ;;  %v3812_v29 = vsub.f32 %v3740_v17, %v3811_v13 }
 0x49d   :  { %v3281_v0 = vmul.f32 %v17638_v31, %v3273_v4 }
 0x49f   :  { %v3282_v8 = vsel %vm3276_vm15, %v3281_v0, 0.0 }
 0x4a0   :  { %v3287_v9 = vsel %vm3285_vm0, %v3282_v8, 0 }
 0x4a1   :  { %v3359_v15 = vand.u32 4294901760, %v3287_v9 }
 0x4a3   :  { %16605 = vmatmul.mubr.f32.vlgmr.msra.gmra.mxu1 %v3359_v15  ;;  %v3360_v19 = vsub.f32 %v3287_v9, %v3359_v15 }
 0x4a4   :  { %16613 = vmatpush3.msra.mxu1 %v18382_v57  ;;  %16614 = vmatprep.mubr.msk.f32.mxu1 %vm17928_vm12, %v17927_v12 }
 0x4a5   :  { %v3361_v10 = vand.u32 4294901760, %v3360_v19  ;;  %16622 = vmatprep.subr.mxu1 %v17927_v12 }
 0x4a7   :  { %16615 = vmatmul.mubr.f32.vlgmr.msra.gmra.mxu1 %v3361_v10  ;;  %v3362_v47 = vsub.f32 %v3360_v19, %v3361_v10 }
 0x4a8   :  { %16623 = vmatpush3.msra.mxu1 %v18382_v57  ;;  %16624 = vmatprep.mubr.msk.f32.mxu1 %vm17928_vm12, %v17927_v12  ;;  %v3813_v57 = vand.u32 4294901760, %v3812_v29 }
 0x4a9   :  { %v3363_v18 = vand.u32 4294901760, %v3362_v47  ;;  %16632 = vmatprep.subr.mxu1 %v17927_v12 }
 0x4aa   :  { %v3814_v7 = vsub.f32 %v3812_v29, %v3813_v57 }
 0x4ab   :  { %16600 = vmatmul.mubr.f32.vlgmr.msra.gmra.mxu0 %v3363_v18  ;;  %16625 = vmatmul.mubr.f32.vlgmr.msra.gmra.mxu1 %v3359_v15 }
 0x4ac   :  { %16608 = vmatpush3.msra.mxu0 %v18385_v33  ;;  %16609 = vmatprep.mubr.msk.f32.mxu0 %vm17928_vm12, %v17927_v12  ;;  %v3815_v33 = vand.u32 4294901760, %v3814_v7 }
 0x4ad   :  { %16633 = vmatpush3.msra.mxu1 %v3856_v20  ;;  %16634 = vmatprep.mubr.msk.f32.mxu1 %vm17928_vm12, %v17927_v12 }
 0x4ae   :  { %16617 = vmatprep.subr.mxu0 %v17927_v12  ;;  %16642 = vmatprep.subr.mxu1 %v17927_v12 }
 0x4af   :  { %16610 = vmatmul.mubr.f32.vlgmr.msra.gmra.mxu0 %v3360_v19  ;;  %16635 = vmatmul.mubr.f32.vlgmr.msra.gmra.mxu1 %v3811_v13 }
 0x4b0   :  { %16618 = vmatpush3.msra.mxu0 %v3402_v3  ;;  %16619 = vmatprep.mubr.msk.f32.mxu0 %vm17928_vm12, %v17927_v12  ;;  %v1453_v3 = vld [vmem:[%s19498_s13 + $0x8] sm:$0xff] }
 0x4b1   :  { %16643 = vmatpush3.msra.mxu1 %v3776_v63  ;;  %16644 = vmatprep.mubr.msk.f32.mxu1 %vm17928_vm12, %v17927_v12  ;;  %v18442_v21 = vand.u32 4294901760, %v1453_v3 }
 0x4b2   :  { %16627 = vmatprep.subr.mxu0 %v17927_v12  ;;  %16652 = vmatprep.subr.mxu1 %v17927_v12 }
 0x4b3   :  { %16620 = vmatmul.mubr.f32.vlgmr.msra.gmra.mxu0 %v3359_v15  ;;  %16645 = vmatmul.mubr.f32.vlgmr.msra.gmra.mxu1 %v3813_v57  ;;  %v18448_v23 = vsub.f32 %v1453_v3, %v18442_v21 }
 0x4b4   :  { %16628 = vmatpush3.msra.mxu0 %v3776_v63  ;;  %16629 = vmatprep.mubr.msk.f32.mxu0 %vm17928_vm12, %v17927_v12 }
 0x4b5   :  { %16653 = vmatpush3.msra.mxu1 %v3776_v63  ;;  %16654 = vmatprep.mubr.msk.f32.mxu1 %vm17928_vm12, %v17927_v12  ;;  %v18455_v25 = vand.u32 4294901760, %v18448_v23 }
 0x4b6   :  { %16637 = vmatprep.subr.mxu0 %v17927_v12  ;;  %16664 = vmatprep.subr.mxu1 %v17927_v12 }
 0x4b7   :  { %16630 = vmatmul.mubr.f32.vlgmr.msra.gmra.mxu0 %v3815_v33  ;;  %16655 = vmatmul.mubr.f32.vlgmr.msra.gmra.mxu1 %v3811_v13  ;;  %v4317_v28 = vsub.f32 %v18448_v23, %v18455_v25 }
 0x4b8   :  { %16638 = vmatpush3.msra.mxu0 %v3853_v5  ;;  %16639 = vmatprep.mubr.msk.f32.mxu0 %vm17928_vm12, %v17927_v12  ;;  %v4679_v5 = vsel %vm430_vm7, %v18278_v62, 0  ;;  %v4676_v62 = vsel %vm430_vm7, %v18275_v38, 0 }
 0x4b9   :  { %16647 = vmatprep.subr.mxu0 %v17927_v12  ;;  %16668 = vmatprep.mubr.msk.f32.mxu1 %vm17928_vm12, %v17927_v12  ;;  %v18467_v14 = vand.u32 4294901760, %v4317_v28  ;;  %v4712_v15 = vand.u32 4294901760, %v4679_v5  ;;  %v4747_v57 = vand.u32 4294901760, %v4676_v62 }
 0x4bb   :  { %16640 = vmatmul.mubr.f32.vlgmr.msra.gmra.mxu0 %v3812_v29  ;;  %16665 = vmatpush3.msra.mxu1 %v18467_v14  ;;  %v18491_v11 = vsub.f32 %v4679_v5, %v4712_v15  ;;  %v4748_v3 = vsub.f32 %v4676_v62, %v4747_v57 }
 0x4bc   :  { %16648 = vmatpush3.msra.mxu0 %v3854_v16  ;;  %16649 = vmatprep.mubr.msk.f32.mxu0 %vm17928_vm12, %v17927_v12  ;;  %v18488_v16 = vld [vmem:[#allocation15] ss:$0 sm:$0xff] }
 0x4bd   :  { %16657 = vmatprep.subr.mxu0 %v17927_v12  ;;  %16666 = vmatprep.subr.mxu1 %v17927_v12  ;;  %v4790_v20 = vand.u32 4294901760, %v18491_v11  ;;  %v4749_v28 = vand.u32 4294901760, %v4748_v3 }
 0x4be   :  { %16667 = vmatpush3.msra.mxu1 %v18472_v35 }
 0x4bf   :  { %16650 = vmatmul.mubr.f32.vlgmr.msra.gmra.mxu0 %v3811_v13  ;;  %16678 = vmatprep.subr.mxu1 %v17927_v12  ;;  %v4791_v33 = vsub.f32 %v18491_v11, %v4790_v20  ;;  %v4750_v30 = vsub.f32 %v4748_v3, %v4749_v28 }
 0x4c0   :  { %16661 = vmatprep.mubr.msk.f32.mxu0 %vm17928_vm12, %v17927_v12  ;;  %16658 = vmatpush3.msra.mxu0 %v18442_v21 }
 0x4c1   :  { %16659 = vmatprep.subr.mxu0 %v17927_v12  ;;  %v4792_v22 = vand.u32 4294901760, %v4791_v33 }
 0x4c2   :  { %16660 = vmatpush3.msra.mxu0 %v18450_v24 }
 0x4c3   :  { %16671 = vmatprep.subr.mxu0 %v17927_v12 }
 0x563   :  { %v3441_v34 = vpop.f32.mrf.mxu1 }
 0x565   :  { %v16606_v39 = vpop.f32.mrf.mxu1 }
 0x566   :  { %v4674_v39 = vmul.f32 %v18480_v36, %v18480_v36 }
 0x567   :  { %v3589_v41 = vpop.f32.mrf.mxu1 }
 0x568   :  { %6037 = vrot.lane.b32.xlu1 %v4674_v39, %s17930_s22 }
 0x569   :  { %v16616_v42 = vpop.f32.mrf.mxu1 }
 0x56b   :  { %v3365_v37 = vpop.f32.mrf.mxu0  ;;  %v3735_v43 = vpop.f32.mrf.mxu1 }
 0x56c   :  { %v3442_v48 = vadd.f32 %v3441_v34, %v3365_v37  ;;  %v4751_v34 = vand.u32 4294901760, %v4750_v30 }
 0x56d   :  { %v16601_v44 = vpop.f32.mrf.mxu0  ;;  %v16626_v46 = vpop.f32.mrf.mxu1 }
 0x56e   :  { %v18551_v44 = vld [vmem:[%s19499_s14] ss:$0 sm:$0xff] }
 0x56f   :  { %v3515_v27 = vpop.f32.mrf.mxu0  ;;  %v3893_v49 = vpop.f32.mrf.mxu1 }
 0x570   :  { %v3516_v50 = vadd.f32 %v3515_v27, %v3442_v48 }
 0x571   :  { %v16611_v52 = vpop.f32.mrf.mxu0  ;;  %v16636_v54 = vpop.f32.mrf.mxu1 }
 0x572   :  { %v3590_v56 = vadd.f32 %v3589_v41, %v3516_v50 }
 0x573   :  { %v3663_v58 = vpop.f32.mrf.mxu0  ;;  %v4041_v59 = vpop.f32.mrf.mxu1 }
 0x574   :  { %v3664_v45 = vadd.f32 %v3663_v58, %v3590_v56 }
 0x575   :  { %v16621_v60 = vpop.f32.mrf.mxu0  ;;  %v16646_v51 = vpop.f32.mrf.mxu1 }
 0x576   :  { %v3736_v53 = vadd.f32 %v3735_v43, %v3664_v45 }
 0x577   :  { %v3817_v31 = vpop.f32.mrf.mxu0  ;;  %v4187_v32 = vpop.f32.mrf.mxu1 }
 0x578   :  { %v3818_v55 = vadd.f32 %v3817_v31, %v3736_v53 }
 0x579   :  { %v16631_v61 = vpop.f32.mrf.mxu0  ;;  %v16656_v63 = vpop.f32.mrf.mxu1 }
 0x57a   :  { %v3894_v1 = vadd.f32 %v3893_v49, %v3818_v55 }
 0x57b   :  { %v3967_v2 = vpop.f32.mrf.mxu0 }
 0x57c   :  { %v3968_v4 = vadd.f32 %v3967_v2, %v3894_v1 }
 0x57d   :  { %v16641_v0 = vpop.f32.mrf.mxu0 }
 0x57e   :  { %v4042_v6 = vadd.f32 %v4041_v59, %v3968_v4 }
 0x57f   :  { %v4115_v8 = vpop.f32.mrf.mxu0 }
 0x580   :  { %v4116_v9 = vadd.f32 %v4115_v8, %v4042_v6 }
 0x581   :  { %v16651_v17 = vpop.f32.mrf.mxu0 }
 0x582   :  { %v4188_v19 = vadd.f32 %v4187_v32, %v4116_v9 }
 0x584   :  { %v4198_v10 = vadd.f32 %v18488_v16, %v4188_v19 }
 0x586   :  { %v4206_v13 = vsel %vm430_vm7, %v4198_v10, 0 }
 0x587   :  { %v4275_v47 = vand.u32 4294901760, %v4206_v13 }
 0x589   :  { %v4276_v18 = vsub.f32 %v4206_v13, %v4275_v47  ;;  %16669 = vmatmul.mubr.f32.vlgmr.msra.gmra.mxu1 %v4275_v47 }
 0x58a   :  { %16679 = vmatpush3.msra.mxu1 %v18442_v21  ;;  %16682 = vmatprep.mubr.msk.f32.mxu1 %vm17928_vm12, %v17927_v12 }
 0x58b   :  { %16680 = vmatprep.subr.mxu1 %v17927_v12  ;;  %v4277_v29 = vand.u32 4294901760, %v4276_v18 }
 0x58c   :  { %16681 = vmatpush3.msra.mxu1 %v18450_v24 }
 0x58d   :  { %16692 = vmatprep.subr.mxu1 %v17927_v12  ;;  %16683 = vmatmul.mubr.f32.vlgmr.msra.gmra.mxu1 %v4277_v29  ;;  %v4278_v7 = vsub.f32 %v4276_v18, %v4277_v29 }
 0x58e   :  { %16693 = vmatpush3.msra.mxu1 %v18442_v21  ;;  %16696 = vmatprep.mubr.msk.f32.mxu1 %vm17928_vm12, %v17927_v12 }
 0x58f   :  { %16694 = vmatprep.subr.mxu1 %v17927_v12  ;;  %v4279_v38 = vand.u32 4294901760, %v4278_v7 }
 0x590   :  { %16695 = vmatpush3.msra.mxu1 %v18450_v24 }
 0x591   :  { %16704 = vmatprep.subr.mxu1 %v17927_v12  ;;  %16662 = vmatmul.mubr.f32.vlgmr.msra.gmra.mxu0 %v4279_v38 }
 0x592   :  { %16672 = vmatpush3.msra.mxu0 %v18448_v23  ;;  %16697 = vmatmul.mubr.f32.vlgmr.msra.gmra.mxu1 %v4275_v47 }
 0x593   :  { %16705 = vmatpush3.xpose.msra.mxu1 %v4792_v22  ;;  %16673 = vmatprep.subr.mxu0 %v17927_v12 }
 0x594   :  { %16674 = vmatpush3.msra.mxu0 %v18458_v26  ;;  %16675 = vmatprep.mubr.msk.f32.mxu0 %vm17928_vm12, %v17927_v12 }
 0x595   :  { %16685 = vmatprep.subr.mxu0 %v17927_v12  ;;  %16706 = vmatprep.mubr.msk.f32.mxu1 %vm17928_vm12, %v17927_v12 }
 0x596   :  { %16714 = vmatprep.subr.mxu1 %v17927_v12  ;;  %16676 = vmatmul.mubr.f32.vlgmr.msra.gmra.mxu0 %v4276_v18 }
 0x597   :  { %16686 = vmatpush3.msra.mxu0 %v18455_v25  ;;  %16707 = vmatmul.mubr.f32.vlgmr.msra.gmra.mxu1 %v4747_v57 }
 0x598   :  { %16715 = vmatpush3.xpose.msra.mxu1 %v4712_v15  ;;  %16687 = vmatprep.subr.mxu0 %v17927_v12 }
 0x599   :  { %16688 = vmatpush3.msra.mxu0 %v18465_v40  ;;  %16689 = vmatprep.mubr.msk.f32.mxu0 %vm17928_vm12, %v17927_v12 }
 0x59a   :  { %16699 = vmatprep.subr.mxu0 %v17927_v12  ;;  %16716 = vmatprep.mubr.msk.f32.mxu1 %vm17928_vm12, %v17927_v12 }
 0x59b   :  { %16724 = vmatprep.subr.mxu1 %v17927_v12  ;;  %16690 = vmatmul.mubr.f32.vlgmr.msra.gmra.mxu0 %v4275_v47  ;;  %v4671_v47 = vpop.permute.xlu0 %4670 }
 0x59c   :  { %16700 = vmatpush3.xpose.msra.mxu0 %v4712_v15  ;;  %16717 = vmatmul.mubr.f32.vlgmr.msra.gmra.mxu1 %v4749_v28  ;;  %v4673_v18 = vmul.f32 %v4671_v47, %v18480_v36 }
 0x59d   :  { %16725 = vmatpush3.xpose.msra.mxu1 %v4712_v15  ;;  %16701 = vmatprep.mubr.msk.f32.mxu0 %vm17928_vm12, %v17927_v12 }
 0x59e   :  { %16709 = vmatprep.subr.mxu0 %v17927_v12  ;;  %16726 = vmatprep.mubr.msk.f32.mxu1 %vm17928_vm12, %v17927_v12 }
 0x59f   :  { %16702 = vmatmul.mubr.f32.vlgmr.msra.gmra.mxu0 %v4751_v34  ;;  %16734 = vmatprep.subr.mxu1 %v17927_v12 }
 0x5a0   :  { %16710 = vmatpush3.xpose.msra.mxu0 %v18491_v11  ;;  %16727 = vmatmul.mubr.f32.vlgmr.msra.gmra.mxu1 %v4747_v57 }
 0x5a1   :  { %16711 = vmatprep.mubr.msk.f32.mxu0 %vm17928_vm12, %v17927_v12  ;;  %16719 = vmatprep.subr.mxu0 %v17927_v12 }
 0x5a2   :  { %16736 = vmatprep.mubr.msk.f32.mxu1 %vm17928_vm12, %v17927_v12 }
 0x5a3   :  { %16712 = vmatmul.mubr.f32.vlgmr.msra.gmra.mxu0 %v4748_v3 }
 0x5a4   :  { %16720 = vmatpush3.xpose.msra.mxu0 %v4790_v20  ;;  %16721 = vmatprep.mubr.msk.f32.mxu0 %vm17928_vm12, %v17927_v12  ;;  %v5135_v20 = vpop.permute.xlu1 %5134 }
 0x5a5   :  { %16729 = vmatprep.subr.mxu0 %v17927_v12  ;;  %v5171_v62 = vand.u32 4294901760, %v5135_v20 }
 0x5a7   :  { %16722 = vmatmul.mubr.f32.vlgmr.msra.gmra.mxu0 %v4747_v57  ;;  %v5248_v29 = vsub.f32 %v5135_v20, %v5171_v62 }
 0x5a8   :  { %16731 = vmatprep.mubr.msk.f32.mxu0 %vm17928_vm12, %v17927_v12  ;;  %16730 = vmatpush3.msra.mxu0 %v5171_v62 }
 0x5a9   :  { %16739 = vmatprep.subr.mxu0 %v17927_v12  ;;  %v5249_v57 = vand.u32 4294901760, %v5248_v29 }
 0x5ab   :  { %v5250_v7 = vsub.f32 %v5248_v29, %v5249_v57 }
 0x5ad   :  { %v5251_v33 = vand.u32 4294901760, %v5250_v7 }
 0x5af   :  { %16735 = vmatpush3.msra.mxu1 %v5251_v33 }
 0x5b0   :  { %16744 = vmatprep.subr.mxu1 %v17927_v12 }
 0x649   :  { %v4362_v41 = vpop.f32.mrf.mxu1 }
 0x64b   :  { %v16670_v42 = vpop.f32.mrf.mxu1 }
 0x64d   :  { %v4513_v37 = vpop.f32.mrf.mxu1 }
 0x64f   :  { %v16684_v43 = vpop.f32.mrf.mxu1 }
 0x651   :  { %v4281_v46 = vpop.f32.mrf.mxu0 }
 0x652   :  { %v4282_v48 = vadd.f32 %v18551_v44, %v4281_v46  ;;  %v4663_v27 = vpop.f32.mrf.mxu1 }
 0x653   :  { %v16663_v49 = vpop.f32.mrf.mxu0 }
 0x654   :  { %v16698_v50 = vpop.f32.mrf.mxu1  ;;  %v4363_v52 = vadd.f32 %v4362_v41, %v4282_v48 }
 0x656   :  { %v4438_v54 = vpop.f32.mrf.mxu0 }
 0x657   :  { %v4439_v56 = vadd.f32 %v4438_v54, %v4363_v52  ;;  %v4829_v58 = vpop.f32.mrf.mxu1 }
 0x658   :  { %v16677_v59 = vpop.f32.mrf.mxu0 }
 0x659   :  { %v16708_v45 = vpop.f32.mrf.mxu1  ;;  %v4514_v60 = vadd.f32 %v4513_v37, %v4439_v56  ;;  %v6038_v37 = vpop.permute.xlu1 %6037 }
 0x65a   :  { %v6071_v48 = vand.u32 4294901760, %v6038_v37  ;;  %v6494_v45 = vld [vmem:[#allocation14] sm:$0xf] }
 0x65b   :  { %v4590_v51 = vpop.f32.mrf.mxu0 }
 0x65c   :  { %v4591_v53 = vadd.f32 %v4590_v51, %v4514_v60  ;;  %v4977_v31 = vpop.f32.mrf.mxu1  ;;  %v6148_v52 = vsub.f32 %v6038_v37, %v6071_v48  ;;  %v6499_v60 = vsel %vm3289_vm14, %v6494_v45, 0 }
 0x65d   :  { %v16691_v32 = vpop.f32.mrf.mxu0  ;;  %v18633_v51 = vand.u32 4294901760, %v6499_v60 }
 0x65e   :  { %v4664_v55 = vadd.f32 %v4663_v27, %v4591_v53  ;;  %v16718_v61 = vpop.f32.mrf.mxu1  ;;  %v6149_v56 = vand.u32 4294901760, %v6148_v52 }
 0x65f   :  { %v4753_v63 = vpop.f32.mrf.mxu0  ;;  %v18636_v53 = vsub.f32 %v6499_v60, %v18633_v51 }
 0x660   :  { %4668 = vst.msk [vmem:[#allocation2] sm:$0xff] %vm4667_vm1, %v4664_v55  ;;  %v5123_v1 = vpop.f32.mrf.mxu1  ;;  %v4830_v4 = vadd.f32 %v4829_v58, %v4753_v63  ;;  %v6150_v58 = vsub.f32 %v6148_v52, %v6149_v56 }
 0x661   :  { %v16703_v2 = vpop.f32.mrf.mxu0 }
 0x662   :  { %v16728_v0 = vpop.f32.mrf.mxu1  ;;  %v6151_v59 = vand.u32 4294901760, %v6150_v58 }
 0x663   :  { %v4903_v5 = vpop.f32.mrf.mxu0 }
 0x664   :  { %v4904_v6 = vadd.f32 %v4903_v5, %v4830_v4 }
 0x665   :  { %v16713_v8 = vpop.f32.mrf.mxu0 }
 0x666   :  { %v4978_v9 = vadd.f32 %v4977_v31, %v4904_v6  ;;  %v6610_v31 = vand.u32 4294901760, %v18636_v53 }
 0x667   :  { %v5051_v15 = vpop.f32.mrf.mxu0 }
 0x668   :  { %v5052_v17 = vadd.f32 %v5051_v15, %v4978_v9  ;;  %v6611_v32 = vsub.f32 %v18636_v53, %v6610_v31 }
 0x669   :  { %v16723_v19 = vpop.f32.mrf.mxu0 }
 0x66a   :  { %v5124_v10 = vadd.f32 %v5123_v1, %v5052_v17  ;;  %v6612_v55 = vand.u32 4294901760, %v6611_v32 }
 0x66c   :  { %v5127_v11 = vmul.f32 0.25, %v5124_v10 }
 0x66e   :  { %v5128_v13 = vsel %vm1917_vm13, %v5127_v11, -inf }
 0x66f   :  { %5129 = vmax.xlane.f32.xlu0 %v5128_v13 }
 0x685   :  { %5587 = vrot.lane.b32.xlu0 %v4673_v18, %s17930_s22 }
 0x6f8   :  { %v5130_v38 = vpop.xlane.xlu0 %5129 }
 0x6f9   :  { %v5131_v3 = vsub.f32 %v5127_v11, %v5130_v38 }
 0x6fb   :  { %v5132_v22 = vmul.f32 1.442695, %v5131_v3 }
 0x6fc   :  { %v5588_v28 = vpop.permute.xlu0 %5587 }
 0x6fd   :  { %17639 = vpow2.f32 %v5132_v22  ;;  %v5621_v36 = vand.u32 4294901760, %v5588_v28 }
 0x6ff   :  { %v5698_v30 = vsub.f32 %v5588_v28, %v5621_v36 }
 0x701   :  { %v5699_v41 = vand.u32 4294901760, %v5698_v30 }
 0x703   :  { %v5700_v46 = vsub.f32 %v5698_v30, %v5699_v41 }
 0x705   :  { %v5701_v50 = vand.u32 4294901760, %v5700_v46 }
 0x70a   :  { %v17640_v34 = vpop.eup %17639 }
 0x70b   :  { %v5138_v39 = vsel %vm1917_vm13, %v17640_v34, 0 }
 0x70c   :  { %v18561_v42 = vand.u32 4294901760, %v5138_v39 }
 0x70e   :  { %v18564_v43 = vsub.f32 %v5138_v39, %v18561_v42  ;;  %16737 = vmatmul.mubr.f32.vlgmr.msra.gmra.mxu1 %v18561_v42 }
 0x70f   :  { %16745 = vmatpush3.msra.mxu1 %v5171_v62  ;;  %16746 = vmatprep.mubr.msk.f32.mxu1 %vm17928_vm12, %v17927_v12 }
 0x710   :  { %16754 = vmatprep.subr.mxu1 %v17927_v12  ;;  %v5208_v27 = vand.u32 4294901760, %v18564_v43 }
 0x712   :  { %16747 = vmatmul.mubr.f32.vlgmr.msra.gmra.mxu1 %v5208_v27  ;;  %v5209_v49 = vsub.f32 %v18564_v43, %v5208_v27 }
 0x713   :  { %16755 = vmatpush3.msra.mxu1 %v5171_v62  ;;  %16756 = vmatprep.mubr.msk.f32.mxu1 %vm17928_vm12, %v17927_v12 }
 0x714   :  { %v5210_v54 = vand.u32 4294901760, %v5209_v49  ;;  %16764 = vmatprep.subr.mxu1 %v17927_v12 }
 0x716   :  { %16732 = vmatmul.mubr.f32.vlgmr.msra.gmra.mxu0 %v5210_v54  ;;  %16757 = vmatmul.mubr.f32.vlgmr.msra.gmra.mxu1 %v18561_v42 }
 0x717   :  { %16740 = vmatpush3.msra.mxu0 %v5248_v29  ;;  %16765 = vmatpush3.msra.mxu1 %v5701_v50 }
 0x718   :  { %16741 = vmatprep.mubr.msk.f32.mxu0 %vm17928_vm12, %v17927_v12  ;;  %16749 = vmatprep.subr.mxu0 %v17927_v12 }
 0x719   :  { %16766 = vmatprep.mubr.msk.f32.mxu1 %vm17928_vm12, %v17927_v12  ;;  %16774 = vmatprep.subr.mxu1 %v17927_v12 }
 0x71a   :  { %16742 = vmatmul.mubr.f32.vlgmr.msra.gmra.mxu0 %v18564_v43  ;;  %16767 = vmatmul.mubr.f32.vlgmr.msra.gmra.mxu1 %v18561_v42 }
 0x71b   :  { %16750 = vmatpush3.msra.mxu0 %v5249_v57  ;;  %16775 = vmatpush3.msra.mxu1 %v5621_v36 }
 0x71c   :  { %16751 = vmatprep.mubr.msk.f32.mxu0 %vm17928_vm12, %v17927_v12  ;;  %16759 = vmatprep.subr.mxu0 %v17927_v12 }
 0x71d   :  { %16776 = vmatprep.mubr.msk.f32.mxu1 %vm17928_vm12, %v17927_v12  ;;  %16784 = vmatprep.subr.mxu1 %v17927_v12 }
 0x71e   :  { %16752 = vmatmul.mubr.f32.vlgmr.msra.gmra.mxu0 %v18561_v42  ;;  %16777 = vmatmul.mubr.f32.vlgmr.msra.gmra.mxu1 %v5208_v27 }
 0x71f   :  { %16760 = vmatpush3.msra.mxu0 %v5621_v36  ;;  %16785 = vmatpush3.msra.mxu1 %v5621_v36 }
 0x720   :  { %16761 = vmatprep.mubr.msk.f32.mxu0 %vm17928_vm12, %v17927_v12  ;;  %16769 = vmatprep.subr.mxu0 %v17927_v12 }
 0x721   :  { %16786 = vmatprep.mubr.msk.f32.mxu1 %vm17928_vm12, %v17927_v12  ;;  %16794 = vmatprep.subr.mxu1 %v17927_v12 }
 0x722   :  { %16762 = vmatmul.mubr.f32.vlgmr.msra.gmra.mxu0 %v5210_v54  ;;  %16787 = vmatmul.mubr.f32.vlgmr.msra.gmra.mxu1 %v18561_v42 }
 0x723   :  { %16770 = vmatpush3.msra.mxu0 %v5698_v30  ;;  %16795 = vmatpush3.msra.mxu1 %v6151_v59 }
 0x724   :  { %16771 = vmatprep.mubr.msk.f32.mxu0 %vm17928_vm12, %v17927_v12  ;;  %16779 = vmatprep.subr.mxu0 %v17927_v12 }
 0x725   :  { %16796 = vmatprep.mubr.msk.f32.mxu1 %vm17928_vm12, %v17927_v12  ;;  %16804 = vmatprep.subr.mxu1 %v17927_v12 }
 0x726   :  { %16772 = vmatmul.mubr.f32.vlgmr.msra.gmra.mxu0 %v18564_v43  ;;  %16797 = vmatmul.mubr.f32.vlgmr.msra.gmra.mxu1 %v18561_v42 }
 0x727   :  { %16780 = vmatpush3.msra.mxu0 %v5699_v41  ;;  %16805 = vmatpush3.msra.mxu1 %v6071_v48 }
 0x728   :  { %16781 = vmatprep.mubr.msk.f32.mxu0 %vm17928_vm12, %v17927_v12  ;;  %16789 = vmatprep.subr.mxu0 %v17927_v12 }
 0x729   :  { %16806 = vmatprep.mubr.msk.f32.mxu1 %vm17928_vm12, %v17927_v12  ;;  %16814 = vmatprep.subr.mxu1 %v17927_v12 }
 0x72a   :  { %16782 = vmatmul.mubr.f32.vlgmr.msra.gmra.mxu0 %v18561_v42  ;;  %16807 = vmatmul.mubr.f32.vlgmr.msra.gmra.mxu1 %v5208_v27 }
 0x72b   :  { %16790 = vmatpush3.msra.mxu0 %v6071_v48  ;;  %16815 = vmatpush3.msra.mxu1 %v6071_v48 }
 0x72c   :  { %16791 = vmatprep.mubr.msk.f32.mxu0 %vm17928_vm12, %v17927_v12  ;;  %16799 = vmatprep.subr.mxu0 %v17927_v12 }
 0x72d   :  { %16816 = vmatprep.mubr.msk.f32.mxu1 %vm17928_vm12, %v17927_v12  ;;  %16824 = vmatprep.subr.mxu1 %v17927_v12 }
 0x72e   :  { %16792 = vmatmul.mubr.f32.vlgmr.msra.gmra.mxu0 %v5210_v54  ;;  %16817 = vmatmul.mubr.f32.vlgmr.msra.gmra.mxu1 %v18561_v42  ;;  %v6493_v54 = vld [vmem:[#allocation12] sm:$0xf] }
 0x72f   :  { %16800 = vmatpush3.msra.mxu0 %v6148_v52  ;;  %16801 = vmatprep.mubr.msk.f32.mxu0 %vm17928_vm12, %v17927_v12  ;;  %v6951_v60 = vsel %vm3289_vm14, %v6493_v54, 0 }
 0x730   :  { %16809 = vmatprep.subr.mxu0 %v17927_v12  ;;  %16826 = vmatprep.mubr.msk.f32.mxu1 %vm17928_vm12, %v17927_v12 }
 0x731   :  { %16825 = vmatpush3.msra.mxu1 %v6612_v55 }
 0x732   :  { %16802 = vmatmul.mubr.f32.vlgmr.msra.gmra.mxu0 %v18564_v43  ;;  %16834 = vmatprep.subr.mxu1 %v17927_v12 }
 0x733   :  { %16810 = vmatpush3.msra.mxu0 %v6149_v56  ;;  %16811 = vmatprep.mubr.msk.f32.mxu0 %vm17928_vm12, %v17927_v12 }
 0x734   :  { %16819 = vmatprep.subr.mxu0 %v17927_v12 }
 0x736   :  { %16812 = vmatmul.mubr.f32.vlgmr.msra.gmra.mxu0 %v18561_v42 }
 0x737   :  { %16821 = vmatprep.mubr.msk.f32.mxu0 %vm17928_vm12, %v17927_v12  ;;  %16820 = vmatpush3.msra.mxu0 %v18633_v51 }
 0x738   :  { %16829 = vmatprep.subr.mxu0 %v17927_v12 }
 0x7ce   :  { %v5288_v61 = vpop.f32.mrf.mxu1 }
 0x7d0   :  { %v16738_v63 = vpop.f32.mrf.mxu1 }
 0x7d2   :  { %v5436_v1 = vpop.f32.mrf.mxu1 }
 0x7d4   :  { %v16748_v2 = vpop.f32.mrf.mxu1 }
 0x7d5   :  { %v6984_v2 = vand.u32 4294901760, %v6951_v60 }
 0x7d6   :  { %v5212_v4 = vpop.f32.mrf.mxu0  ;;  %v5582_v0 = vpop.f32.mrf.mxu1 }
 0x7d7   :  { %v5289_v8 = vadd.f32 %v5288_v61, %v5212_v4 }
 0x7d8   :  { %v16733_v5 = vpop.f32.mrf.mxu0  ;;  %v16758_v6 = vpop.f32.mrf.mxu1 }
 0x7da   :  { %v5362_v9 = vpop.f32.mrf.mxu0  ;;  %v5738_v15 = vpop.f32.mrf.mxu1 }
 0x7db   :  { %v5363_v17 = vadd.f32 %v5362_v9, %v5289_v8  ;;  %v7061_v8 = vsub.f32 %v6951_v60, %v6984_v2 }
 0x7dc   :  { %v16743_v19 = vpop.f32.mrf.mxu0  ;;  %v16768_v10 = vpop.f32.mrf.mxu1 }
 0x7dd   :  { %v5437_v11 = vadd.f32 %v5436_v1, %v5363_v17  ;;  %v7062_v10 = vand.u32 4294901760, %v7061_v8 }
 0x7de   :  { %v5510_v13 = vpop.f32.mrf.mxu0  ;;  %v5886_v47 = vpop.f32.mrf.mxu1 }
 0x7df   :  { %v5511_v18 = vadd.f32 %v5510_v13, %v5437_v11 }
 0x7e0   :  { %v16753_v20 = vpop.f32.mrf.mxu0  ;;  %v16778_v62 = vpop.f32.mrf.mxu1 }
 0x7e1   :  { %v5583_v29 = vadd.f32 %v5582_v0, %v5511_v18  ;;  %v7063_v18 = vsub.f32 %v7061_v8, %v7062_v10 }
 0x7e2   :  { %v5662_v57 = vpop.f32.mrf.mxu0  ;;  %v6032_v7 = vpop.f32.mrf.mxu1 }
 0x7e3   :  { %vm6486_vm2 = vcmp.gt.f32.partialorder %v5583_v29, 0.0  ;;  %v5739_v34 = vadd.f32 %v5738_v15, %v5662_v57  ;;  %v7064_v57 = vand.u32 4294901760, %v7063_v18 }
 0x7e4   :  { %v16763_v33 = vpop.f32.mrf.mxu0  ;;  %v16788_v38 = vpop.f32.mrf.mxu1  ;;  %v6487_v3 = vsel %vm6486_vm2, %v5583_v29, 1.0 }
 0x7e5   :  { %17641 = vrcp.f32 %v6487_v3 }
 0x7e6   :  { %v5812_v22 = vpop.f32.mrf.mxu0  ;;  %v6188_v28 = vpop.f32.mrf.mxu1 }
 0x7e7   :  { %v5813_v42 = vadd.f32 %v5812_v22, %v5739_v34 }
 0x7e8   :  { %v16773_v36 = vpop.f32.mrf.mxu0  ;;  %v16798_v30 = vpop.f32.mrf.mxu1 }
 0x7e9   :  { %v5887_v27 = vadd.f32 %v5886_v47, %v5813_v42 }
 0x7ea   :  { %v5960_v39 = vpop.f32.mrf.mxu0  ;;  %v6336_v41 = vpop.f32.mrf.mxu1 }
 0x7eb   :  { %v5961_v58 = vadd.f32 %v5960_v39, %v5887_v27 }
 0x7ec   :  { %v16783_v37 = vpop.f32.mrf.mxu0  ;;  %v16808_v43 = vpop.f32.mrf.mxu1 }
 0x7ed   :  { %v6033_v63 = vadd.f32 %v6032_v7, %v5961_v58 }
 0x7ee   :  { %v6112_v46 = vpop.f32.mrf.mxu0  ;;  %v6482_v48 = vpop.f32.mrf.mxu1 }
 0x7ef   :  { %v6189_v52 = vadd.f32 %v6188_v28, %v6112_v46 }
 0x7f0   :  { %v16793_v49 = vpop.f32.mrf.mxu0  ;;  %v16818_v50 = vpop.f32.mrf.mxu1 }
 0x7f2   :  { %v6262_v56 = vpop.f32.mrf.mxu0  ;;  %v17642_v55 = vpop.eup %17641 }
 0x7f3   :  { %v6263_v59 = vadd.f32 %v6262_v56, %v6189_v52  ;;  %v6489_v0 = vmul.f32 %v17642_v55, %v6033_v63  ;;  %v1456_v63 = vld [vmem:[%s19500_s15 + $0x8] sm:$0xff] }
 0x7f4   :  { %v16803_v45 = vpop.f32.mrf.mxu0 }
 0x7f5   :  { %v6337_v32 = vadd.f32 %v6336_v41, %v6263_v59  ;;  %v6490_v9 = vsel %vm6486_vm2, %v6489_v0, 0.0  ;;  %v18701_v0 = vand.u32 4294901760, %v1456_v63 }
 0x7f6   :  { %v6410_v61 = vpop.f32.mrf.mxu0  ;;  %v6948_v11 = vsel %vm3285_vm0, %v6490_v9, 0 }
 0x7f7   :  { %v6411_v1 = vadd.f32 %v6410_v61, %v6337_v32  ;;  %v7019_v20 = vand.u32 4294901760, %v6948_v11 }
 0x7f8   :  { %v16813_v4 = vpop.f32.mrf.mxu0 }
 0x7f9   :  { %v6483_v5 = vadd.f32 %v6482_v48, %v6411_v1  ;;  %v7020_v7 = vsub.f32 %v6948_v11, %v7019_v20 }
 0x7fb   :  { %v6491_v6 = vmul.f32 %v17642_v55, %v6483_v5 }
 0x7fd   :  { %v6492_v15 = vsel %vm6486_vm2, %v6491_v6, 0.0  ;;  %v1455_v6 = vld [vmem:[%s19500_s15] sm:$0xff] }
 0x7fe   :  { %v6496_v17 = vsel %vm3285_vm0, %v6492_v15, 0  ;;  %v18708_v15 = vsub.f32 %v1456_v63, %v18701_v0 }
 0x7ff   :  { %v6567_v19 = vand.u32 4294901760, %v6496_v17 }
 0x800   :  { %v18714_v11 = vand.u32 4294901760, %v18708_v15 }
 0x801   :  { %16827 = vmatmul.mubr.f32.vlgmr.msra.gmra.mxu1 %v6567_v19  ;;  %v6568_v13 = vsub.f32 %v6496_v17, %v6567_v19  ;;  %v18710_v17 = vand.u32 4294901760, %v1455_v6 }
 0x802   :  { %16835 = vmatpush3.msra.mxu1 %v18633_v51  ;;  %16836 = vmatprep.mubr.msk.f32.mxu1 %vm17928_vm12, %v17927_v12  ;;  %v7983_v18 = vsub.f32 %v18708_v15, %v18714_v11 }
 0x803   :  { %v6569_v47 = vand.u32 4294901760, %v6568_v13  ;;  %16844 = vmatprep.subr.mxu1 %v17927_v12 }
 0x805   :  { %16837 = vmatmul.mubr.f32.vlgmr.msra.gmra.mxu1 %v6569_v47  ;;  %v6570_v62 = vsub.f32 %v6568_v13, %v6569_v47 }
 0x806   :  { %16845 = vmatpush3.msra.mxu1 %v18633_v51  ;;  %16846 = vmatprep.mubr.msk.f32.mxu1 %vm17928_vm12, %v17927_v12  ;;  %v7021_v51 = vand.u32 4294901760, %v7020_v7 }
 0x807   :  { %v6571_v29 = vand.u32 4294901760, %v6570_v62  ;;  %16854 = vmatprep.subr.mxu1 %v17927_v12 }
 0x808   :  { %v7022_v33 = vsub.f32 %v7020_v7, %v7021_v51 }
 0x809   :  { %16822 = vmatmul.mubr.f32.vlgmr.msra.gmra.mxu0 %v6571_v29  ;;  %16847 = vmatmul.mubr.f32.vlgmr.msra.gmra.mxu1 %v6567_v19 }
 0x80a   :  { %16830 = vmatpush3.msra.mxu0 %v18636_v53  ;;  %16831 = vmatprep.mubr.msk.f32.mxu0 %vm17928_vm12, %v17927_v12  ;;  %v7023_v53 = vand.u32 4294901760, %v7022_v33 }
 0x80b   :  { %16855 = vmatpush3.msra.mxu1 %v7064_v57  ;;  %16856 = vmatprep.mubr.msk.f32.mxu1 %vm17928_vm12, %v17927_v12  ;;  %v18735_v57 = vand.u32 4294901760, %v7983_v18 }
 0x80c   :  { %16839 = vmatprep.subr.mxu0 %v17927_v12  ;;  %16864 = vmatprep.subr.mxu1 %v17927_v12 }
 0x80d   :  { %16832 = vmatmul.mubr.f32.vlgmr.msra.gmra.mxu0 %v6568_v13  ;;  %16857 = vmatmul.mubr.f32.vlgmr.msra.gmra.mxu1 %v7019_v20  ;;  %v18717_v13 = vsub.f32 %v1455_v6, %v18710_v17 }
 0x80e   :  { %16840 = vmatpush3.msra.mxu0 %v6610_v31  ;;  %16841 = vmatprep.mubr.msk.f32.mxu0 %vm17928_vm12, %v17927_v12 }
 0x80f   :  { %16865 = vmatpush3.msra.mxu1 %v6984_v2  ;;  %16866 = vmatprep.mubr.msk.f32.mxu1 %vm17928_vm12, %v17927_v12 }
 0x810   :  { %16849 = vmatprep.subr.mxu0 %v17927_v12  ;;  %16874 = vmatprep.subr.mxu1 %v17927_v12 }
 0x811   :  { %16842 = vmatmul.mubr.f32.vlgmr.msra.gmra.mxu0 %v6567_v19  ;;  %16867 = vmatmul.mubr.f32.vlgmr.msra.gmra.mxu1 %v7021_v51 }
 0x812   :  { %16850 = vmatpush3.msra.mxu0 %v6984_v2  ;;  %16851 = vmatprep.mubr.msk.f32.mxu0 %vm17928_vm12, %v17927_v12 }
 0x813   :  { %16875 = vmatpush3.msra.mxu1 %v6984_v2  ;;  %16876 = vmatprep.mubr.msk.f32.mxu1 %vm17928_vm12, %v17927_v12 }
 0x814   :  { %16859 = vmatprep.subr.mxu0 %v17927_v12  ;;  %16886 = vmatprep.subr.mxu1 %v17927_v12 }
 0x815   :  { %16852 = vmatmul.mubr.f32.vlgmr.msra.gmra.mxu0 %v7023_v53  ;;  %16877 = vmatmul.mubr.f32.vlgmr.msra.gmra.mxu1 %v7019_v20 }
 0x816   :  { %16860 = vmatpush3.msra.mxu0 %v7061_v8  ;;  %16861 = vmatprep.mubr.msk.f32.mxu0 %vm17928_vm12, %v17927_v12 }
 0x817   :  { %16869 = vmatprep.subr.mxu0 %v17927_v12  ;;  %16887 = vmatpush3.msra.mxu1 %v18467_v14 }
 0x818   :  { %16888 = vmatprep.subr.mxu1 %v17927_v12  ;;  %16890 = vmatprep.mubr.msk.f32.mxu1 %vm17928_vm12, %v17927_v12 }
 0x819   :  { %16862 = vmatmul.mubr.f32.vlgmr.msra.gmra.mxu0 %v7020_v7  ;;  %16889 = vmatpush3.msra.mxu1 %v18472_v35 }
 0x81a   :  { %16870 = vmatpush3.msra.mxu0 %v7062_v10  ;;  %16871 = vmatprep.mubr.msk.f32.mxu0 %vm17928_vm12, %v17927_v12 }
 0x81b   :  { %16900 = vmatprep.subr.mxu1 %v17927_v12  ;;  %16879 = vmatprep.subr.mxu0 %v17927_v12 }
 0x81d   :  { %16872 = vmatmul.mubr.f32.vlgmr.msra.gmra.mxu0 %v7019_v20  ;;  %v18727_v20 = vand.u32 4294901760, %v18717_v13 }
 0x81e   :  { %16880 = vmatpush3.msra.mxu0 %v18442_v21  ;;  %16883 = vmatprep.mubr.msk.f32.mxu0 %vm17928_vm12, %v17927_v12 }
 0x81f   :  { %16881 = vmatprep.subr.mxu0 %v17927_v12  ;;  %v7990_v7 = vsub.f32 %v18717_v13, %v18727_v20 }
 0x820   :  { %16882 = vmatpush3.msra.mxu0 %v18450_v24 }
 0x821   :  { %16893 = vmatprep.subr.mxu0 %v17927_v12 }
 0x8c1   :  { %v6649_v14 = vpop.f32.mrf.mxu1 }
 0x8c3   :  { %v16828_v35 = vpop.f32.mrf.mxu1 }
 0x8c5   :  { %v6797_v31 = vpop.f32.mrf.mxu1 }
 0x8c7   :  { %v16838_v38 = vpop.f32.mrf.mxu1 }
 0x8c9   :  { %v6573_v3 = vpop.f32.mrf.mxu0  ;;  %v6943_v22 = vpop.f32.mrf.mxu1 }
 0x8ca   :  { %v6650_v30 = vadd.f32 %v6649_v14, %v6573_v3 }
 0x8cb   :  { %v16823_v28 = vpop.f32.mrf.mxu0  ;;  %v16848_v36 = vpop.f32.mrf.mxu1 }
 0x8cd   :  { %v6723_v34 = vpop.f32.mrf.mxu0  ;;  %v7101_v39 = vpop.f32.mrf.mxu1 }
 0x8ce   :  { %v6724_v41 = vadd.f32 %v6723_v34, %v6650_v30  ;;  %v18812_v34 = vld [vmem:[%s19501_s16] sm:$0x1] }
 0x8cf   :  { %v16833_v42 = vpop.f32.mrf.mxu0  ;;  %v16858_v37 = vpop.f32.mrf.mxu1 }
 0x8d0   :  { %v6798_v43 = vadd.f32 %v6797_v31, %v6724_v41 }
 0x8d1   :  { %v6871_v46 = vpop.f32.mrf.mxu0  ;;  %v7249_v48 = vpop.f32.mrf.mxu1 }
 0x8d2   :  { %v6872_v27 = vadd.f32 %v6871_v46, %v6798_v43 }
 0x8d3   :  { %v16843_v49 = vpop.f32.mrf.mxu0  ;;  %v16868_v50 = vpop.f32.mrf.mxu1 }
 0x8d4   :  { %v6944_v52 = vadd.f32 %v6943_v22, %v6872_v27 }
 0x8d5   :  { %v7025_v54 = vpop.f32.mrf.mxu0  ;;  %v7395_v56 = vpop.f32.mrf.mxu1 }
 0x8d6   :  { %v7026_v58 = vadd.f32 %v7025_v54, %v6944_v52 }
 0x8d7   :  { %v16853_v59 = vpop.f32.mrf.mxu0  ;;  %v16878_v45 = vpop.f32.mrf.mxu1 }
 0x8d8   :  { %v7102_v60 = vadd.f32 %v7101_v39, %v7026_v58 }
 0x8d9   :  { %v7175_v32 = vpop.f32.mrf.mxu0 }
 0x8da   :  { %v7176_v55 = vadd.f32 %v7175_v32, %v7102_v60 }
 0x8db   :  { %v16863_v61 = vpop.f32.mrf.mxu0 }
 0x8dc   :  { %v7250_v1 = vadd.f32 %v7249_v48, %v7176_v55  ;;  %v7870_v55 = vld [vmem:[#allocation2] sm:$0x1] }
 0x8dd   :  { %v7323_v2 = vpop.f32.mrf.mxu0 }
 0x8de   :  { %v7324_v4 = vadd.f32 %v7323_v2, %v7250_v1 }
 0x8df   :  { %v16873_v5 = vpop.f32.mrf.mxu0 }
 0x8e0   :  { %v7396_v8 = vadd.f32 %v7395_v56, %v7324_v4 }
 0x8e2   :  { %v7406_v9 = vadd.f32 %v18488_v16, %v7396_v8 }
 0x8e4   :  { %v7408_v19 = vsel %vm430_vm7, %v7406_v9, 0 }
 0x8e5   :  { %v7477_v10 = vand.u32 4294901760, %v7408_v19 }
 0x8e7   :  { %v7478_v47 = vsub.f32 %v7408_v19, %v7477_v10  ;;  %16891 = vmatmul.mubr.f32.vlgmr.msra.gmra.mxu1 %v7477_v10 }
 0x8e8   :  { %16901 = vmatpush3.msra.mxu1 %v18442_v21  ;;  %16904 = vmatprep.mubr.msk.f32.mxu1 %vm17928_vm12, %v17927_v12 }
 0x8e9   :  { %16902 = vmatprep.subr.mxu1 %v17927_v12  ;;  %v7479_v16 = vand.u32 4294901760, %v7478_v47 }
 0x8ea   :  { %16903 = vmatpush3.msra.mxu1 %v18450_v24 }
 0x8eb   :  { %16905 = vmatmul.mubr.f32.vlgmr.msra.gmra.mxu1 %v7479_v16  ;;  %16914 = vmatprep.subr.mxu1 %v17927_v12  ;;  %v7480_v62 = vsub.f32 %v7478_v47, %v7479_v16 }
 0x8ec   :  { %16915 = vmatpush3.msra.mxu1 %v18442_v21  ;;  %16918 = vmatprep.mubr.msk.f32.mxu1 %vm17928_vm12, %v17927_v12  ;;  %v18746_v21 = vand.u32 4294901760, %v7990_v7 }
 0x8ed   :  { %16916 = vmatprep.subr.mxu1 %v17927_v12  ;;  %v7481_v29 = vand.u32 4294901760, %v7480_v62 }
 0x8ee   :  { %16917 = vmatpush3.msra.mxu1 %v18450_v24 }
 0x8ef   :  { %16884 = vmatmul.mubr.f32.vlgmr.msra.gmra.mxu0 %v7481_v29  ;;  %16919 = vmatmul.mubr.f32.vlgmr.msra.gmra.mxu1 %v7477_v10 }
 0x8f0   :  { %16894 = vmatpush3.msra.mxu0 %v18448_v23  ;;  %16897 = vmatprep.mubr.msk.f32.mxu0 %vm17928_vm12, %v17927_v12 }
 0x8f1   :  { %16895 = vmatprep.subr.mxu0 %v17927_v12  ;;  %16928 = vmatprep.subr.mxu1 %v17927_v12 }
 0x8f2   :  { %16896 = vmatpush3.msra.mxu0 %v18458_v26  ;;  %16929 = vmatpush3.msra.mxu1 %v18735_v57 }
 0x8f3   :  { %16898 = vmatmul.mubr.f32.vlgmr.msra.gmra.mxu0 %v7478_v47  ;;  %16907 = vmatprep.subr.mxu0 %v17927_v12 }
 0x8f4   :  { %16908 = vmatpush3.msra.mxu0 %v18455_v25  ;;  %16911 = vmatprep.mubr.msk.f32.mxu0 %vm17928_vm12, %v17927_v12 }
 0x8f5   :  { %16909 = vmatprep.subr.mxu0 %v17927_v12  ;;  %16930 = vmatprep.subr.mxu1 %v17927_v12 }
 0x8f6   :  { %16910 = vmatpush3.msra.mxu0 %v18465_v40  ;;  %16931 = vmatpush3.msra.mxu1 %v18746_v21 }
 0x8f7   :  { %16912 = vmatmul.mubr.f32.vlgmr.msra.gmra.mxu0 %v7477_v10  ;;  %16921 = vmatprep.subr.mxu0 %v17927_v12 }
 0x8f8   :  { %16922 = vmatpush3.msra.mxu0 %v18701_v0  ;;  %16925 = vmatprep.mubr.msk.f32.mxu0 %vm17928_vm12, %v17927_v12 }
 0x8f9   :  { %16923 = vmatprep.subr.mxu0 %v17927_v12  ;;  %16932 = vmatprep.mubr.msk.f32.mxu1 %vm17928_vm12, %v17927_v12 }
 0x8fa   :  { %16924 = vmatpush3.msra.mxu0 %v18710_v17  ;;  %16933 = vmatmul.mubr.f32.vlgmr.msra.gmra.mxu1 %v17927_v12 }
 0x8fb   :  { %16926 = vmatmul.mubr.f32.vlgmr.msra.gmra.mxu0 %v17927_v12  ;;  %16935 = vmatprep.subr.mxu0 %v17927_v12 }
 0x8fc   :  { %16936 = vmatpush3.msra.mxu0 %v18708_v15  ;;  %16942 = vmatprep.subr.mxu1 %v17927_v12 }
 0x8fd   :  { %16937 = vmatprep.subr.mxu0 %v17927_v12  ;;  %16943 = vmatpush3.msra.mxu1 %v18701_v0 }
 0x8fe   :  { %16938 = vmatpush3.msra.mxu0 %v18717_v13  ;;  %16939 = vmatprep.mubr.msk.f32.mxu0 %vm17928_vm12, %v17927_v12 }
 0x8ff   :  { %16944 = vmatprep.subr.mxu1 %v17927_v12  ;;  %16940 = vmatmul.mubr.f32.vlgmr.msra.gmra.mxu0 %v17927_v12 }
 0x900   :  { %16945 = vmatpush3.msra.mxu1 %v18710_v17  ;;  %16946 = vmatprep.mubr.msk.f32.mxu1 %vm17928_vm12, %v17927_v12 }
 0x901   :  { %16949 = vmatprep.subr.mxu0 %v17927_v12  ;;  %16947 = vmatmul.mubr.f32.vlgmr.msra.gmra.mxu1 %v17927_v12 }
 0x902   :  { %16950 = vmatpush3.msra.mxu0 %v18714_v11  ;;  %16956 = vmatprep.subr.mxu1 %v17927_v12 }
 0x903   :  { %16951 = vmatprep.subr.mxu0 %v17927_v12  ;;  %16957 = vmatpush3.msra.mxu1 %v18701_v0 }
 0x904   :  { %16952 = vmatpush3.msra.mxu0 %v18727_v20  ;;  %16953 = vmatprep.mubr.msk.f32.mxu0 %vm17928_vm12, %v17927_v12 }
 0x905   :  { %16958 = vmatprep.subr.mxu1 %v17927_v12  ;;  %16954 = vmatmul.mubr.f32.vlgmr.msra.gmra.mxu0 %v17927_v12 }
 0x906   :  { %16959 = vmatpush3.msra.mxu1 %v18710_v17  ;;  %16960 = vmatprep.mubr.msk.f32.mxu1 %vm17928_vm12, %v17927_v12 }
 0x907   :  { %16961 = vmatmul.mubr.f32.vlgmr.msra.gmra.mxu1 %v17927_v12  ;;  %16970 = vmatprep.subr.mxu1 %v17927_v12 }
 0x908   :  { %16971 = vmatpush3.msra.mxu1 %v18735_v57  ;;  %16974 = vmatprep.mubr.msk.f32.mxu1 %vm17928_vm12, %v17927_v12 }
 0x909   :  { %16972 = vmatprep.subr.mxu1 %v17927_v12  ;;  %16963 = vmatprep.subr.mxu0 %v17927_v12 }
 0x90a   :  { %16973 = vmatpush3.msra.mxu1 %v18746_v21  ;;  %16964 = vmatpush3.msra.mxu0 %v18701_v0 }
 0x90b   :  { %16984 = vmatprep.subr.mxu1 %v17927_v12  ;;  %16965 = vmatprep.subr.mxu0 %v17927_v12 }
 0x90c   :  { %16966 = vmatpush3.msra.mxu0 %v18710_v17  ;;  %16967 = vmatprep.mubr.msk.f32.mxu0 %vm17928_vm12, %v17927_v12 }
 0x90d   :  { %16977 = vmatprep.subr.mxu0 %v17927_v12 }
 0x9a7   :  { %v7564_v23 = vpop.f32.mrf.mxu1 }
 0x9a9   :  { %v16892_v24 = vpop.f32.mrf.mxu1 }
 0x9ab   :  { %v7715_v25 = vpop.f32.mrf.mxu1 }
 0x9ad   :  { %v16906_v26 = vpop.f32.mrf.mxu1 }
 0x9af   :  { %v7483_v40 = vpop.f32.mrf.mxu0  ;;  %v7865_v51 = vpop.f32.mrf.mxu1 }
 0x9b0   :  { %v7484_v33 = vadd.f32 %v18551_v44, %v7483_v40 }
 0x9b1   :  { %v16885_v53 = vpop.f32.mrf.mxu0  ;;  %v16920_v14 = vpop.f32.mrf.mxu1 }
 0x9b2   :  { %v7565_v35 = vadd.f32 %v7564_v23, %v7484_v33 }
 0x9b3   :  { %v7640_v31 = vpop.f32.mrf.mxu0 }
 0x9b4   :  { %v7641_v38 = vadd.f32 %v7640_v31, %v7565_v35 }
 0x9b5   :  { %v16899_v3 = vpop.f32.mrf.mxu0 }
 0x9b6   :  { %v7716_v22 = vadd.f32 %v7715_v25, %v7641_v38 }
 0x9b7   :  { %v7792_v28 = vpop.f32.mrf.mxu0 }
 0x9b8   :  { %v7793_v36 = vadd.f32 %v7792_v28, %v7716_v22 }
 0x9b9   :  { %v16913_v30 = vpop.f32.mrf.mxu0 }
 0x9ba   :  { %v7866_v39 = vadd.f32 %v7865_v51, %v7793_v36  ;;  %v8028_v41 = vpop.f32.mrf.mxu1 }
 0x9bb   :  { %v7947_v42 = vpop.f32.mrf.mxu0 }
 0x9bc   :  { %7869 = vst.msk [vmem:[#allocation2 + $0x8] sm:$0xff] %vm4667_vm1, %v7866_v39  ;;  %v7948_v44 = vadd.f32 %v7947_v42, %v18812_v34  ;;  %v16934_v37 = vpop.f32.mrf.mxu1 }
 0x9bd   :  { %v16927_v43 = vpop.f32.mrf.mxu0 }
 0x9be   :  { %v8029_v46 = vadd.f32 %v8028_v41, %v7948_v44 }
 0x9bf   :  { %v8104_v48 = vpop.f32.mrf.mxu0 }
 0x9c0   :  { %v8105_v27 = vadd.f32 %v8104_v48, %v8029_v46 }
 0x9c1   :  { %v8179_v49 = vpop.f32.mrf.mxu1  ;;  %v16941_v50 = vpop.f32.mrf.mxu0 }
 0x9c2   :  { %v8180_v52 = vadd.f32 %v8179_v49, %v8105_v27 }
 0x9c3   :  { %v16948_v54 = vpop.f32.mrf.mxu1  ;;  %v8365_v63 = vld [vmem:[#allocation2 + $0x8] sm:$0x1] }
 0x9c5   :  { %v8256_v56 = vpop.f32.mrf.mxu0 }
 0x9c6   :  { %v8257_v58 = vadd.f32 %v8256_v56, %v8180_v52 }
 0x9c7   :  { %v8329_v59 = vpop.f32.mrf.mxu1  ;;  %v16955_v45 = vpop.f32.mrf.mxu0 }
 0x9c8   :  { %v8330_v60 = vadd.f32 %v8329_v59, %v8257_v58 }
 0x9c9   :  { %v16962_v32 = vpop.f32.mrf.mxu1 }
 0x9ca   :  { %8341 = vrot.lane.b32.xlu1 %v8330_v60, %s17931_s29  ;;  %v8333_v61 = vadd.f32 %v8330_v60, %v7870_v55  ;;  %v8366_v2 = vadd.f32 %v8365_v63, %v8330_v60 }
 0x9cc   :  { %v15854_v1 = vmul.f32 -1.442695, %v8333_v61  ;;  %v15855_v4 = vmul.f32 -1.442695, %v8366_v2 }
 0x9ce   :  { %17643 = vpow2.f32 %v15854_v1 }
 0x9cf   :  { %17645 = vpow2.f32 %v15855_v4 }
 0x9db   :  { %v17644_v5 = vpop.eup %17643 }
 0x9dc   :  { %v8337_v6 = vadd.f32 1.0, %v17644_v5  ;;  %v17646_v8 = vpop.eup %17645 }
 0x9dd   :  { %v8370_v9 = vadd.f32 1.0, %v17646_v8 }
 0x9de   :  { %17647 = vrcp.f32 %v8337_v6 }
 0x9df   :  { %17649 = vrcp.f32 %v8370_v9 }
 0x9eb   :  { %v17648_v19 = vpop.eup %17647 }
 0x9ec   :  { %v17650_v16 = vpop.eup %17649  ;;  %v8351_v26 = vsub.f32 1.0, %v17648_v19  ;;  %v8357_v51 = vmul.f32 0.0, %v17648_v19 }
 0x9ed   :  { %v8380_v14 = vsub.f32 1.0, %v17650_v16  ;;  %v8386_v31 = vmul.f32 0.0, %v17650_v16 }
 0xa3c   :  { %v8342_v10 = vpop.permute.xlu1 %8341 }
 0xa3d   :  { %v8344_v47 = vmul.f32 %v17648_v19, %v8342_v10  ;;  %v8373_v18 = vmul.f32 %v17650_v16, %v8342_v10 }
 0xa3f   :  { %8346 = vrot.lane.b32.xlu1 %v8344_v47, %s17932_s6 }
 0xa43   :  { %8375 = vrot.lane.b32.xlu1 %v8373_v18, %s17932_s6 }
 0xab1   :  { %v8347_v62 = vpop.permute.xlu1 %8346 }
 0xab2   :  { %v8349_v29 = vadd.f32 %v8347_v62, %v7870_v55 }
 0xab4   :  { %17651 = vtanh.f32 %v8349_v29 }
 0xab5   :  { %v8376_v7 = vpop.permute.xlu1 %8375 }
 0xab6   :  { %v8378_v23 = vadd.f32 %v8376_v7, %v8365_v63 }
 0xab8   :  { %17653 = vtanh.f32 %v8378_v23 }
 0xac1   :  { %v17652_v24 = vpop.eup %17651 }
 0xac2   :  { %8353 = vrot.lane.b32.xlu1 %v17652_v24, %s17933_s12 }
 0xac5   :  { %v17654_v25 = vpop.eup %17653 }
 0xac6   :  { %8382 = vrot.lane.b32.xlu0 %v17654_v25, %s17933_s12 }
 0xb34   :  { %v8354_v40 = vpop.permute.xlu1 %8353 }
 0xb35   :  { %v8356_v33 = vmul.f32 %v8354_v40, %v8351_v26 }
 0xb37   :  { %v18821_v53 = vadd.f32 %v8357_v51, %v8356_v33 }
 0xb38   :  { %v8383_v35 = vpop.permute.xlu0 %8382 }
 0xb39   :  { %v8385_v38 = vmul.f32 %v8383_v35, %v8380_v14  ;;  %8360 = vrot.lane.b32.xlu1 %v18821_v53, %s17933_s12 }
 0xb3b   :  { %v18825_v3 = vadd.f32 %v8386_v31, %v8385_v38  ;;  %v8393_v31 = vld [vmem:[#allocation2 + $0x1] sm:$0x1] }
 0xb3d   :  { %8389 = vrot.lane.b32.xlu0 %v18825_v3, %s17933_s12 }
 0xbab   :  { %v8361_v22 = vpop.permute.xlu1 %8360 }
 0xbac   :  { %8364 = vst.msk [vmem:[#allocation3] sm:$0x1] %vm8363_vm3, %v8361_v22  ;;  %v8394_v28 = vsel %vm430_vm7, %v8361_v22, 0 }
 0xbad   :  { %v8463_v36 = vand.u32 4294901760, %v8394_v28 }
 0xbaf   :  { %v8464_v30 = vsub.f32 %v8394_v28, %v8463_v36  ;;  %v8390_v39 = vpop.permute.xlu0 %8389  ;;  %16975 = vmatmul.mubr.f32.vlgmr.msra.gmra.mxu1 %v8463_v36  ;;  %v8886_v28 = vld [vmem:[#allocation2 + $0x9] sm:$0x1] }
 0xbb0   :  { %8392 = vst.msk [vmem:[#allocation3 + $0x8] sm:$0x1] %vm8363_vm3, %v8390_v39  ;;  %16985 = vmatpush3.msra.mxu1 %v18701_v0  ;;  %16988 = vmatprep.mubr.msk.f32.mxu1 %vm17928_vm12, %v17927_v12  ;;  %v8887_v44 = vsel %vm430_vm7, %v8390_v39, 0 }
 0xbb1   :  { %v8465_v41 = vand.u32 4294901760, %v8464_v30  ;;  %16986 = vmatprep.subr.mxu1 %v17927_v12  ;;  %v8956_v43 = vand.u32 4294901760, %v8887_v44 }
 0xbb2   :  { %16987 = vmatpush3.msra.mxu1 %v18710_v17 }
 0xbb3   :  { %v8466_v42 = vsub.f32 %v8464_v30, %v8465_v41  ;;  %16989 = vmatmul.mubr.f32.vlgmr.msra.gmra.mxu1 %v8465_v41  ;;  %16998 = vmatprep.subr.mxu1 %v17927_v12  ;;  %v8957_v46 = vsub.f32 %v8887_v44, %v8956_v43 }
 0xbb4   :  { %16999 = vmatpush3.msra.mxu1 %v18701_v0  ;;  %17002 = vmatprep.mubr.msk.f32.mxu1 %vm17928_vm12, %v17927_v12 }
 0xbb5   :  { %17000 = vmatprep.subr.mxu1 %v17927_v12  ;;  %v8467_v37 = vand.u32 4294901760, %v8466_v42  ;;  %v8958_v48 = vand.u32 4294901760, %v8957_v46 }
 0xbb6   :  { %17001 = vmatpush3.msra.mxu1 %v18710_v17 }
 0xbb7   :  { %16968 = vmatmul.mubr.f32.vlgmr.msra.gmra.mxu0 %v8467_v37  ;;  %17003 = vmatmul.mubr.f32.vlgmr.msra.gmra.mxu1 %v8463_v36  ;;  %v8959_v27 = vsub.f32 %v8957_v46, %v8958_v48 }
 0xbb8   :  { %17012 = vmatprep.subr.mxu1 %v17927_v12  ;;  %16978 = vmatpush3.msra.mxu0 %v18708_v15 }
 0xbb9   :  { %17013 = vmatpush3.msra.mxu1 %v18735_v57  ;;  %16979 = vmatprep.subr.mxu0 %v17927_v12  ;;  %v8960_v49 = vand.u32 4294901760, %v8959_v27 }
 0xbba   :  { %17014 = vmatprep.subr.mxu1 %v17927_v12  ;;  %16980 = vmatpush3.msra.mxu0 %v18717_v13 }
 0xbbb   :  { %16981 = vmatprep.mubr.msk.f32.mxu0 %vm17928_vm12, %v17927_v12  ;;  %17015 = vmatpush3.msra.mxu1 %v18746_v21 }
 0xbbc   :  { %17016 = vmatprep.mubr.msk.f32.mxu1 %vm17928_vm12, %v17927_v12  ;;  %16982 = vmatmul.mubr.f32.vlgmr.msra.gmra.mxu0 %v8464_v30 }
 0xbbd   :  { %16991 = vmatprep.subr.mxu0 %v17927_v12  ;;  %17017 = vmatmul.mubr.f32.vlgmr.msra.gmra.mxu1 %v8956_v43 }
 0xbbe   :  { %17026 = vmatprep.subr.mxu1 %v17927_v12  ;;  %16992 = vmatpush3.msra.mxu0 %v18714_v11 }
 0xbbf   :  { %17027 = vmatpush3.msra.mxu1 %v18701_v0  ;;  %16993 = vmatprep.subr.mxu0 %v17927_v12 }
 0xbc0   :  { %17028 = vmatprep.subr.mxu1 %v17927_v12  ;;  %16994 = vmatpush3.msra.mxu0 %v18727_v20 }
 0xbc1   :  { %16995 = vmatprep.mubr.msk.f32.mxu0 %vm17928_vm12, %v17927_v12  ;;  %17029 = vmatpush3.msra.mxu1 %v18710_v17 }
 0xbc2   :  { %17030 = vmatprep.mubr.msk.f32.mxu1 %vm17928_vm12, %v17927_v12  ;;  %16996 = vmatmul.mubr.f32.vlgmr.msra.gmra.mxu0 %v8463_v36 }
 0xbc3   :  { %17005 = vmatprep.subr.mxu0 %v17927_v12  ;;  %17031 = vmatmul.mubr.f32.vlgmr.msra.gmra.mxu1 %v8958_v48 }
 0xbc4   :  { %17040 = vmatprep.subr.mxu1 %v17927_v12  ;;  %17006 = vmatpush3.msra.mxu0 %v18701_v0 }
 0xbc5   :  { %17041 = vmatpush3.msra.mxu1 %v18701_v0  ;;  %17007 = vmatprep.subr.mxu0 %v17927_v12 }
 0xbc6   :  { %17042 = vmatprep.subr.mxu1 %v17927_v12  ;;  %17008 = vmatpush3.msra.mxu0 %v18710_v17 }
 0xbc7   :  { %17009 = vmatprep.mubr.msk.f32.mxu0 %vm17928_vm12, %v17927_v12  ;;  %17043 = vmatpush3.msra.mxu1 %v18710_v17 }
 0xbc8   :  { %17044 = vmatprep.mubr.msk.f32.mxu1 %vm17928_vm12, %v17927_v12  ;;  %17010 = vmatmul.mubr.f32.vlgmr.msra.gmra.mxu0 %v8960_v49 }
 0xbc9   :  { %17019 = vmatprep.subr.mxu0 %v17927_v12  ;;  %17045 = vmatmul.mubr.f32.vlgmr.msra.gmra.mxu1 %v8956_v43 }
 0xbca   :  { %17020 = vmatpush3.msra.mxu0 %v18708_v15  ;;  %17023 = vmatprep.mubr.msk.f32.mxu0 %vm17928_vm12, %v17927_v12 }
 0xbcb   :  { %17021 = vmatprep.subr.mxu0 %v17927_v12  ;;  %17054 = vmatprep.subr.mxu1 %v17927_v12 }
 0xbcc   :  { %17022 = vmatpush3.msra.mxu0 %v18717_v13  ;;  %17055 = vmatpush3.msra.mxu1 %v18735_v57 }
 0xbcd   :  { %17024 = vmatmul.mubr.f32.vlgmr.msra.gmra.mxu0 %v8957_v46  ;;  %17033 = vmatprep.subr.mxu0 %v17927_v12 }
 0xbce   :  { %17034 = vmatpush3.msra.mxu0 %v18714_v11  ;;  %17037 = vmatprep.mubr.msk.f32.mxu0 %vm17928_vm12, %v17927_v12 }
 0xbcf   :  { %17035 = vmatprep.subr.mxu0 %v17927_v12  ;;  %17056 = vmatprep.subr.mxu1 %v17927_v12 }
 0xbd0   :  { %17036 = vmatpush3.msra.mxu0 %v18727_v20  ;;  %17057 = vmatpush3.msra.mxu1 %v18746_v21 }
 0xbd1   :  { %17038 = vmatmul.mubr.f32.vlgmr.msra.gmra.mxu0 %v8956_v43  ;;  %17058 = vmatprep.mubr.msk.f32.mxu1 %vm17928_vm12, %v17927_v12 }
 0xbd2   :  { %17068 = vmatprep.subr.mxu1 %v17927_v12  ;;  %17047 = vmatprep.subr.mxu0 %v17927_v12 }
 0xbd3   :  { %17048 = vmatpush3.msra.mxu0 %v18701_v0  ;;  %17051 = vmatprep.mubr.msk.f32.mxu0 %vm17928_vm12, %v17927_v12 }
 0xbd4   :  { %17049 = vmatprep.subr.mxu0 %v17927_v12 }
 0xbd5   :  { %17050 = vmatpush3.msra.mxu0 %v18710_v17 }
 0xbd6   :  { %17061 = vmatprep.subr.mxu0 %v17927_v12 }
 0xc6f   :  { %v8550_v50 = vpop.f32.mrf.mxu1 }
 0xc71   :  { %v16976_v52 = vpop.f32.mrf.mxu1 }
 0xc73   :  { %v8701_v54 = vpop.f32.mrf.mxu1 }
 0xc75   :  { %v16990_v56 = vpop.f32.mrf.mxu1 }
 0xc77   :  { %v8469_v58 = vpop.f32.mrf.mxu0  ;;  %v8851_v59 = vpop.f32.mrf.mxu1 }
 0xc78   :  { %v8470_v45 = vadd.f32 %v8469_v58, %v18812_v34 }
 0xc79   :  { %v16969_v60 = vpop.f32.mrf.mxu0  ;;  %v17004_v32 = vpop.f32.mrf.mxu1 }
 0xc7a   :  { %v8551_v55 = vadd.f32 %v8550_v50, %v8470_v45 }
 0xc7c   :  { %v8626_v61 = vpop.f32.mrf.mxu0 }
 0xc7d   :  { %v8627_v63 = vadd.f32 %v8626_v61, %v8551_v55  ;;  %v9043_v1 = vpop.f32.mrf.mxu1 }
 0xc7e   :  { %v16983_v2 = vpop.f32.mrf.mxu0 }
 0xc7f   :  { %v17018_v4 = vpop.f32.mrf.mxu1  ;;  %v8702_v5 = vadd.f32 %v8701_v54, %v8627_v63 }
 0xc82   :  { %v8778_v6 = vpop.f32.mrf.mxu0 }
 0xc83   :  { %v8779_v8 = vadd.f32 %v8778_v6, %v8702_v5  ;;  %v9194_v9 = vpop.f32.mrf.mxu1 }
 0xc84   :  { %v16997_v19 = vpop.f32.mrf.mxu0 }
 0xc85   :  { %v8852_v10 = vadd.f32 %v8851_v59, %v8779_v8  ;;  %v17032_v47 = vpop.f32.mrf.mxu1 }
 0xc87   :  { %8863 = vrot.lane.b32.xlu1 %v8852_v10, %s17931_s29  ;;  %v8855_v38 = vadd.f32 %v8852_v10, %v8393_v31 }
 0xc88   :  { %v8962_v16 = vpop.f32.mrf.mxu0 }
 0xc89   :  { %v8963_v18 = vadd.f32 %v8962_v16, %v18812_v34  ;;  %v9344_v62 = vpop.f32.mrf.mxu1  ;;  %v15856_v22 = vmul.f32 -1.442695, %v8855_v38 }
 0xc8a   :  { %v17011_v29 = vpop.f32.mrf.mxu0 }
 0xc8b   :  { %v17046_v7 = vpop.f32.mrf.mxu1  ;;  %v9044_v23 = vadd.f32 %v9043_v1, %v8963_v18  ;;  %17655 = vpow2.f32 %v15856_v22 }
 0xc8d   :  { %v9119_v24 = vpop.f32.mrf.mxu0 }
 0xc8e   :  { %v9120_v25 = vadd.f32 %v9119_v24, %v9044_v23 }
 0xc8f   :  { %v17025_v26 = vpop.f32.mrf.mxu0 }
 0xc90   :  { %v9195_v40 = vadd.f32 %v9194_v9, %v9120_v25 }
 0xc91   :  { %v9271_v51 = vpop.f32.mrf.mxu0 }
 0xc92   :  { %v9272_v33 = vadd.f32 %v9271_v51, %v9195_v40 }
 0xc93   :  { %v17039_v14 = vpop.f32.mrf.mxu0 }
 0xc94   :  { %v9345_v35 = vadd.f32 %v9344_v62, %v9272_v33 }
 0xc96   :  { %9356 = vrot.lane.b32.xlu0 %v9345_v35, %s17931_s29  ;;  %v9348_v36 = vadd.f32 %v9345_v35, %v8886_v28 }
 0xc98   :  { %v15857_v30 = vmul.f32 -1.442695, %v9348_v36  ;;  %v17656_v39 = vpop.eup %17655 }
 0xc99   :  { %v8859_v41 = vadd.f32 1.0, %v17656_v39 }
 0xc9a   :  { %17657 = vpow2.f32 %v15857_v30 }
 0xc9b   :  { %17659 = vrcp.f32 %v8859_v41 }
 0xca7   :  { %v17658_v42 = vpop.eup %17657 }
 0xca8   :  { %v9352_v44 = vadd.f32 1.0, %v17658_v42  ;;  %v17660_v37 = vpop.eup %17659 }
 0xca9   :  { %v8873_v45 = vsub.f32 1.0, %v17660_v37  ;;  %v8879_v32 = vmul.f32 %v17660_v37, %v18821_v53 }
 0xcaa   :  { %17661 = vrcp.f32 %v9352_v44 }
 0xcb7   :  { %v17662_v48 = vpop.eup %17661 }
 0xcb8   :  { %v9366_v63 = vsub.f32 1.0, %v17662_v48  ;;  %v9372_v2 = vmul.f32 %v17662_v48, %v18825_v3 }
 0xcf9   :  { %v8864_v43 = vpop.permute.xlu1 %8863 }
 0xcfa   :  { %v8866_v46 = vmul.f32 %v17660_v37, %v8864_v43 }
 0xcfc   :  { %8868 = vrot.lane.b32.xlu1 %v8866_v46, %s17932_s6 }
 0xd08   :  { %v9357_v27 = vpop.permute.xlu0 %9356 }
 0xd09   :  { %v9359_v49 = vmul.f32 %v17662_v48, %v9357_v27 }
 0xd0b   :  { %9361 = vrot.lane.b32.xlu0 %v9359_v49, %s17932_s6 }
 0xd6e   :  { %v8869_v50 = vpop.permute.xlu1 %8868 }
 0xd6f   :  { %v8871_v52 = vadd.f32 %v8869_v50, %v8393_v31 }
 0xd71   :  { %17663 = vtanh.f32 %v8871_v52 }
 0xd7d   :  { %v9362_v54 = vpop.permute.xlu0 %9361 }
 0xd7e   :  { %v17664_v56 = vpop.eup %17663  ;;  %v9364_v58 = vadd.f32 %v9362_v54, %v8886_v28 }
 0xd7f   :  { %8875 = vrot.lane.b32.xlu1 %v17664_v56, %s17933_s12 }
 0xd80   :  { %17665 = vtanh.f32 %v9364_v58 }
 0xd8d   :  { %v17666_v59 = vpop.eup %17665 }
 0xd8e   :  { %9368 = vrot.lane.b32.xlu0 %v17666_v59, %s17933_s12 }
 0xdf1   :  { %v8876_v60 = vpop.permute.xlu1 %8875 }
 0xdf2   :  { %v8878_v55 = vmul.f32 %v8876_v60, %v8873_v45 }
 0xdf4   :  { %v18914_v61 = vadd.f32 %v8879_v32, %v8878_v55 }
 0xdf6   :  { %8882 = vrot.lane.b32.xlu1 %v18914_v61, %s17933_s12 }
 0xe00   :  { %v9369_v1 = vpop.permute.xlu0 %9368 }
 0xe01   :  { %v9371_v4 = vmul.f32 %v9369_v1, %v9366_v63 }
 0xe03   :  { %v18919_v5 = vadd.f32 %v9372_v2, %v9371_v4  ;;  %v9379_v2 = vld [vmem:[#allocation2 + $0x2] sm:$0x1] }
 0xe05   :  { %9375 = vrot.lane.b32.xlu0 %v18919_v5, %s17933_s12 }
 0xe68   :  { %v8883_v6 = vpop.permute.xlu1 %8882 }
 0xe69   :  { %8885 = vst.msk [vmem:[#allocation3 + $0x1] sm:$0x1] %vm8363_vm3, %v8883_v6  ;;  %v9380_v53 = vsel %vm430_vm7, %v8883_v6, 0 }
 0xe6a   :  { %v9449_v8 = vand.u32 4294901760, %v9380_v53 }
 0xe6c   :  { %v9450_v9 = vsub.f32 %v9380_v53, %v9449_v8  ;;  %17059 = vmatmul.mubr.f32.vlgmr.msra.gmra.mxu1 %v9449_v8  ;;  %v9872_v53 = vld [vmem:[#allocation2 + $0xa] sm:$0x1] }
 0xe6d   :  { %17069 = vmatpush3.msra.mxu1 %v18701_v0  ;;  %17072 = vmatprep.mubr.msk.f32.mxu1 %vm17928_vm12, %v17927_v12 }
 0xe6e   :  { %v9451_v3 = vand.u32 4294901760, %v9450_v9  ;;  %17070 = vmatprep.subr.mxu1 %v17927_v12 }
 0xe6f   :  { %17071 = vmatpush3.msra.mxu1 %v18710_v17 }
 0xe70   :  { %v9452_v19 = vsub.f32 %v9450_v9, %v9451_v3  ;;  %17073 = vmatmul.mubr.f32.vlgmr.msra.gmra.mxu1 %v9451_v3  ;;  %17082 = vmatprep.subr.mxu1 %v17927_v12 }
 0xe71   :  { %17083 = vmatpush3.msra.mxu1 %v18701_v0  ;;  %17086 = vmatprep.mubr.msk.f32.mxu1 %vm17928_vm12, %v17927_v12 }
 0xe72   :  { %v9453_v10 = vand.u32 4294901760, %v9452_v19  ;;  %17084 = vmatprep.subr.mxu1 %v17927_v12 }
 0xe73   :  { %17085 = vmatpush3.msra.mxu1 %v18710_v17 }
 0xe74   :  { %17052 = vmatmul.mubr.f32.vlgmr.msra.gmra.mxu0 %v9453_v10  ;;  %17087 = vmatmul.mubr.f32.vlgmr.msra.gmra.mxu1 %v9449_v8 }
 0xe75   :  { %17096 = vmatprep.subr.mxu1 %v17927_v12  ;;  %17062 = vmatpush3.msra.mxu0 %v18708_v15 }
 0xe76   :  { %17097 = vmatpush3.msra.mxu1 %v18735_v57  ;;  %17063 = vmatprep.subr.mxu0 %v17927_v12 }
 0xe77   :  { %v9376_v47 = vpop.permute.xlu0 %9375  ;;  %17098 = vmatprep.subr.mxu1 %v17927_v12  ;;  %17064 = vmatpush3.msra.mxu0 %v18717_v13 }
 0xe78   :  { %9378 = vst.msk [vmem:[#allocation3 + $0x9] sm:$0x1] %vm8363_vm3, %v9376_v47  ;;  %v9873_v16 = vsel %vm430_vm7, %v9376_v47, 0  ;;  %17065 = vmatprep.mubr.msk.f32.mxu0 %vm17928_vm12, %v17927_v12  ;;  %17099 = vmatpush3.msra.mxu1 %v18746_v21 }
 0xe79   :  { %v9942_v18 = vand.u32 4294901760, %v9873_v16  ;;  %17100 = vmatprep.mubr.msk.f32.mxu1 %vm17928_vm12, %v17927_v12  ;;  %17066 = vmatmul.mubr.f32.vlgmr.msra.gmra.mxu0 %v9450_v9 }
 0xe7a   :  { %17075 = vmatprep.subr.mxu0 %v17927_v12  ;;  %17110 = vmatprep.subr.mxu1 %v17927_v12 }
 0xe7b   :  { %v9943_v62 = vsub.f32 %v9873_v16, %v9942_v18  ;;  %17101 = vmatmul.mubr.f32.vlgmr.msra.gmra.mxu1 %v9942_v18  ;;  %17076 = vmatpush3.msra.mxu0 %v18714_v11 }
 0xe7c   :  { %17111 = vmatpush3.msra.mxu1 %v18701_v0  ;;  %17077 = vmatprep.subr.mxu0 %v17927_v12 }
 0xe7d   :  { %v9944_v29 = vand.u32 4294901760, %v9943_v62  ;;  %17112 = vmatprep.subr.mxu1 %v17927_v12  ;;  %17078 = vmatpush3.msra.mxu0 %v18727_v20 }
 0xe7e   :  { %17079 = vmatprep.mubr.msk.f32.mxu0 %vm17928_vm12, %v17927_v12  ;;  %17113 = vmatpush3.msra.mxu1 %v18710_v17 }
 0xe7f   :  { %v9945_v7 = vsub.f32 %v9943_v62, %v9944_v29  ;;  %17114 = vmatprep.mubr.msk.f32.mxu1 %vm17928_vm12, %v17927_v12  ;;  %17080 = vmatmul.mubr.f32.vlgmr.msra.gmra.mxu0 %v9449_v8 }
 0xe80   :  { %17089 = vmatprep.subr.mxu0 %v17927_v12  ;;  %17115 = vmatmul.mubr.f32.vlgmr.msra.gmra.mxu1 %v9944_v29 }
 0xe81   :  { %v9946_v23 = vand.u32 4294901760, %v9945_v7  ;;  %17124 = vmatprep.subr.mxu1 %v17927_v12  ;;  %17090 = vmatpush3.msra.mxu0 %v18701_v0 }
 0xe82   :  { %17125 = vmatpush3.msra.mxu1 %v18701_v0  ;;  %17091 = vmatprep.subr.mxu0 %v17927_v12 }
 0xe83   :  { %17126 = vmatprep.subr.mxu1 %v17927_v12  ;;  %17092 = vmatpush3.msra.mxu0 %v18710_v17 }
 0xe84   :  { %17093 = vmatprep.mubr.msk.f32.mxu0 %vm17928_vm12, %v17927_v12  ;;  %17127 = vmatpush3.msra.mxu1 %v18710_v17 }
 0xe85   :  { %17128 = vmatprep.mubr.msk.f32.mxu1 %vm17928_vm12, %v17927_v12  ;;  %17094 = vmatmul.mubr.f32.vlgmr.msra.gmra.mxu0 %v9946_v23 }
 0xe86   :  { %17103 = vmatprep.subr.mxu0 %v17927_v12  ;;  %17129 = vmatmul.mubr.f32.vlgmr.msra.gmra.mxu1 %v9942_v18 }
 0xe87   :  { %17104 = vmatpush3.msra.mxu0 %v18708_v15  ;;  %17107 = vmatprep.mubr.msk.f32.mxu0 %vm17928_vm12, %v17927_v12 }
 0xe88   :  { %17105 = vmatprep.subr.mxu0 %v17927_v12  ;;  %17138 = vmatprep.subr.mxu1 %v17927_v12 }
 0xe89   :  { %17106 = vmatpush3.msra.mxu0 %v18717_v13  ;;  %17139 = vmatpush3.msra.mxu1 %v18735_v57 }
 0xe8a   :  { %17108 = vmatmul.mubr.f32.vlgmr.msra.gmra.mxu0 %v9943_v62  ;;  %17117 = vmatprep.subr.mxu0 %v17927_v12 }
 0xe8b   :  { %17118 = vmatpush3.msra.mxu0 %v18714_v11  ;;  %17121 = vmatprep.mubr.msk.f32.mxu0 %vm17928_vm12, %v17927_v12 }
 0xe8c   :  { %17119 = vmatprep.subr.mxu0 %v17927_v12  ;;  %17140 = vmatprep.subr.mxu1 %v17927_v12 }
 0xe8d   :  { %17120 = vmatpush3.msra.mxu0 %v18727_v20  ;;  %17141 = vmatpush3.msra.mxu1 %v18746_v21 }
 0xe8e   :  { %17122 = vmatmul.mubr.f32.vlgmr.msra.gmra.mxu0 %v9942_v18  ;;  %17142 = vmatprep.mubr.msk.f32.mxu1 %vm17928_vm12, %v17927_v12 }
 0xe8f   :  { %17152 = vmatprep.subr.mxu1 %v17927_v12  ;;  %17131 = vmatprep.subr.mxu0 %v17927_v12 }
 0xe90   :  { %17132 = vmatpush3.msra.mxu0 %v18701_v0  ;;  %17135 = vmatprep.mubr.msk.f32.mxu0 %vm17928_vm12, %v17927_v12 }
 0xe91   :  { %17133 = vmatprep.subr.mxu0 %v17927_v12 }
 0xe92   :  { %17134 = vmatpush3.msra.mxu0 %v18710_v17 }
 0xe93   :  { %17145 = vmatprep.subr.mxu0 %v17927_v12 }
 0xf2c   :  { %v9536_v24 = vpop.f32.mrf.mxu1 }
 0xf2e   :  { %v17060_v25 = vpop.f32.mrf.mxu1 }
 0xf30   :  { %v9687_v26 = vpop.f32.mrf.mxu1 }
 0xf32   :  { %v17074_v40 = vpop.f32.mrf.mxu1 }
 0xf34   :  { %v9455_v51 = vpop.f32.mrf.mxu0  ;;  %v9837_v33 = vpop.f32.mrf.mxu1 }
 0xf35   :  { %v9456_v14 = vadd.f32 %v9455_v51, %v18812_v34 }
 0xf36   :  { %v17053_v35 = vpop.f32.mrf.mxu0  ;;  %v17088_v31 = vpop.f32.mrf.mxu1 }
 0xf37   :  { %v9537_v38 = vadd.f32 %v9536_v24, %v9456_v14 }
 0xf39   :  { %v9612_v22 = vpop.f32.mrf.mxu0 }
 0xf3a   :  { %v9613_v28 = vadd.f32 %v9612_v22, %v9537_v38 }
 0xf3b   :  { %v10029_v36 = vpop.f32.mrf.mxu1  ;;  %v17067_v30 = vpop.f32.mrf.mxu0 }
 0xf3c   :  { %v9688_v39 = vadd.f32 %v9687_v26, %v9613_v28 }
 0xf3d   :  { %v17102_v41 = vpop.f32.mrf.mxu1 }
 0xf3f   :  { %v9764_v42 = vpop.f32.mrf.mxu0 }
 0xf40   :  { %v9765_v44 = vadd.f32 %v9764_v42, %v9688_v39  ;;  %v10180_v37 = vpop.f32.mrf.mxu1 }
 0xf41   :  { %v17081_v43 = vpop.f32.mrf.mxu0 }
 0xf42   :  { %v9838_v46 = vadd.f32 %v9837_v33, %v9765_v44  ;;  %v17116_v48 = vpop.f32.mrf.mxu1 }
 0xf44   :  { %9849 = vrot.lane.b32.xlu1 %v9838_v46, %s17931_s29  ;;  %v9841_v4 = vadd.f32 %v9838_v46, %v9379_v2 }
 0xf45   :  { %v9948_v27 = vpop.f32.mrf.mxu0 }
 0xf46   :  { %v9949_v49 = vadd.f32 %v9948_v27, %v18812_v34  ;;  %v10330_v50 = vpop.f32.mrf.mxu1  ;;  %v15858_v6 = vmul.f32 -1.442695, %v9841_v4 }
 0xf47   :  { %v17095_v52 = vpop.f32.mrf.mxu0 }
 0xf48   :  { %v17130_v54 = vpop.f32.mrf.mxu1  ;;  %v10030_v56 = vadd.f32 %v10029_v36, %v9949_v49  ;;  %17667 = vpow2.f32 %v15858_v6 }
 0xf4a   :  { %v10105_v58 = vpop.f32.mrf.mxu0 }
 0xf4b   :  { %v10106_v59 = vadd.f32 %v10105_v58, %v10030_v56 }
 0xf4c   :  { %v17109_v45 = vpop.f32.mrf.mxu0 }
 0xf4d   :  { %v10181_v60 = vadd.f32 %v10180_v37, %v10106_v59 }
 0xf4e   :  { %v10257_v32 = vpop.f32.mrf.mxu0 }
 0xf4f   :  { %v10258_v55 = vadd.f32 %v10257_v32, %v10181_v60 }
 0xf50   :  { %v17123_v63 = vpop.f32.mrf.mxu0 }
 0xf51   :  { %v10331_v1 = vadd.f32 %v10330_v50, %v10258_v55 }
 0xf53   :  { %10342 = vrot.lane.b32.xlu0 %v10331_v1, %s17931_s29  ;;  %v10334_v8 = vadd.f32 %v10331_v1, %v9872_v53 }
 0xf55   :  { %v15859_v9 = vmul.f32 -1.442695, %v10334_v8  ;;  %v17668_v3 = vpop.eup %17667 }
 0xf56   :  { %v9845_v19 = vadd.f32 1.0, %v17668_v3 }
 0xf57   :  { %17669 = vpow2.f32 %v15859_v9 }
 0xf58   :  { %17671 = vrcp.f32 %v9845_v19 }
 0xf64   :  { %v17670_v10 = vpop.eup %17669 }
 0xf65   :  { %v10338_v47 = vadd.f32 1.0, %v17670_v10  ;;  %v17672_v16 = vpop.eup %17671 }
 0xf66   :  { %v9859_v14 = vsub.f32 1.0, %v17672_v16  ;;  %v9865_v31 = vmul.f32 %v17672_v16, %v18914_v61 }
 0xf67   :  { %17673 = vrcp.f32 %v10338_v47 }
 0xf74   :  { %v17674_v29 = vpop.eup %17673 }
 0xf75   :  { %v10352_v28 = vsub.f32 1.0, %v17674_v29  ;;  %v10358_v30 = vmul.f32 %v17674_v29, %v18919_v5 }
 0xfb6   :  { %v9850_v18 = vpop.permute.xlu1 %9849 }
 0xfb7   :  { %v9852_v62 = vmul.f32 %v17672_v16, %v9850_v18 }
 0xfb9   :  { %9854 = vrot.lane.b32.xlu1 %v9852_v62, %s17932_s6 }
 0xfc5   :  { %v10343_v7 = vpop.permute.xlu0 %10342 }
 0xfc6   :  { %v10345_v23 = vmul.f32 %v17674_v29, %v10343_v7 }
 0xfc8   :  { %10347 = vrot.lane.b32.xlu0 %v10345_v23, %s17932_s6 }
0x102b   :  { %v9855_v24 = vpop.permute.xlu1 %9854 }
0x102c   :  { %v9857_v25 = vadd.f32 %v9855_v24, %v9379_v2 }
0x102e   :  { %17675 = vtanh.f32 %v9857_v25 }
0x103a   :  { %v10348_v26 = vpop.permute.xlu0 %10347 }
0x103b   :  { %v17676_v40 = vpop.eup %17675  ;;  %v10350_v51 = vadd.f32 %v10348_v26, %v9872_v53 }
0x103c   :  { %9861 = vrot.lane.b32.xlu1 %v17676_v40, %s17933_s12 }
0x103d   :  { %17677 = vtanh.f32 %v10350_v51 }
0x104a   :  { %v17678_v33 = vpop.eup %17677 }
0x104b   :  { %10354 = vrot.lane.b32.xlu0 %v17678_v33, %s17933_s12 }
0x10ae   :  { %v9862_v35 = vpop.permute.xlu1 %9861 }
0x10af   :  { %v9864_v38 = vmul.f32 %v9862_v35, %v9859_v14 }
0x10b1   :  { %v19008_v22 = vadd.f32 %v9865_v31, %v9864_v38 }
0x10b3   :  { %9868 = vrot.lane.b32.xlu1 %v19008_v22, %s17933_s12 }
0x10bd   :  { %v10355_v36 = vpop.permute.xlu0 %10354 }
0x10be   :  { %v10357_v39 = vmul.f32 %v10355_v36, %v10352_v28 }
0x10c0   :  { %v19013_v41 = vadd.f32 %v10358_v30, %v10357_v39  ;;  %v10365_v30 = vld [vmem:[#allocation2 + $0x3] sm:$0x1] }
0x10c2   :  { %10361 = vrot.lane.b32.xlu0 %v19013_v41, %s17933_s12 }
0x1125   :  { %v9869_v42 = vpop.permute.xlu1 %9868 }
0x1126   :  { %9871 = vst.msk [vmem:[#allocation3 + $0x2] sm:$0x1] %vm8363_vm3, %v9869_v42  ;;  %v10366_v61 = vsel %vm430_vm7, %v9869_v42, 0 }
0x1127   :  { %v10435_v44 = vand.u32 4294901760, %v10366_v61 }
0x1129   :  { %v10436_v37 = vsub.f32 %v10366_v61, %v10435_v44  ;;  %17143 = vmatmul.mubr.f32.vlgmr.msra.gmra.mxu1 %v10435_v44  ;;  %v10858_v61 = vld [vmem:[#allocation2 + $0xb] sm:$0x1] }
0x112a   :  { %17153 = vmatpush3.msra.mxu1 %v18701_v0  ;;  %17156 = vmatprep.mubr.msk.f32.mxu1 %vm17928_vm12, %v17927_v12 }
0x112b   :  { %v10437_v5 = vand.u32 4294901760, %v10436_v37  ;;  %17154 = vmatprep.subr.mxu1 %v17927_v12 }
0x112c   :  { %17155 = vmatpush3.msra.mxu1 %v18710_v17 }
0x112d   :  { %v10438_v43 = vsub.f32 %v10436_v37, %v10437_v5  ;;  %17157 = vmatmul.mubr.f32.vlgmr.msra.gmra.mxu1 %v10437_v5  ;;  %17166 = vmatprep.subr.mxu1 %v17927_v12 }
0x112e   :  { %17167 = vmatpush3.msra.mxu1 %v18701_v0  ;;  %17170 = vmatprep.mubr.msk.f32.mxu1 %vm17928_vm12, %v17927_v12 }
0x112f   :  { %v10439_v46 = vand.u32 4294901760, %v10438_v43  ;;  %17168 = vmatprep.subr.mxu1 %v17927_v12 }
0x1130   :  { %17169 = vmatpush3.msra.mxu1 %v18710_v17 }
0x1131   :  { %17136 = vmatmul.mubr.f32.vlgmr.msra.gmra.mxu0 %v10439_v46  ;;  %17171 = vmatmul.mubr.f32.vlgmr.msra.gmra.mxu1 %v10435_v44 }
0x1132   :  { %17180 = vmatprep.subr.mxu1 %v17927_v12  ;;  %17146 = vmatpush3.msra.mxu0 %v18708_v15 }
0x1133   :  { %17181 = vmatpush3.msra.mxu1 %v18735_v57  ;;  %17147 = vmatprep.subr.mxu0 %v17927_v12 }
0x1134   :  { %v10362_v48 = vpop.permute.xlu0 %10361  ;;  %17182 = vmatprep.subr.mxu1 %v17927_v12  ;;  %17148 = vmatpush3.msra.mxu0 %v18717_v13 }
0x1135   :  { %10364 = vst.msk [vmem:[#allocation3 + $0xa] sm:$0x1] %vm8363_vm3, %v10362_v48  ;;  %v10859_v27 = vsel %vm430_vm7, %v10362_v48, 0  ;;  %17149 = vmatprep.mubr.msk.f32.mxu0 %vm17928_vm12, %v17927_v12  ;;  %17183 = vmatpush3.msra.mxu1 %v18746_v21 }
0x1136   :  { %v10928_v49 = vand.u32 4294901760, %v10859_v27  ;;  %17184 = vmatprep.mubr.msk.f32.mxu1 %vm17928_vm12, %v17927_v12  ;;  %17150 = vmatmul.mubr.f32.vlgmr.msra.gmra.mxu0 %v10436_v37 }
0x1137   :  { %17159 = vmatprep.subr.mxu0 %v17927_v12  ;;  %17194 = vmatprep.subr.mxu1 %v17927_v12 }
0x1138   :  { %v10929_v50 = vsub.f32 %v10859_v27, %v10928_v49  ;;  %17185 = vmatmul.mubr.f32.vlgmr.msra.gmra.mxu1 %v10928_v49  ;;  %17160 = vmatpush3.msra.mxu0 %v18714_v11 }
0x1139   :  { %17195 = vmatpush3.msra.mxu1 %v18701_v0  ;;  %17161 = vmatprep.subr.mxu0 %v17927_v12 }
0x113a   :  { %v10930_v52 = vand.u32 4294901760, %v10929_v50  ;;  %17196 = vmatprep.subr.mxu1 %v17927_v12  ;;  %17162 = vmatpush3.msra.mxu0 %v18727_v20 }
0x113b   :  { %17163 = vmatprep.mubr.msk.f32.mxu0 %vm17928_vm12, %v17927_v12  ;;  %17197 = vmatpush3.msra.mxu1 %v18710_v17 }
0x113c   :  { %v10931_v54 = vsub.f32 %v10929_v50, %v10930_v52  ;;  %17198 = vmatprep.mubr.msk.f32.mxu1 %vm17928_vm12, %v17927_v12  ;;  %17164 = vmatmul.mubr.f32.vlgmr.msra.gmra.mxu0 %v10435_v44 }
0x113d   :  { %17173 = vmatprep.subr.mxu0 %v17927_v12  ;;  %17199 = vmatmul.mubr.f32.vlgmr.msra.gmra.mxu1 %v10930_v52 }
0x113e   :  { %v10932_v56 = vand.u32 4294901760, %v10931_v54  ;;  %17208 = vmatprep.subr.mxu1 %v17927_v12  ;;  %17174 = vmatpush3.msra.mxu0 %v18701_v0 }
0x113f   :  { %17209 = vmatpush3.msra.mxu1 %v18701_v0  ;;  %17175 = vmatprep.subr.mxu0 %v17927_v12 }
0x1140   :  { %17210 = vmatprep.subr.mxu1 %v17927_v12  ;;  %17176 = vmatpush3.msra.mxu0 %v18710_v17 }
0x1141   :  { %17177 = vmatprep.mubr.msk.f32.mxu0 %vm17928_vm12, %v17927_v12  ;;  %17211 = vmatpush3.msra.mxu1 %v18710_v17 }
0x1142   :  { %17212 = vmatprep.mubr.msk.f32.mxu1 %vm17928_vm12, %v17927_v12  ;;  %17178 = vmatmul.mubr.f32.vlgmr.msra.gmra.mxu0 %v10932_v56 }
0x1143   :  { %17187 = vmatprep.subr.mxu0 %v17927_v12  ;;  %17213 = vmatmul.mubr.f32.vlgmr.msra.gmra.mxu1 %v10928_v49 }
0x1144   :  { %17188 = vmatpush3.msra.mxu0 %v18708_v15  ;;  %17191 = vmatprep.mubr.msk.f32.mxu0 %vm17928_vm12, %v17927_v12 }
0x1145   :  { %17189 = vmatprep.subr.mxu0 %v17927_v12  ;;  %17222 = vmatprep.subr.mxu1 %v17927_v12 }
0x1146   :  { %17190 = vmatpush3.msra.mxu0 %v18717_v13  ;;  %17223 = vmatpush3.msra.mxu1 %v18735_v57 }
0x1147   :  { %17192 = vmatmul.mubr.f32.vlgmr.msra.gmra.mxu0 %v10929_v50  ;;  %17201 = vmatprep.subr.mxu0 %v17927_v12 }
0x1148   :  { %17202 = vmatpush3.msra.mxu0 %v18714_v11  ;;  %17205 = vmatprep.mubr.msk.f32.mxu0 %vm17928_vm12, %v17927_v12 }
0x1149   :  { %17203 = vmatprep.subr.mxu0 %v17927_v12  ;;  %17224 = vmatprep.subr.mxu1 %v17927_v12 }
0x114a   :  { %17204 = vmatpush3.msra.mxu0 %v18727_v20  ;;  %17225 = vmatpush3.msra.mxu1 %v18746_v21 }
0x114b   :  { %17206 = vmatmul.mubr.f32.vlgmr.msra.gmra.mxu0 %v10928_v49  ;;  %17226 = vmatprep.mubr.msk.f32.mxu1 %vm17928_vm12, %v17927_v12 }
0x114c   :  { %17236 = vmatprep.subr.mxu1 %v17927_v12  ;;  %17215 = vmatprep.subr.mxu0 %v17927_v12 }
0x114d   :  { %17216 = vmatpush3.msra.mxu0 %v18701_v0  ;;  %17219 = vmatprep.mubr.msk.f32.mxu0 %vm17928_vm12, %v17927_v12 }
0x114e   :  { %17217 = vmatprep.subr.mxu0 %v17927_v12 }
0x114f   :  { %17218 = vmatpush3.msra.mxu0 %v18710_v17 }
0x1150   :  { %17229 = vmatprep.subr.mxu0 %v17927_v12 }
0x11e9   :  { %v10522_v58 = vpop.f32.mrf.mxu1 }
0x11eb   :  { %v17144_v59 = vpop.f32.mrf.mxu1 }
0x11ed   :  { %v10673_v45 = vpop.f32.mrf.mxu1 }
0x11ef   :  { %v17158_v60 = vpop.f32.mrf.mxu1 }
0x11f1   :  { %v10441_v32 = vpop.f32.mrf.mxu0  ;;  %v10823_v55 = vpop.f32.mrf.mxu1 }
0x11f2   :  { %v10442_v63 = vadd.f32 %v10441_v32, %v18812_v34  ;;  %v19098_v34 = vld [vmem:[%s19501_s16] sm:$0x1] }
0x11f3   :  { %v17137_v1 = vpop.f32.mrf.mxu0  ;;  %v17172_v2 = vpop.f32.mrf.mxu1 }
0x11f4   :  { %v10523_v4 = vadd.f32 %v10522_v58, %v10442_v63 }
0x11f6   :  { %v10598_v6 = vpop.f32.mrf.mxu0 }
0x11f7   :  { %v10599_v53 = vadd.f32 %v10598_v6, %v10523_v4 }
0x11f8   :  { %v11015_v8 = vpop.f32.mrf.mxu1  ;;  %v17151_v9 = vpop.f32.mrf.mxu0 }
0x11f9   :  { %v10674_v3 = vadd.f32 %v10673_v45, %v10599_v53 }
0x11fa   :  { %v17186_v19 = vpop.f32.mrf.mxu1 }
0x11fc   :  { %v10750_v10 = vpop.f32.mrf.mxu0 }
0x11fd   :  { %v10751_v47 = vadd.f32 %v10750_v10, %v10674_v3  ;;  %v11166_v16 = vpop.f32.mrf.mxu1 }
0x11fe   :  { %v17165_v18 = vpop.f32.mrf.mxu0 }
0x11ff   :  { %v10824_v62 = vadd.f32 %v10823_v55, %v10751_v47  ;;  %v17200_v29 = vpop.f32.mrf.mxu1 }
0x1201   :  { %10835 = vrot.lane.b32.xlu1 %v10824_v62, %s17931_s29  ;;  %v10827_v39 = vadd.f32 %v10824_v62, %v10365_v30 }
0x1202   :  { %v10934_v7 = vpop.f32.mrf.mxu0 }
0x1203   :  { %v10935_v23 = vadd.f32 %v19098_v34, %v10934_v7  ;;  %v11316_v24 = vpop.f32.mrf.mxu1  ;;  %v15860_v42 = vmul.f32 -1.442695, %v10827_v39 }
0x1204   :  { %v17179_v25 = vpop.f32.mrf.mxu0 }
0x1205   :  { %v17214_v26 = vpop.f32.mrf.mxu1  ;;  %v11016_v40 = vadd.f32 %v11015_v8, %v10935_v23  ;;  %17679 = vpow2.f32 %v15860_v42 }
0x1207   :  { %v11091_v51 = vpop.f32.mrf.mxu0 }
0x1208   :  { %v11092_v33 = vadd.f32 %v11091_v51, %v11016_v40 }
0x1209   :  { %v17193_v14 = vpop.f32.mrf.mxu0 }
0x120a   :  { %v11167_v35 = vadd.f32 %v11166_v16, %v11092_v33 }
0x120b   :  { %v11243_v31 = vpop.f32.mrf.mxu0 }
0x120c   :  { %v11244_v38 = vadd.f32 %v11243_v31, %v11167_v35 }
0x120d   :  { %v17207_v28 = vpop.f32.mrf.mxu0 }
0x120e   :  { %v11317_v36 = vadd.f32 %v11316_v24, %v11244_v38 }
0x1210   :  { %11328 = vrot.lane.b32.xlu0 %v11317_v36, %s17931_s29  ;;  %v11320_v44 = vadd.f32 %v11317_v36, %v10858_v61 }
0x1212   :  { %v15861_v37 = vmul.f32 -1.442695, %v11320_v44  ;;  %v17680_v5 = vpop.eup %17679 }
0x1213   :  { %v10831_v43 = vadd.f32 1.0, %v17680_v5 }
0x1214   :  { %17681 = vpow2.f32 %v15861_v37 }
0x1215   :  { %17683 = vrcp.f32 %v10831_v43 }
0x1221   :  { %v17682_v46 = vpop.eup %17681 }
0x1222   :  { %v11324_v48 = vadd.f32 1.0, %v17682_v46  ;;  %v17684_v27 = vpop.eup %17683 }
0x1223   :  { %v10845_v63 = vsub.f32 1.0, %v17684_v27  ;;  %v10851_v2 = vmul.f32 %v17684_v27, %v19008_v22 }
0x1224   :  { %17685 = vrcp.f32 %v11324_v48 }
0x1231   :  { %v17686_v52 = vpop.eup %17685 }
0x1232   :  { %v11338_v53 = vsub.f32 1.0, %v17686_v52  ;;  %v11344_v9 = vmul.f32 %v17686_v52, %v19013_v41 }
0x1273   :  { %v10836_v49 = vpop.permute.xlu1 %10835 }
0x1274   :  { %v10838_v50 = vmul.f32 %v17684_v27, %v10836_v49 }
0x1276   :  { %10840 = vrot.lane.b32.xlu1 %v10838_v50, %s17932_s6 }
0x1282   :  { %v11329_v54 = vpop.permute.xlu0 %11328 }
0x1283   :  { %v11331_v56 = vmul.f32 %v17686_v52, %v11329_v54 }
0x1285   :  { %11333 = vrot.lane.b32.xlu0 %v11331_v56, %s17932_s6 }
0x12e8   :  { %v10841_v58 = vpop.permute.xlu1 %10840 }
0x12e9   :  { %v10843_v59 = vadd.f32 %v10841_v58, %v10365_v30 }
0x12eb   :  { %17687 = vtanh.f32 %v10843_v59 }
0x12f7   :  { %v11334_v45 = vpop.permute.xlu0 %11333 }
0x12f8   :  { %v17688_v60 = vpop.eup %17687  ;;  %v11336_v32 = vadd.f32 %v11334_v45, %v10858_v61 }
0x12f9   :  { %10847 = vrot.lane.b32.xlu1 %v17688_v60, %s17933_s12 }
0x12fa   :  { %17689 = vtanh.f32 %v11336_v32 }
0x1307   :  { %v17690_v55 = vpop.eup %17689 }
0x1308   :  { %11340 = vrot.lane.b32.xlu0 %v17690_v55, %s17933_s12 }
0x136b   :  { %v10848_v1 = vpop.permute.xlu1 %10847 }
0x136c   :  { %v10850_v4 = vmul.f32 %v10848_v1, %v10845_v63 }
0x136e   :  { %v19107_v6 = vadd.f32 %v10851_v2, %v10850_v4 }
0x1370   :  { %10854 = vrot.lane.b32.xlu1 %v19107_v6, %s17933_s12 }
0x137a   :  { %v11341_v8 = vpop.permute.xlu0 %11340 }
0x137b   :  { %v11343_v3 = vmul.f32 %v11341_v8, %v11338_v53 }
0x137d   :  { %v19112_v19 = vadd.f32 %v11344_v9, %v11343_v3  ;;  %v11351_v9 = vld [vmem:[#allocation2 + $0x4] sm:$0x1] }
0x137f   :  { %11347 = vrot.lane.b32.xlu0 %v19112_v19, %s17933_s12 }
0x13e2   :  { %v10855_v10 = vpop.permute.xlu1 %10854 }
0x13e3   :  { %10857 = vst.msk [vmem:[#allocation3 + $0x3] sm:$0x1] %vm8363_vm3, %v10855_v10  ;;  %v11352_v22 = vsel %vm430_vm7, %v10855_v10, 0 }
0x13e4   :  { %v11421_v47 = vand.u32 4294901760, %v11352_v22 }
0x13e6   :  { %v11422_v16 = vsub.f32 %v11352_v22, %v11421_v47  ;;  %17227 = vmatmul.mubr.f32.vlgmr.msra.gmra.mxu1 %v11421_v47  ;;  %v11844_v22 = vld [vmem:[#allocation2 + $0xc] sm:$0x1] }
0x13e7   :  { %17237 = vmatpush3.msra.mxu1 %v18701_v0  ;;  %17240 = vmatprep.mubr.msk.f32.mxu1 %vm17928_vm12, %v17927_v12 }
0x13e8   :  { %v11423_v41 = vand.u32 4294901760, %v11422_v16  ;;  %17238 = vmatprep.subr.mxu1 %v17927_v12 }
0x13e9   :  { %17239 = vmatpush3.msra.mxu1 %v18710_v17 }
0x13ea   :  { %v11424_v18 = vsub.f32 %v11422_v16, %v11423_v41  ;;  %17241 = vmatmul.mubr.f32.vlgmr.msra.gmra.mxu1 %v11423_v41  ;;  %17250 = vmatprep.subr.mxu1 %v17927_v12 }
0x13eb   :  { %17251 = vmatpush3.msra.mxu1 %v18701_v0  ;;  %17254 = vmatprep.mubr.msk.f32.mxu1 %vm17928_vm12, %v17927_v12 }
0x13ec   :  { %v11425_v62 = vand.u32 4294901760, %v11424_v18  ;;  %17252 = vmatprep.subr.mxu1 %v17927_v12 }
0x13ed   :  { %17253 = vmatpush3.msra.mxu1 %v18710_v17 }
0x13ee   :  { %17220 = vmatmul.mubr.f32.vlgmr.msra.gmra.mxu0 %v11425_v62  ;;  %17255 = vmatmul.mubr.f32.vlgmr.msra.gmra.mxu1 %v11421_v47 }
0x13ef   :  { %17264 = vmatprep.subr.mxu1 %v17927_v12  ;;  %17230 = vmatpush3.msra.mxu0 %v18708_v15 }
0x13f0   :  { %17265 = vmatpush3.msra.mxu1 %v18735_v57  ;;  %17231 = vmatprep.subr.mxu0 %v17927_v12 }
0x13f1   :  { %v11348_v29 = vpop.permute.xlu0 %11347  ;;  %17266 = vmatprep.subr.mxu1 %v17927_v12  ;;  %17232 = vmatpush3.msra.mxu0 %v18717_v13 }
0x13f2   :  { %11350 = vst.msk [vmem:[#allocation3 + $0xb] sm:$0x1] %vm8363_vm3, %v11348_v29  ;;  %v11845_v7 = vsel %vm430_vm7, %v11348_v29, 0  ;;  %17233 = vmatprep.mubr.msk.f32.mxu0 %vm17928_vm12, %v17927_v12  ;;  %17267 = vmatpush3.msra.mxu1 %v18746_v21 }
0x13f3   :  { %v11914_v23 = vand.u32 4294901760, %v11845_v7  ;;  %17268 = vmatprep.mubr.msk.f32.mxu1 %vm17928_vm12, %v17927_v12  ;;  %17234 = vmatmul.mubr.f32.vlgmr.msra.gmra.mxu0 %v11422_v16 }
0x13f4   :  { %17243 = vmatprep.subr.mxu0 %v17927_v12  ;;  %17278 = vmatprep.subr.mxu1 %v17927_v12 }
0x13f5   :  { %v11915_v24 = vsub.f32 %v11845_v7, %v11914_v23  ;;  %17269 = vmatmul.mubr.f32.vlgmr.msra.gmra.mxu1 %v11914_v23  ;;  %17244 = vmatpush3.msra.mxu0 %v18714_v11 }
0x13f6   :  { %17279 = vmatpush3.msra.mxu1 %v18701_v0  ;;  %17245 = vmatprep.subr.mxu0 %v17927_v12 }
0x13f7   :  { %v11916_v25 = vand.u32 4294901760, %v11915_v24  ;;  %17280 = vmatprep.subr.mxu1 %v17927_v12  ;;  %17246 = vmatpush3.msra.mxu0 %v18727_v20 }
0x13f8   :  { %17247 = vmatprep.mubr.msk.f32.mxu0 %vm17928_vm12, %v17927_v12  ;;  %17281 = vmatpush3.msra.mxu1 %v18710_v17 }
0x13f9   :  { %v11917_v26 = vsub.f32 %v11915_v24, %v11916_v25  ;;  %17282 = vmatprep.mubr.msk.f32.mxu1 %vm17928_vm12, %v17927_v12  ;;  %17248 = vmatmul.mubr.f32.vlgmr.msra.gmra.mxu0 %v11421_v47 }
0x13fa   :  { %17257 = vmatprep.subr.mxu0 %v17927_v12  ;;  %17283 = vmatmul.mubr.f32.vlgmr.msra.gmra.mxu1 %v11916_v25 }
0x13fb   :  { %v11918_v40 = vand.u32 4294901760, %v11917_v26  ;;  %17292 = vmatprep.subr.mxu1 %v17927_v12  ;;  %17258 = vmatpush3.msra.mxu0 %v18701_v0 }
0x13fc   :  { %17293 = vmatpush3.msra.mxu1 %v18701_v0  ;;  %17259 = vmatprep.subr.mxu0 %v17927_v12 }
0x13fd   :  { %17294 = vmatprep.subr.mxu1 %v17927_v12  ;;  %17260 = vmatpush3.msra.mxu0 %v18710_v17 }
0x13fe   :  { %17261 = vmatprep.mubr.msk.f32.mxu0 %vm17928_vm12, %v17927_v12  ;;  %17295 = vmatpush3.msra.mxu1 %v18710_v17 }
0x13ff   :  { %17296 = vmatprep.mubr.msk.f32.mxu1 %vm17928_vm12, %v17927_v12  ;;  %17262 = vmatmul.mubr.f32.vlgmr.msra.gmra.mxu0 %v11918_v40 }
0x1400   :  { %17271 = vmatprep.subr.mxu0 %v17927_v12  ;;  %17297 = vmatmul.mubr.f32.vlgmr.msra.gmra.mxu1 %v11914_v23 }
0x1401   :  { %17272 = vmatpush3.msra.mxu0 %v18708_v15  ;;  %17275 = vmatprep.mubr.msk.f32.mxu0 %vm17928_vm12, %v17927_v12 }
0x1402   :  { %17273 = vmatprep.subr.mxu0 %v17927_v12  ;;  %17306 = vmatprep.subr.mxu1 %v17927_v12 }
0x1403   :  { %17274 = vmatpush3.msra.mxu0 %v18717_v13  ;;  %17307 = vmatpush3.msra.mxu1 %v18735_v57 }
0x1404   :  { %17276 = vmatmul.mubr.f32.vlgmr.msra.gmra.mxu0 %v11915_v24  ;;  %17285 = vmatprep.subr.mxu0 %v17927_v12 }
0x1405   :  { %17286 = vmatpush3.msra.mxu0 %v18714_v11  ;;  %17289 = vmatprep.mubr.msk.f32.mxu0 %vm17928_vm12, %v17927_v12 }
0x1406   :  { %17287 = vmatprep.subr.mxu0 %v17927_v12  ;;  %17308 = vmatprep.subr.mxu1 %v17927_v12 }
0x1407   :  { %17288 = vmatpush3.msra.mxu0 %v18727_v20  ;;  %17309 = vmatpush3.msra.mxu1 %v18746_v21 }
0x1408   :  { %17290 = vmatmul.mubr.f32.vlgmr.msra.gmra.mxu0 %v11914_v23  ;;  %17310 = vmatprep.mubr.msk.f32.mxu1 %vm17928_vm12, %v17927_v12 }
0x1409   :  { %17320 = vmatprep.subr.mxu1 %v17927_v12  ;;  %17299 = vmatprep.subr.mxu0 %v17927_v12 }
0x140a   :  { %17300 = vmatpush3.msra.mxu0 %v18701_v0  ;;  %17303 = vmatprep.mubr.msk.f32.mxu0 %vm17928_vm12, %v17927_v12 }
0x140b   :  { %17301 = vmatprep.subr.mxu0 %v17927_v12 }
0x140c   :  { %17302 = vmatpush3.msra.mxu0 %v18710_v17 }
0x140d   :  { %17313 = vmatprep.subr.mxu0 %v17927_v12 }
0x14a6   :  { %v11508_v51 = vpop.f32.mrf.mxu1 }
0x14a8   :  { %v17228_v33 = vpop.f32.mrf.mxu1 }
0x14aa   :  { %v11659_v14 = vpop.f32.mrf.mxu1 }
0x14ac   :  { %v17242_v35 = vpop.f32.mrf.mxu1 }
0x14ae   :  { %v11427_v31 = vpop.f32.mrf.mxu0  ;;  %v11809_v38 = vpop.f32.mrf.mxu1 }
0x14af   :  { %v11428_v28 = vadd.f32 %v19098_v34, %v11427_v31 }
0x14b0   :  { %v17221_v36 = vpop.f32.mrf.mxu0  ;;  %v17256_v30 = vpop.f32.mrf.mxu1 }
0x14b1   :  { %v11509_v39 = vadd.f32 %v11508_v51, %v11428_v28 }
0x14b3   :  { %v11584_v42 = vpop.f32.mrf.mxu0 }
0x14b4   :  { %v11585_v61 = vadd.f32 %v11584_v42, %v11509_v39 }
0x14b5   :  { %v12001_v44 = vpop.f32.mrf.mxu1  ;;  %v17235_v37 = vpop.f32.mrf.mxu0 }
0x14b6   :  { %v11660_v5 = vadd.f32 %v11659_v14, %v11585_v61 }
0x14b7   :  { %v17270_v43 = vpop.f32.mrf.mxu1 }
0x14b9   :  { %v11736_v46 = vpop.f32.mrf.mxu0 }
0x14ba   :  { %v11737_v48 = vadd.f32 %v11736_v46, %v11660_v5  ;;  %v12152_v27 = vpop.f32.mrf.mxu1 }
0x14bb   :  { %v17249_v49 = vpop.f32.mrf.mxu0 }
0x14bc   :  { %v11810_v50 = vadd.f32 %v11809_v38, %v11737_v48  ;;  %v17284_v52 = vpop.f32.mrf.mxu1 }
0x14be   :  { %11821 = vrot.lane.b32.xlu1 %v11810_v50, %s17931_s29  ;;  %v11813_v3 = vadd.f32 %v11810_v50, %v11351_v9 }
0x14bf   :  { %v11920_v54 = vpop.f32.mrf.mxu0 }
0x14c0   :  { %v11921_v56 = vadd.f32 %v19098_v34, %v11920_v54  ;;  %v12302_v58 = vpop.f32.mrf.mxu1  ;;  %v15862_v10 = vmul.f32 -1.442695, %v11813_v3 }
0x14c1   :  { %v17263_v59 = vpop.f32.mrf.mxu0 }
0x14c2   :  { %v17298_v45 = vpop.f32.mrf.mxu1  ;;  %v12002_v60 = vadd.f32 %v12001_v44, %v11921_v56  ;;  %17691 = vpow2.f32 %v15862_v10 }
0x14c4   :  { %v12077_v32 = vpop.f32.mrf.mxu0 }
0x14c5   :  { %v12078_v55 = vadd.f32 %v12077_v32, %v12002_v60 }
0x14c6   :  { %v17277_v63 = vpop.f32.mrf.mxu0 }
0x14c7   :  { %v12153_v1 = vadd.f32 %v12152_v27, %v12078_v55 }
0x14c8   :  { %v12229_v2 = vpop.f32.mrf.mxu0 }
0x14c9   :  { %v12230_v4 = vadd.f32 %v12229_v2, %v12153_v1 }
0x14ca   :  { %v17291_v53 = vpop.f32.mrf.mxu0 }
0x14cb   :  { %v12303_v8 = vadd.f32 %v12302_v58, %v12230_v4 }
0x14cd   :  { %12314 = vrot.lane.b32.xlu0 %v12303_v8, %s17931_s29  ;;  %v12306_v47 = vadd.f32 %v12303_v8, %v11844_v22 }
0x14cf   :  { %v15863_v16 = vmul.f32 -1.442695, %v12306_v47  ;;  %v17692_v41 = vpop.eup %17691 }
0x14d0   :  { %v11817_v18 = vadd.f32 1.0, %v17692_v41 }
0x14d1   :  { %17693 = vpow2.f32 %v15863_v16 }
0x14d2   :  { %17695 = vrcp.f32 %v11817_v18 }
0x14de   :  { %v17694_v62 = vpop.eup %17693 }
0x14df   :  { %v12310_v29 = vadd.f32 1.0, %v17694_v62  ;;  %v17696_v7 = vpop.eup %17695 }
0x14e0   :  { %v11831_v28 = vsub.f32 1.0, %v17696_v7  ;;  %v11837_v30 = vmul.f32 %v17696_v7, %v19107_v6 }
0x14e1   :  { %17697 = vrcp.f32 %v12310_v29 }
0x14ee   :  { %v17698_v25 = vpop.eup %17697 }
0x14ef   :  { %v12324_v61 = vsub.f32 1.0, %v17698_v25  ;;  %v12330_v37 = vmul.f32 %v17698_v25, %v19112_v19 }
0x1530   :  { %v11822_v23 = vpop.permute.xlu1 %11821 }
0x1531   :  { %v11824_v24 = vmul.f32 %v17696_v7, %v11822_v23 }
0x1533   :  { %11826 = vrot.lane.b32.xlu1 %v11824_v24, %s17932_s6 }
0x153f   :  { %v12315_v26 = vpop.permute.xlu0 %12314 }
0x1540   :  { %v12317_v40 = vmul.f32 %v17698_v25, %v12315_v26 }
0x1542   :  { %12319 = vrot.lane.b32.xlu0 %v12317_v40, %s17932_s6 }
0x15a5   :  { %v11827_v51 = vpop.permute.xlu1 %11826 }
0x15a6   :  { %v11829_v33 = vadd.f32 %v11827_v51, %v11351_v9 }
0x15a8   :  { %17699 = vtanh.f32 %v11829_v33 }
0x15b4   :  { %v12320_v14 = vpop.permute.xlu0 %12319 }
0x15b5   :  { %v17700_v35 = vpop.eup %17699  ;;  %v12322_v31 = vadd.f32 %v12320_v14, %v11844_v22 }
0x15b6   :  { %11833 = vrot.lane.b32.xlu1 %v17700_v35, %s17933_s12 }
0x15b7   :  { %17701 = vtanh.f32 %v12322_v31 }
0x15c4   :  { %v17702_v38 = vpop.eup %17701 }
0x15c5   :  { %12326 = vrot.lane.b32.xlu0 %v17702_v38, %s17933_s12 }
0x1628   :  { %v11834_v36 = vpop.permute.xlu1 %11833 }
0x1629   :  { %v11836_v39 = vmul.f32 %v11834_v36, %v11831_v28 }
0x162b   :  { %v19201_v42 = vadd.f32 %v11837_v30, %v11836_v39 }
0x162d   :  { %11840 = vrot.lane.b32.xlu1 %v19201_v42, %s17933_s12 }
0x1637   :  { %v12327_v44 = vpop.permute.xlu0 %12326 }
0x1638   :  { %v12329_v5 = vmul.f32 %v12327_v44, %v12324_v61 }
0x163a   :  { %v19206_v43 = vadd.f32 %v12330_v37, %v12329_v5  ;;  %v12337_v37 = vld [vmem:[#allocation2 + $0x5] sm:$0x1] }
0x163c   :  { %12333 = vrot.lane.b32.xlu0 %v19206_v43, %s17933_s12 }
0x169f   :  { %v11841_v46 = vpop.permute.xlu1 %11840 }
0x16a0   :  { %11843 = vst.msk [vmem:[#allocation3 + $0x4] sm:$0x1] %vm8363_vm3, %v11841_v46  ;;  %v12338_v6 = vsel %vm430_vm7, %v11841_v46, 0 }
0x16a1   :  { %v12407_v48 = vand.u32 4294901760, %v12338_v6 }
0x16a3   :  { %v12408_v27 = vsub.f32 %v12338_v6, %v12407_v48  ;;  %17311 = vmatmul.mubr.f32.vlgmr.msra.gmra.mxu1 %v12407_v48  ;;  %v12830_v6 = vld [vmem:[#allocation2 + $0xd] sm:$0x1] }
0x16a4   :  { %17321 = vmatpush3.msra.mxu1 %v18701_v0  ;;  %17324 = vmatprep.mubr.msk.f32.mxu1 %vm17928_vm12, %v17927_v12 }
0x16a5   :  { %v12409_v19 = vand.u32 4294901760, %v12408_v27  ;;  %17322 = vmatprep.subr.mxu1 %v17927_v12 }
0x16a6   :  { %17323 = vmatpush3.msra.mxu1 %v18710_v17 }
0x16a7   :  { %v12410_v49 = vsub.f32 %v12408_v27, %v12409_v19  ;;  %17325 = vmatmul.mubr.f32.vlgmr.msra.gmra.mxu1 %v12409_v19  ;;  %17334 = vmatprep.subr.mxu1 %v17927_v12 }
0x16a8   :  { %17335 = vmatpush3.msra.mxu1 %v18701_v0  ;;  %17338 = vmatprep.mubr.msk.f32.mxu1 %vm17928_vm12, %v17927_v12 }
0x16a9   :  { %v12411_v50 = vand.u32 4294901760, %v12410_v49  ;;  %17336 = vmatprep.subr.mxu1 %v17927_v12 }
0x16aa   :  { %17337 = vmatpush3.msra.mxu1 %v18710_v17 }
0x16ab   :  { %17304 = vmatmul.mubr.f32.vlgmr.msra.gmra.mxu0 %v12411_v50  ;;  %17339 = vmatmul.mubr.f32.vlgmr.msra.gmra.mxu1 %v12407_v48 }
0x16ac   :  { %17348 = vmatprep.subr.mxu1 %v17927_v12  ;;  %17314 = vmatpush3.msra.mxu0 %v18708_v15 }
0x16ad   :  { %17349 = vmatpush3.msra.mxu1 %v18735_v57  ;;  %17315 = vmatprep.subr.mxu0 %v17927_v12 }
0x16ae   :  { %v12334_v52 = vpop.permute.xlu0 %12333  ;;  %17350 = vmatprep.subr.mxu1 %v17927_v12  ;;  %17316 = vmatpush3.msra.mxu0 %v18717_v13 }
0x16af   :  { %12336 = vst.msk [vmem:[#allocation3 + $0xc] sm:$0x1] %vm8363_vm3, %v12334_v52  ;;  %v12831_v54 = vsel %vm430_vm7, %v12334_v52, 0  ;;  %17317 = vmatprep.mubr.msk.f32.mxu0 %vm17928_vm12, %v17927_v12  ;;  %17351 = vmatpush3.msra.mxu1 %v18746_v21 }
0x16b0   :  { %v12900_v56 = vand.u32 4294901760, %v12831_v54  ;;  %17352 = vmatprep.mubr.msk.f32.mxu1 %vm17928_vm12, %v17927_v12  ;;  %17318 = vmatmul.mubr.f32.vlgmr.msra.gmra.mxu0 %v12408_v27 }
0x16b1   :  { %17327 = vmatprep.subr.mxu0 %v17927_v12  ;;  %17362 = vmatprep.subr.mxu1 %v17927_v12 }
0x16b2   :  { %v12901_v58 = vsub.f32 %v12831_v54, %v12900_v56  ;;  %17353 = vmatmul.mubr.f32.vlgmr.msra.gmra.mxu1 %v12900_v56  ;;  %17328 = vmatpush3.msra.mxu0 %v18714_v11 }
0x16b3   :  { %17363 = vmatpush3.msra.mxu1 %v18701_v0  ;;  %17329 = vmatprep.subr.mxu0 %v17927_v12 }
0x16b4   :  { %v12902_v59 = vand.u32 4294901760, %v12901_v58  ;;  %17364 = vmatprep.subr.mxu1 %v17927_v12  ;;  %17330 = vmatpush3.msra.mxu0 %v18727_v20 }
0x16b5   :  { %17331 = vmatprep.mubr.msk.f32.mxu0 %vm17928_vm12, %v17927_v12  ;;  %17365 = vmatpush3.msra.mxu1 %v18710_v17 }
0x16b6   :  { %v12903_v45 = vsub.f32 %v12901_v58, %v12902_v59  ;;  %17366 = vmatprep.mubr.msk.f32.mxu1 %vm17928_vm12, %v17927_v12  ;;  %17332 = vmatmul.mubr.f32.vlgmr.msra.gmra.mxu0 %v12407_v48 }
0x16b7   :  { %17341 = vmatprep.subr.mxu0 %v17927_v12  ;;  %17367 = vmatmul.mubr.f32.vlgmr.msra.gmra.mxu1 %v12902_v59 }
0x16b8   :  { %v12904_v60 = vand.u32 4294901760, %v12903_v45  ;;  %17376 = vmatprep.subr.mxu1 %v17927_v12  ;;  %17342 = vmatpush3.msra.mxu0 %v18701_v0 }
0x16b9   :  { %17377 = vmatpush3.msra.mxu1 %v18701_v0  ;;  %17343 = vmatprep.subr.mxu0 %v17927_v12 }
0x16ba   :  { %17378 = vmatprep.subr.mxu1 %v17927_v12  ;;  %17344 = vmatpush3.msra.mxu0 %v18710_v17 }
0x16bb   :  { %17345 = vmatprep.mubr.msk.f32.mxu0 %vm17928_vm12, %v17927_v12  ;;  %17379 = vmatpush3.msra.mxu1 %v18710_v17 }
0x16bc   :  { %17380 = vmatprep.mubr.msk.f32.mxu1 %vm17928_vm12, %v17927_v12  ;;  %17346 = vmatmul.mubr.f32.vlgmr.msra.gmra.mxu0 %v12904_v60 }
0x16bd   :  { %17355 = vmatprep.subr.mxu0 %v17927_v12  ;;  %17381 = vmatmul.mubr.f32.vlgmr.msra.gmra.mxu1 %v12900_v56 }
0x16be   :  { %17356 = vmatpush3.msra.mxu0 %v18708_v15  ;;  %17359 = vmatprep.mubr.msk.f32.mxu0 %vm17928_vm12, %v17927_v12 }
0x16bf   :  { %17357 = vmatprep.subr.mxu0 %v17927_v12  ;;  %17390 = vmatprep.subr.mxu1 %v17927_v12 }
0x16c0   :  { %17358 = vmatpush3.msra.mxu0 %v18717_v13  ;;  %17391 = vmatpush3.msra.mxu1 %v18735_v57 }
0x16c1   :  { %17360 = vmatmul.mubr.f32.vlgmr.msra.gmra.mxu0 %v12901_v58  ;;  %17369 = vmatprep.subr.mxu0 %v17927_v12 }
0x16c2   :  { %17370 = vmatpush3.msra.mxu0 %v18714_v11  ;;  %17373 = vmatprep.mubr.msk.f32.mxu0 %vm17928_vm12, %v17927_v12 }
0x16c3   :  { %17371 = vmatprep.subr.mxu0 %v17927_v12  ;;  %17392 = vmatprep.subr.mxu1 %v17927_v12 }
0x16c4   :  { %17372 = vmatpush3.msra.mxu0 %v18727_v20  ;;  %17393 = vmatpush3.msra.mxu1 %v18746_v21 }
0x16c5   :  { %17374 = vmatmul.mubr.f32.vlgmr.msra.gmra.mxu0 %v12900_v56  ;;  %17394 = vmatprep.mubr.msk.f32.mxu1 %vm17928_vm12, %v17927_v12 }
0x16c6   :  { %17404 = vmatprep.subr.mxu1 %v17927_v12  ;;  %17383 = vmatprep.subr.mxu0 %v17927_v12 }
0x16c7   :  { %17384 = vmatpush3.msra.mxu0 %v18701_v0  ;;  %17387 = vmatprep.mubr.msk.f32.mxu0 %vm17928_vm12, %v17927_v12 }
0x16c8   :  { %17385 = vmatprep.subr.mxu0 %v17927_v12 }
0x16c9   :  { %17386 = vmatpush3.msra.mxu0 %v18710_v17 }
0x16ca   :  { %17397 = vmatprep.subr.mxu0 %v17927_v12 }
0x1763   :  { %v12494_v32 = vpop.f32.mrf.mxu1 }
0x1765   :  { %v17312_v55 = vpop.f32.mrf.mxu1 }
0x1767   :  { %v12645_v63 = vpop.f32.mrf.mxu1 }
0x1769   :  { %v17326_v1 = vpop.f32.mrf.mxu1 }
0x176b   :  { %v12413_v2 = vpop.f32.mrf.mxu0  ;;  %v12795_v4 = vpop.f32.mrf.mxu1 }
0x176c   :  { %v12414_v53 = vadd.f32 %v19098_v34, %v12413_v2 }
0x176d   :  { %v17305_v8 = vpop.f32.mrf.mxu0  ;;  %v17340_v9 = vpop.f32.mrf.mxu1 }
0x176e   :  { %v12495_v3 = vadd.f32 %v12494_v32, %v12414_v53 }
0x1770   :  { %v12570_v10 = vpop.f32.mrf.mxu0 }
0x1771   :  { %v12571_v22 = vadd.f32 %v12570_v10, %v12495_v3 }
0x1772   :  { %v12987_v47 = vpop.f32.mrf.mxu1  ;;  %v17319_v16 = vpop.f32.mrf.mxu0 }
0x1773   :  { %v12646_v41 = vadd.f32 %v12645_v63, %v12571_v22 }
0x1774   :  { %v17354_v18 = vpop.f32.mrf.mxu1 }
0x1776   :  { %v12722_v62 = vpop.f32.mrf.mxu0 }
0x1777   :  { %v12723_v29 = vadd.f32 %v12722_v62, %v12646_v41  ;;  %v13138_v7 = vpop.f32.mrf.mxu1 }
0x1778   :  { %v17333_v23 = vpop.f32.mrf.mxu0 }
0x1779   :  { %v12796_v24 = vadd.f32 %v12795_v4, %v12723_v29  ;;  %v17368_v25 = vpop.f32.mrf.mxu1 }
0x177b   :  { %12807 = vrot.lane.b32.xlu1 %v12796_v24, %s17931_s29  ;;  %v12799_v5 = vadd.f32 %v12796_v24, %v12337_v37 }
0x177c   :  { %v12906_v26 = vpop.f32.mrf.mxu0 }
0x177d   :  { %v12907_v40 = vadd.f32 %v19098_v34, %v12906_v26  ;;  %v13288_v51 = vpop.f32.mrf.mxu1  ;;  %v15864_v46 = vmul.f32 -1.442695, %v12799_v5 }
0x177e   :  { %v17347_v33 = vpop.f32.mrf.mxu0 }
0x177f   :  { %v17382_v14 = vpop.f32.mrf.mxu1  ;;  %v12988_v35 = vadd.f32 %v12987_v47, %v12907_v40  ;;  %17703 = vpow2.f32 %v15864_v46 }
0x1781   :  { %v13063_v31 = vpop.f32.mrf.mxu0 }
0x1782   :  { %v13064_v38 = vadd.f32 %v13063_v31, %v12988_v35 }
0x1783   :  { %v17361_v28 = vpop.f32.mrf.mxu0 }
0x1784   :  { %v13139_v36 = vadd.f32 %v13138_v7, %v13064_v38 }
0x1785   :  { %v13215_v30 = vpop.f32.mrf.mxu0 }
0x1786   :  { %v13216_v39 = vadd.f32 %v13215_v30, %v13139_v36 }
0x1787   :  { %v17375_v61 = vpop.f32.mrf.mxu0 }
0x1788   :  { %v13289_v44 = vadd.f32 %v13288_v51, %v13216_v39 }
0x178a   :  { %13300 = vrot.lane.b32.xlu0 %v13289_v44, %s17931_s29  ;;  %v13292_v48 = vadd.f32 %v13289_v44, %v12830_v6 }
0x178c   :  { %v15865_v27 = vmul.f32 -1.442695, %v13292_v48  ;;  %v17704_v19 = vpop.eup %17703 }
0x178d   :  { %v12803_v49 = vadd.f32 1.0, %v17704_v19 }
0x178e   :  { %17705 = vpow2.f32 %v15865_v27 }
0x178f   :  { %17707 = vrcp.f32 %v12803_v49 }
0x179b   :  { %v17706_v50 = vpop.eup %17705 }
0x179c   :  { %v13296_v52 = vadd.f32 1.0, %v17706_v50  ;;  %v17708_v54 = vpop.eup %17707 }
0x179d   :  { %v12817_v53 = vsub.f32 1.0, %v17708_v54  ;;  %v12823_v9 = vmul.f32 %v17708_v54, %v19201_v42 }
0x179e   :  { %17709 = vrcp.f32 %v13296_v52 }
0x17ab   :  { %v17710_v59 = vpop.eup %17709 }
0x17ac   :  { %v13310_v22 = vsub.f32 1.0, %v17710_v59  ;;  %v13316_v16 = vmul.f32 %v17710_v59, %v19206_v43 }
0x17ed   :  { %v12808_v56 = vpop.permute.xlu1 %12807 }
0x17ee   :  { %v12810_v58 = vmul.f32 %v17708_v54, %v12808_v56 }
0x17f0   :  { %12812 = vrot.lane.b32.xlu1 %v12810_v58, %s17932_s6 }
0x17fc   :  { %v13301_v45 = vpop.permute.xlu0 %13300 }
0x17fd   :  { %v13303_v60 = vmul.f32 %v17710_v59, %v13301_v45 }
0x17ff   :  { %13305 = vrot.lane.b32.xlu0 %v13303_v60, %s17932_s6 }
0x1862   :  { %v12813_v32 = vpop.permute.xlu1 %12812 }
0x1863   :  { %v12815_v55 = vadd.f32 %v12813_v32, %v12337_v37 }
0x1865   :  { %17711 = vtanh.f32 %v12815_v55 }
0x1871   :  { %v13306_v63 = vpop.permute.xlu0 %13305 }
0x1872   :  { %v17712_v1 = vpop.eup %17711  ;;  %v13308_v2 = vadd.f32 %v13306_v63, %v12830_v6 }
0x1873   :  { %12819 = vrot.lane.b32.xlu1 %v17712_v1, %s17933_s12 }
0x1874   :  { %17713 = vtanh.f32 %v13308_v2 }
0x1881   :  { %v17714_v4 = vpop.eup %17713 }
0x1882   :  { %13312 = vrot.lane.b32.xlu0 %v17714_v4, %s17933_s12 }
0x18e5   :  { %v12820_v8 = vpop.permute.xlu1 %12819 }
0x18e6   :  { %v12822_v3 = vmul.f32 %v12820_v8, %v12817_v53 }
0x18e8   :  { %v19295_v10 = vadd.f32 %v12823_v9, %v12822_v3 }
0x18ea   :  { %12826 = vrot.lane.b32.xlu1 %v19295_v10, %s17933_s12 }
0x18f4   :  { %v13313_v47 = vpop.permute.xlu0 %13312 }
0x18f5   :  { %v13315_v41 = vmul.f32 %v13313_v47, %v13310_v22 }
0x18f7   :  { %v19300_v18 = vadd.f32 %v13316_v16, %v13315_v41  ;;  %v13323_v16 = vld [vmem:[#allocation2 + $0x6] sm:$0x1] }
0x18f9   :  { %13319 = vrot.lane.b32.xlu0 %v19300_v18, %s17933_s12 }
0x195c   :  { %v12827_v62 = vpop.permute.xlu1 %12826 }
0x195d   :  { %12829 = vst.msk [vmem:[#allocation3 + $0x5] sm:$0x1] %vm8363_vm3, %v12827_v62  ;;  %v13324_v42 = vsel %vm430_vm7, %v12827_v62, 0 }
0x195e   :  { %v13393_v29 = vand.u32 4294901760, %v13324_v42 }
0x1960   :  { %v13394_v7 = vsub.f32 %v13324_v42, %v13393_v29  ;;  %17395 = vmatmul.mubr.f32.vlgmr.msra.gmra.mxu1 %v13393_v29  ;;  %v13816_v42 = vld [vmem:[#allocation2 + $0xe] sm:$0x1] }
0x1961   :  { %17405 = vmatpush3.msra.mxu1 %v18701_v0  ;;  %17408 = vmatprep.mubr.msk.f32.mxu1 %vm17928_vm12, %v17927_v12 }
0x1962   :  { %v13395_v43 = vand.u32 4294901760, %v13394_v7  ;;  %17406 = vmatprep.subr.mxu1 %v17927_v12 }
0x1963   :  { %17407 = vmatpush3.msra.mxu1 %v18710_v17 }
0x1964   :  { %v13396_v23 = vsub.f32 %v13394_v7, %v13395_v43  ;;  %17409 = vmatmul.mubr.f32.vlgmr.msra.gmra.mxu1 %v13395_v43  ;;  %17418 = vmatprep.subr.mxu1 %v17927_v12 }
0x1965   :  { %17419 = vmatpush3.msra.mxu1 %v18701_v0  ;;  %17422 = vmatprep.mubr.msk.f32.mxu1 %vm17928_vm12, %v17927_v12 }
0x1966   :  { %v13397_v24 = vand.u32 4294901760, %v13396_v23  ;;  %17420 = vmatprep.subr.mxu1 %v17927_v12 }
0x1967   :  { %17421 = vmatpush3.msra.mxu1 %v18710_v17 }
0x1968   :  { %17388 = vmatmul.mubr.f32.vlgmr.msra.gmra.mxu0 %v13397_v24  ;;  %17423 = vmatmul.mubr.f32.vlgmr.msra.gmra.mxu1 %v13393_v29 }
0x1969   :  { %17432 = vmatprep.subr.mxu1 %v17927_v12  ;;  %17398 = vmatpush3.msra.mxu0 %v18708_v15 }
0x196a   :  { %17433 = vmatpush3.msra.mxu1 %v18735_v57  ;;  %17399 = vmatprep.subr.mxu0 %v17927_v12 }
0x196b   :  { %v13320_v25 = vpop.permute.xlu0 %13319  ;;  %17434 = vmatprep.subr.mxu1 %v17927_v12  ;;  %17400 = vmatpush3.msra.mxu0 %v18717_v13 }
0x196c   :  { %13322 = vst.msk [vmem:[#allocation3 + $0xd] sm:$0x1] %vm8363_vm3, %v13320_v25  ;;  %v13817_v26 = vsel %vm430_vm7, %v13320_v25, 0  ;;  %17401 = vmatprep.mubr.msk.f32.mxu0 %vm17928_vm12, %v17927_v12  ;;  %17435 = vmatpush3.msra.mxu1 %v18746_v21 }
0x196d   :  { %v13886_v40 = vand.u32 4294901760, %v13817_v26  ;;  %17436 = vmatprep.mubr.msk.f32.mxu1 %vm17928_vm12, %v17927_v12  ;;  %17402 = vmatmul.mubr.f32.vlgmr.msra.gmra.mxu0 %v13394_v7 }
0x196e   :  { %17411 = vmatprep.subr.mxu0 %v17927_v12  ;;  %17446 = vmatprep.subr.mxu1 %v17927_v12 }
0x196f   :  { %v13887_v51 = vsub.f32 %v13817_v26, %v13886_v40  ;;  %17437 = vmatmul.mubr.f32.vlgmr.msra.gmra.mxu1 %v13886_v40  ;;  %17412 = vmatpush3.msra.mxu0 %v18714_v11 }
0x1970   :  { %17447 = vmatpush3.msra.mxu1 %v18701_v0  ;;  %17413 = vmatprep.subr.mxu0 %v17927_v12 }
0x1971   :  { %v13888_v33 = vand.u32 4294901760, %v13887_v51  ;;  %17448 = vmatprep.subr.mxu1 %v17927_v12  ;;  %17414 = vmatpush3.msra.mxu0 %v18727_v20 }
0x1972   :  { %17415 = vmatprep.mubr.msk.f32.mxu0 %vm17928_vm12, %v17927_v12  ;;  %17449 = vmatpush3.msra.mxu1 %v18710_v17 }
0x1973   :  { %v13889_v14 = vsub.f32 %v13887_v51, %v13888_v33  ;;  %17450 = vmatprep.mubr.msk.f32.mxu1 %vm17928_vm12, %v17927_v12  ;;  %17416 = vmatmul.mubr.f32.vlgmr.msra.gmra.mxu0 %v13393_v29 }
0x1974   :  { %17425 = vmatprep.subr.mxu0 %v17927_v12  ;;  %17451 = vmatmul.mubr.f32.vlgmr.msra.gmra.mxu1 %v13888_v33 }
0x1975   :  { %v13890_v35 = vand.u32 4294901760, %v13889_v14  ;;  %17460 = vmatprep.subr.mxu1 %v17927_v12  ;;  %17426 = vmatpush3.msra.mxu0 %v18701_v0 }
0x1976   :  { %17461 = vmatpush3.msra.mxu1 %v18701_v0  ;;  %17427 = vmatprep.subr.mxu0 %v17927_v12 }
0x1977   :  { %17462 = vmatprep.subr.mxu1 %v17927_v12  ;;  %17428 = vmatpush3.msra.mxu0 %v18710_v17 }
0x1978   :  { %17429 = vmatprep.mubr.msk.f32.mxu0 %vm17928_vm12, %v17927_v12  ;;  %17463 = vmatpush3.msra.mxu1 %v18710_v17 }
0x1979   :  { %17464 = vmatprep.mubr.msk.f32.mxu1 %vm17928_vm12, %v17927_v12  ;;  %17430 = vmatmul.mubr.f32.vlgmr.msra.gmra.mxu0 %v13890_v35 }
0x197a   :  { %17439 = vmatprep.subr.mxu0 %v17927_v12  ;;  %17465 = vmatmul.mubr.f32.vlgmr.msra.gmra.mxu1 %v13886_v40 }
0x197b   :  { %17440 = vmatpush3.msra.mxu0 %v18708_v15  ;;  %17443 = vmatprep.mubr.msk.f32.mxu0 %vm17928_vm12, %v17927_v12 }
0x197c   :  { %17441 = vmatprep.subr.mxu0 %v17927_v12  ;;  %17474 = vmatprep.subr.mxu1 %v17927_v12 }
0x197d   :  { %17442 = vmatpush3.msra.mxu0 %v18717_v13  ;;  %17475 = vmatpush3.msra.mxu1 %v18735_v57 }
0x197e   :  { %17444 = vmatmul.mubr.f32.vlgmr.msra.gmra.mxu0 %v13887_v51  ;;  %17453 = vmatprep.subr.mxu0 %v17927_v12 }
0x197f   :  { %17454 = vmatpush3.msra.mxu0 %v18714_v11  ;;  %17457 = vmatprep.mubr.msk.f32.mxu0 %vm17928_vm12, %v17927_v12 }
0x1980   :  { %17455 = vmatprep.subr.mxu0 %v17927_v12  ;;  %17476 = vmatprep.subr.mxu1 %v17927_v12 }
0x1981   :  { %17456 = vmatpush3.msra.mxu0 %v18727_v20  ;;  %17477 = vmatpush3.msra.mxu1 %v18746_v21 }
0x1982   :  { %17458 = vmatmul.mubr.f32.vlgmr.msra.gmra.mxu0 %v13886_v40  ;;  %17478 = vmatprep.mubr.msk.f32.mxu1 %vm17928_vm12, %v17927_v12 }
0x1983   :  { %17488 = vmatprep.subr.mxu1 %v17927_v12  ;;  %17467 = vmatprep.subr.mxu0 %v17927_v12 }
0x1984   :  { %17468 = vmatpush3.msra.mxu0 %v18701_v0  ;;  %17471 = vmatprep.mubr.msk.f32.mxu0 %vm17928_vm12, %v17927_v12 }
0x1985   :  { %17469 = vmatprep.subr.mxu0 %v17927_v12 }
0x1986   :  { %17470 = vmatpush3.msra.mxu0 %v18710_v17 }
0x1987   :  { %17481 = vmatprep.subr.mxu0 %v17927_v12 }
0x1a20   :  { %v13480_v31 = vpop.f32.mrf.mxu1 }
0x1a22   :  { %v17396_v38 = vpop.f32.mrf.mxu1 }
0x1a24   :  { %v13631_v28 = vpop.f32.mrf.mxu1 }
0x1a26   :  { %v17410_v36 = vpop.f32.mrf.mxu1 }
0x1a28   :  { %v13399_v30 = vpop.f32.mrf.mxu0  ;;  %v13781_v39 = vpop.f32.mrf.mxu1 }
0x1a29   :  { %v13400_v61 = vadd.f32 %v19098_v34, %v13399_v30 }
0x1a2a   :  { %v17389_v44 = vpop.f32.mrf.mxu0  ;;  %v17424_v37 = vpop.f32.mrf.mxu1 }
0x1a2b   :  { %v13481_v5 = vadd.f32 %v13480_v31, %v13400_v61 }
0x1a2d   :  { %v13556_v46 = vpop.f32.mrf.mxu0 }
0x1a2e   :  { %v13557_v6 = vadd.f32 %v13556_v46, %v13481_v5 }
0x1a2f   :  { %v13973_v48 = vpop.f32.mrf.mxu1  ;;  %v17403_v27 = vpop.f32.mrf.mxu0 }
0x1a30   :  { %v13632_v19 = vadd.f32 %v13631_v28, %v13557_v6 }
0x1a31   :  { %v17438_v49 = vpop.f32.mrf.mxu1 }
0x1a33   :  { %v13708_v50 = vpop.f32.mrf.mxu0 }
0x1a34   :  { %v13709_v52 = vadd.f32 %v13708_v50, %v13632_v19  ;;  %v14124_v54 = vpop.f32.mrf.mxu1 }
0x1a35   :  { %v17417_v56 = vpop.f32.mrf.mxu0 }
0x1a36   :  { %v13782_v58 = vadd.f32 %v13781_v39, %v13709_v52  ;;  %v17452_v59 = vpop.f32.mrf.mxu1 }
0x1a38   :  { %13793 = vrot.lane.b32.xlu1 %v13782_v58, %s17931_s29  ;;  %v13785_v41 = vadd.f32 %v13782_v58, %v13323_v16 }
0x1a39   :  { %v13892_v45 = vpop.f32.mrf.mxu0 }
0x1a3a   :  { %v13893_v60 = vadd.f32 %v19098_v34, %v13892_v45  ;;  %v14274_v32 = vpop.f32.mrf.mxu1  ;;  %v15866_v62 = vmul.f32 -1.442695, %v13785_v41 }
0x1a3b   :  { %v17431_v55 = vpop.f32.mrf.mxu0 }
0x1a3c   :  { %v17466_v63 = vpop.f32.mrf.mxu1  ;;  %v13974_v1 = vadd.f32 %v13973_v48, %v13893_v60  ;;  %17715 = vpow2.f32 %v15866_v62 }
0x1a3e   :  { %v14049_v2 = vpop.f32.mrf.mxu0 }
0x1a3f   :  { %v14050_v4 = vadd.f32 %v14049_v2, %v13974_v1 }
0x1a40   :  { %v17445_v53 = vpop.f32.mrf.mxu0 }
0x1a41   :  { %v14125_v8 = vadd.f32 %v14124_v54, %v14050_v4 }
0x1a42   :  { %v14201_v9 = vpop.f32.mrf.mxu0 }
0x1a43   :  { %v14202_v3 = vadd.f32 %v14201_v9, %v14125_v8 }
0x1a44   :  { %v17459_v22 = vpop.f32.mrf.mxu0 }
0x1a45   :  { %v14275_v47 = vadd.f32 %v14274_v32, %v14202_v3 }
0x1a47   :  { %14286 = vrot.lane.b32.xlu0 %v14275_v47, %s17931_s29  ;;  %v14278_v34 = vadd.f32 %v14275_v47, %v13816_v42 }
0x1a49   :  { %v15867_v29 = vmul.f32 -1.442695, %v14278_v34  ;;  %v17716_v7 = vpop.eup %17715 }
0x1a4a   :  { %v13789_v43 = vadd.f32 1.0, %v17716_v7 }
0x1a4b   :  { %17717 = vpow2.f32 %v15867_v29 }
0x1a4c   :  { %17719 = vrcp.f32 %v13789_v43 }
0x1a58   :  { %v17718_v23 = vpop.eup %17717 }
0x1a59   :  { %v14282_v24 = vadd.f32 1.0, %v17718_v23  ;;  %v17720_v25 = vpop.eup %17719 }
0x1a5a   :  { %v13803_v39 = vsub.f32 1.0, %v17720_v25  ;;  %v13809_v44 = vmul.f32 %v17720_v25, %v19295_v10 }
0x1a5b   :  { %17721 = vrcp.f32 %v14282_v24 }
0x1a68   :  { %v17722_v51 = vpop.eup %17721 }
0x1a69   :  { %v14296_v46 = vsub.f32 1.0, %v17722_v51  ;;  %v14302_v48 = vmul.f32 %v17722_v51, %v19300_v18 }
0x1aaa   :  { %v13794_v26 = vpop.permute.xlu1 %13793 }
0x1aab   :  { %v13796_v40 = vmul.f32 %v17720_v25, %v13794_v26 }
0x1aad   :  { %13798 = vrot.lane.b32.xlu1 %v13796_v40, %s17932_s6 }
0x1ab9   :  { %v14287_v33 = vpop.permute.xlu0 %14286 }
0x1aba   :  { %v14289_v14 = vmul.f32 %v17722_v51, %v14287_v33 }
0x1abc   :  { %14291 = vrot.lane.b32.xlu0 %v14289_v14, %s17932_s6 }
0x1b1f   :  { %v13799_v35 = vpop.permute.xlu1 %13798 }
0x1b20   :  { %v13801_v31 = vadd.f32 %v13799_v35, %v13323_v16 }
0x1b22   :  { %17723 = vtanh.f32 %v13801_v31 }
0x1b2e   :  { %v14292_v38 = vpop.permute.xlu0 %14291 }
0x1b2f   :  { %v17724_v28 = vpop.eup %17723  ;;  %v14294_v36 = vadd.f32 %v14292_v38, %v13816_v42 }
0x1b30   :  { %13805 = vrot.lane.b32.xlu1 %v17724_v28, %s17933_s12  ;;  %v14309_v28 = vld [vmem:[#allocation2 + $0x7] sm:$0x1] }
0x1b31   :  { %17725 = vtanh.f32 %v14294_v36 }
0x1b3e   :  { %v17726_v30 = vpop.eup %17725 }
0x1b3f   :  { %14298 = vrot.lane.b32.xlu0 %v17726_v30, %s17933_s12 }
0x1ba2   :  { %v13806_v61 = vpop.permute.xlu1 %13805 }
0x1ba3   :  { %v13808_v37 = vmul.f32 %v13806_v61, %v13803_v39  ;;  %v14802_v39 = vld [vmem:[#allocation2 + $0xf] sm:$0x1] }
0x1ba5   :  { %v19389_v5 = vadd.f32 %v13809_v44, %v13808_v37 }
0x1ba7   :  { %13812 = vrot.lane.b32.xlu1 %v19389_v5, %s17933_s12 }
0x1bb1   :  { %v14299_v6 = vpop.permute.xlu0 %14298 }
0x1bb2   :  { %v14301_v27 = vmul.f32 %v14299_v6, %v14296_v46 }
0x1bb4   :  { %v19394_v19 = vadd.f32 %v14302_v48, %v14301_v27 }
0x1bb6   :  { %14305 = vrot.lane.b32.xlu0 %v19394_v19, %s17933_s12 }
0x1c19   :  { %v13813_v49 = vpop.permute.xlu1 %13812 }
0x1c1a   :  { %13815 = vst.msk [vmem:[#allocation3 + $0x6] sm:$0x1] %vm8363_vm3, %v13813_v49  ;;  %v14310_v10 = vsel %vm430_vm7, %v13813_v49, 0 }
0x1c1b   :  { %v14379_v50 = vand.u32 4294901760, %v14310_v10 }
0x1c1d   :  { %v14380_v52 = vsub.f32 %v14310_v10, %v14379_v50  ;;  %17479 = vmatmul.mubr.f32.vlgmr.msra.gmra.mxu1 %v14379_v50 }
0x1c1e   :  { %17489 = vmatpush3.msra.mxu1 %v18701_v0  ;;  %17492 = vmatprep.mubr.msk.f32.mxu1 %vm17928_vm12, %v17927_v12 }
0x1c1f   :  { %v14381_v18 = vand.u32 4294901760, %v14380_v52  ;;  %17490 = vmatprep.subr.mxu1 %v17927_v12 }
0x1c20   :  { %17491 = vmatpush3.msra.mxu1 %v18710_v17 }
0x1c21   :  { %v14382_v54 = vsub.f32 %v14380_v52, %v14381_v18  ;;  %17493 = vmatmul.mubr.f32.vlgmr.msra.gmra.mxu1 %v14381_v18  ;;  %17502 = vmatprep.subr.mxu1 %v17927_v12 }
0x1c22   :  { %17503 = vmatpush3.msra.mxu1 %v18701_v0  ;;  %17506 = vmatprep.mubr.msk.f32.mxu1 %vm17928_vm12, %v17927_v12 }
0x1c23   :  { %v14383_v56 = vand.u32 4294901760, %v14382_v54  ;;  %17504 = vmatprep.subr.mxu1 %v17927_v12 }
0x1c24   :  { %17505 = vmatpush3.msra.mxu1 %v18710_v17 }
0x1c25   :  { %17472 = vmatmul.mubr.f32.vlgmr.msra.gmra.mxu0 %v14383_v56  ;;  %17507 = vmatmul.mubr.f32.vlgmr.msra.gmra.mxu1 %v14379_v50 }
0x1c26   :  { %17516 = vmatprep.subr.mxu1 %v17927_v12  ;;  %17482 = vmatpush3.msra.mxu0 %v18708_v15 }
0x1c27   :  { %17517 = vmatpush3.msra.mxu1 %v18735_v57  ;;  %17483 = vmatprep.subr.mxu0 %v17927_v12 }
0x1c28   :  { %v14306_v58 = vpop.permute.xlu0 %14305  ;;  %17518 = vmatprep.subr.mxu1 %v17927_v12  ;;  %17484 = vmatpush3.msra.mxu0 %v18717_v13 }
0x1c29   :  { %14308 = vst.msk [vmem:[#allocation3 + $0xe] sm:$0x1] %vm8363_vm3, %v14306_v58  ;;  %v14803_v59 = vsel %vm430_vm7, %v14306_v58, 0  ;;  %17485 = vmatprep.mubr.msk.f32.mxu0 %vm17928_vm12, %v17927_v12  ;;  %17519 = vmatpush3.msra.mxu1 %v18746_v21 }
0x1c2a   :  { %v14872_v45 = vand.u32 4294901760, %v14803_v59  ;;  %17520 = vmatprep.mubr.msk.f32.mxu1 %vm17928_vm12, %v17927_v12  ;;  %17486 = vmatmul.mubr.f32.vlgmr.msra.gmra.mxu0 %v14380_v52 }
0x1c2b   :  { %17495 = vmatprep.subr.mxu0 %v17927_v12  ;;  %17530 = vmatprep.subr.mxu1 %v17927_v12 }
0x1c2c   :  { %v14873_v57 = vsub.f32 %v14803_v59, %v14872_v45  ;;  %17521 = vmatmul.mubr.f32.vlgmr.msra.gmra.mxu1 %v14872_v45  ;;  %17496 = vmatpush3.msra.mxu0 %v18714_v11 }
0x1c2d   :  { %17531 = vmatpush3.msra.mxu1 %v18701_v0  ;;  %17497 = vmatprep.subr.mxu0 %v17927_v12 }
0x1c2e   :  { %v14874_v60 = vand.u32 4294901760, %v14873_v57  ;;  %17532 = vmatprep.subr.mxu1 %v17927_v12  ;;  %17498 = vmatpush3.msra.mxu0 %v18727_v20 }
0x1c2f   :  { %17499 = vmatprep.mubr.msk.f32.mxu0 %vm17928_vm12, %v17927_v12  ;;  %17533 = vmatpush3.msra.mxu1 %v18710_v17 }
0x1c30   :  { %v14875_v21 = vsub.f32 %v14873_v57, %v14874_v60  ;;  %17534 = vmatprep.mubr.msk.f32.mxu1 %vm17928_vm12, %v17927_v12  ;;  %17500 = vmatmul.mubr.f32.vlgmr.msra.gmra.mxu0 %v14379_v50 }
0x1c31   :  { %17509 = vmatprep.subr.mxu0 %v17927_v12  ;;  %17535 = vmatmul.mubr.f32.vlgmr.msra.gmra.mxu1 %v14874_v60 }
0x1c32   :  { %v14876_v32 = vand.u32 4294901760, %v14875_v21  ;;  %17544 = vmatprep.subr.mxu1 %v17927_v12  ;;  %17510 = vmatpush3.msra.mxu0 %v18701_v0 }
0x1c33   :  { %17545 = vmatpush3.msra.mxu1 %v18701_v0  ;;  %17511 = vmatprep.subr.mxu0 %v17927_v12 }
0x1c34   :  { %17546 = vmatprep.subr.mxu1 %v17927_v12  ;;  %17512 = vmatpush3.msra.mxu0 %v18710_v17 }
0x1c35   :  { %17513 = vmatprep.mubr.msk.f32.mxu0 %vm17928_vm12, %v17927_v12  ;;  %17547 = vmatpush3.msra.mxu1 %v18710_v17 }
0x1c36   :  { %17548 = vmatprep.mubr.msk.f32.mxu1 %vm17928_vm12, %v17927_v12  ;;  %17514 = vmatmul.mubr.f32.vlgmr.msra.gmra.mxu0 %v14876_v32 }
0x1c37   :  { %17523 = vmatprep.subr.mxu0 %v17927_v12  ;;  %17549 = vmatmul.mubr.f32.vlgmr.msra.gmra.mxu1 %v14872_v45 }
0x1c38   :  { %17524 = vmatpush3.msra.mxu0 %v18708_v15  ;;  %17527 = vmatprep.mubr.msk.f32.mxu0 %vm17928_vm12, %v17927_v12 }
0x1c39   :  { %17525 = vmatprep.subr.mxu0 %v17927_v12 }
0x1c3a   :  { %17526 = vmatpush3.msra.mxu0 %v18717_v13  ;;  %v17740_v13 = vld [vmem:[%s19501_s16] sm:$0x1] }
0x1c3b   :  { %17528 = vmatmul.mubr.f32.vlgmr.msra.gmra.mxu0 %v14873_v57  ;;  %17537 = vmatprep.subr.mxu0 %v17927_v12 }
0x1c3c   :  { %17538 = vmatpush3.msra.mxu0 %v18714_v11  ;;  %17541 = vmatprep.mubr.msk.f32.mxu0 %vm17928_vm12, %v17927_v12 }
0x1c3d   :  { %17539 = vmatprep.subr.mxu0 %v17927_v12 }
0x1c3e   :  { %17540 = vmatpush3.msra.mxu0 %v18727_v20 }
0x1c3f   :  { %17542 = vmatmul.mubr.f32.vlgmr.msra.gmra.mxu0 %v14872_v45 }
0x1cdd   :  { %v14466_v0 = vpop.f32.mrf.mxu1 }
0x1cdf   :  { %v17480_v15 = vpop.f32.mrf.mxu1 }
0x1ce1   :  { %v14617_v17 = vpop.f32.mrf.mxu1 }
0x1ce3   :  { %v17494_v55 = vpop.f32.mrf.mxu1 }
0x1ce5   :  { %v14385_v63 = vpop.f32.mrf.mxu0  ;;  %v14767_v1 = vpop.f32.mrf.mxu1 }
0x1ce6   :  { %v14386_v2 = vadd.f32 %v17740_v13, %v14385_v63  ;;  %v15297_v63 = vld [vmem:[#allocation17] sm:$0xff] }
0x1ce7   :  { %v17473_v11 = vpop.f32.mrf.mxu0  ;;  %v17508_v4 = vpop.f32.mrf.mxu1 }
0x1ce8   :  { %v14467_v53 = vadd.f32 %v14466_v0, %v14386_v2 }
0x1cea   :  { %v14542_v8 = vpop.f32.mrf.mxu0 }
0x1ceb   :  { %v14543_v9 = vadd.f32 %v14542_v8, %v14467_v53 }
0x1cec   :  { %v14959_v12 = vpop.f32.mrf.mxu1  ;;  %v17487_v3 = vpop.f32.mrf.mxu0 }
0x1ced   :  { %v14618_v20 = vadd.f32 %v14617_v17, %v14543_v9  ;;  %v15298_v17 = vld [vmem:[#allocation17 + $0x8] sm:$0xff] }
0x1cee   :  { %v17522_v22 = vpop.f32.mrf.mxu1  ;;  %v15341_v55 = vand.u32 4294901760, %v15298_v17 }
0x1cf0   :  { %v14694_v47 = vpop.f32.mrf.mxu0  ;;  %17551 = vmatprep.subr.mxu0 %v15341_v55 }
0x1cf1   :  { %v14695_v16 = vadd.f32 %v14694_v47, %v14618_v20  ;;  %v15110_v41 = vpop.f32.mrf.mxu1  ;;  %17552 = vmatpush3.msra.mxu0 %v15341_v55 }
0x1cf2   :  { %v17501_v62 = vpop.f32.mrf.mxu0 }
0x1cf3   :  { %v14768_v42 = vadd.f32 %v14767_v1, %v14695_v16  ;;  %v17536_v34 = vpop.f32.mrf.mxu1  ;;  %v15429_v1 = vsub.f32 %v15298_v17, %v15341_v55 }
0x1cf5   :  { %14779 = vrot.lane.b32.xlu1 %v14768_v42, %s17931_s29  ;;  %v14771_v36 = vadd.f32 %v14768_v42, %v14309_v28  ;;  %v15430_v2 = vand.u32 4294901760, %v15429_v1 }
0x1cf6   :  { %v14878_v29 = vpop.f32.mrf.mxu0 }
0x1cf7   :  { %v14879_v7 = vadd.f32 %v17740_v13, %v14878_v29  ;;  %v15260_v43 = vpop.f32.mrf.mxu1  ;;  %v15868_v30 = vmul.f32 -1.442695, %v14771_v36  ;;  %v15344_v13 = vand.u32 4294901760, %v15297_v63  ;;  %v15431_v4 = vsub.f32 %v15429_v1, %v15430_v2 }
0x1cf8   :  { %v17515_v23 = vpop.f32.mrf.mxu0 }
0x1cf9   :  { %v17550_v24 = vpop.f32.mrf.mxu1  ;;  %v14960_v25 = vadd.f32 %v14959_v12, %v14879_v7  ;;  %17727 = vpow2.f32 %v15868_v30  ;;  %v15436_v11 = vsub.f32 %v15297_v63, %v15344_v13  ;;  %17553 = vmatprep.subr.mxu0 %v15344_v13  ;;  %v15432_v8 = vand.u32 4294901760, %v15431_v4 }
0x1cfa   :  { %17554 = vmatpush3.msra.mxu0 %v15344_v13 }
0x1cfb   :  { %v15035_v26 = vpop.f32.mrf.mxu0  ;;  %v15437_v53 = vand.u32 4294901760, %v15436_v11  ;;  %17565 = vmatprep.subr.mxu0 %v15429_v1  ;;  %17558 = vmatprep.subr.mxu1 %v15432_v8 }
0x1cfc   :  { %v15036_v40 = vadd.f32 %v15035_v26, %v14960_v25  ;;  %17559 = vmatpush3.msra.mxu1 %v15432_v8 }
0x1cfd   :  { %v17529_v51 = vpop.f32.mrf.mxu0 }
0x1cfe   :  { %v15111_v33 = vadd.f32 %v15110_v41, %v15036_v40 }
0x1cff   :  { %v15187_v14 = vpop.f32.mrf.mxu0 }
0x1d00   :  { %v15188_v35 = vadd.f32 %v15187_v14, %v15111_v33 }
0x1d01   :  { %v17543_v31 = vpop.f32.mrf.mxu0 }
0x1d02   :  { %v15261_v38 = vadd.f32 %v15260_v43, %v15188_v35  ;;  %v15870_v31 = vld [vmem:[%s19503_s18] ss:$0 sm:$0xff]  ;;  %s17934_s18 = smov [#allocation18]  }
0x1d03   :  { %s15822_s21 = sshll.u32 %s17934_s18, 4  ;;  %s15823_s21 = int_to_ptr.vmem [resolvable:$true] %s15822_s21 }
0x1d04   :  { %15272 = vrot.lane.b32.xlu0 %v15261_v38, %s17931_s29  ;;  %v15264_v61 = vadd.f32 %v15261_v38, %v14802_v39  ;;  %s17881_s1 = scalar_lea.vmem %s15823_s21, 256  ;;  %p17886_p8 = scmp.lt.s32.totalorder %s15823_s21, %s15823_s21 }
0x1d05   :  { %p17882_p7 = scmp.ne.s32.totalorder %s15823_s21, %s17881_s1  ;;  %p17887_p9 = scmp.lt.s32.totalorder %s17881_s1, %s17881_s1 }
0x1d06   :  { %v15869_v44 = vmul.f32 -1.442695, %v15264_v61  ;;  %v17728_v37 = vpop.eup %17727 }
0x1d07   :  { %v14775_v46 = vadd.f32 1.0, %v17728_v37  ;;  %p17888_p10 = por %p17887_p9, %p17886_p8 }
0x1d08   :  { %17729 = vpow2.f32 %v15869_v44 }
0x1d09   :  { %17731 = vrcp.f32 %v14775_v46  ;;  %p17889_p11 = pnand %p17888_p10, %p17882_p7 }
0x1d15   :  { %v17730_v6 = vpop.eup %17729 }
0x1d16   :  { %v15268_v48 = vadd.f32 1.0, %v17730_v6  ;;  %v17732_v27 = vpop.eup %17731 }
0x1d17   :  { %v14789_v60 = vsub.f32 1.0, %v17732_v27  ;;  %v14795_v32 = vmul.f32 %v17732_v27, %v19389_v5  ;;  %v15438_v5 = vsub.f32 %v15436_v11, %v15437_v53 }
0x1d18   :  { %17733 = vrcp.f32 %v15268_v48 }
0x1d19   :  { %v15439_v12 = vand.u32 4294901760, %v15438_v5 }
0x1d1b   :  { %17560 = vmatprep.subr.mxu1 %v15439_v12 }
0x1d1c   :  { %17561 = vmatpush3.msra.mxu1 %v15439_v12 }
0x1d1d   :  { %17572 = vmatprep.subr.mxu1 %v15341_v55 }
0x1d25   :  { %v17734_v50 = vpop.eup %17733 }
0x1d26   :  { %v15282_v9 = vsub.f32 1.0, %v17734_v50  ;;  %v15288_v20 = vmul.f32 %v17734_v50, %v19394_v19 }
0x1d67   :  { %v14780_v49 = vpop.permute.xlu1 %14779 }
0x1d68   :  { %v14782_v10 = vmul.f32 %v17732_v27, %v14780_v49 }
0x1d6a   :  { %14784 = vrot.lane.b32.xlu1 %v14782_v10, %s17932_s6 }
0x1d76   :  { %v15273_v52 = vpop.permute.xlu0 %15272 }
0x1d77   :  { %v15275_v18 = vmul.f32 %v17734_v50, %v15273_v52 }
0x1d79   :  { %15277 = vrot.lane.b32.xlu0 %v15275_v18, %s17932_s6 }
0x1ddc   :  { %v14785_v54 = vpop.permute.xlu1 %14784 }
0x1ddd   :  { %v14787_v56 = vadd.f32 %v14785_v54, %v14309_v28 }
0x1ddf   :  { %17735 = vtanh.f32 %v14787_v56 }
0x1deb   :  { %v15278_v58 = vpop.permute.xlu0 %15277 }
0x1dec   :  { %v17736_v59 = vpop.eup %17735  ;;  %v15280_v45 = vadd.f32 %v15278_v58, %v14802_v39 }
0x1ded   :  { %14791 = vrot.lane.b32.xlu1 %v17736_v59, %s17933_s12 }
0x1dee   :  { %17737 = vtanh.f32 %v15280_v45 }
0x1dfb   :  { %v17738_v57 = vpop.eup %17737 }
0x1dfc   :  { %15284 = vrot.lane.b32.xlu0 %v17738_v57, %s17933_s12 }
0x1e5f   :  { %v14792_v21 = vpop.permute.xlu1 %14791 }
0x1e60   :  { %v14794_v0 = vmul.f32 %v14792_v21, %v14789_v60 }
0x1e62   :  { %v14796_v15 = vadd.f32 %v14795_v32, %v14794_v0 }
0x1e64   :  { %14798 = vrot.lane.b32.xlu1 %v14796_v15, %s17933_s12 }
0x1e6e   :  { %v15285_v3 = vpop.permute.xlu0 %15284 }
0x1e6f   :  { %v15287_v22 = vmul.f32 %v15285_v3, %v15282_v9 }
0x1e71   :  { %v15289_v47 = vadd.f32 %v15288_v20, %v15287_v22 }
0x1e73   :  { %15291 = vrot.lane.b32.xlu0 %v15289_v47, %s17933_s12 }
0x1ed6   :  { %v14799_v16 = vpop.permute.xlu1 %14798 }
0x1ed7   :  { %14801 = vst.msk [vmem:[#allocation3 + $0x7] sm:$0x1] %vm8363_vm3, %v14799_v16 }
0x1ede   :  { %v15295_v41 = vld [vmem:[#allocation3] sm:$0xff] }
0x1edf   :  { %v15307_v62 = vsel %vm430_vm7, %v15295_v41, 0 }
0x1ee0   :  { %v15379_v42 = vand.u32 4294901760, %v15307_v62 }
0x1ee2   :  { %17562 = vmatprep.mubr.f32.mxu1 %v15379_v42  ;;  %v15380_v34 = vsub.f32 %v15307_v62, %v15379_v42 }
0x1ee4   :  { %v15381_v29 = vand.u32 4294901760, %v15380_v34 }
0x1ee5   :  { %v15292_v7 = vpop.permute.xlu0 %15291 }
0x1ee6   :  { %15294 = vst.msk [vmem:[#allocation3 + $0xf] sm:$0x1] %vm8363_vm3, %v15292_v7  ;;  %v15382_v19 = vsub.f32 %v15380_v34, %v15381_v29 }
0x1ee8   :  { %v15383_v43 = vand.u32 4294901760, %v15382_v19 }
0x1eea   :  { %17555 = vmatprep.mubr.f32.mxu0 %v15383_v43 }
0x1eed   :  { %v15296_v23 = vld [vmem:[#allocation3 + $0x8] sm:$0xff] }
0x1eee   :  { %v15310_v24 = vsel %vm430_vm7, %v15296_v23, 0 }
0x1eef   :  { %v15389_v25 = vand.u32 4294901760, %v15310_v24 }
0x1ef1   :  { %v15390_v26 = vsub.f32 %v15310_v24, %v15389_v25  ;;  %17563 = vmatmul.mubr.f32.vlgmr.msra.gmra.mxu1 %v15389_v25 }
0x1ef2   :  { %17573 = vmatpush3.msra.mxu1 %v15341_v55  ;;  %17576 = vmatprep.mubr.f32.mxu1 %v15381_v29 }
0x1ef3   :  { %17574 = vmatprep.subr.mxu1 %v15344_v13  ;;  %v15391_v40 = vand.u32 4294901760, %v15390_v26 }
0x1ef4   :  { %17575 = vmatpush3.msra.mxu1 %v15344_v13 }
0x1ef5   :  { %17577 = vmatmul.mubr.f32.vlgmr.msra.gmra.mxu1 %v15391_v40  ;;  %17586 = vmatprep.subr.mxu1 %v15341_v55  ;;  %v15392_v51 = vsub.f32 %v15390_v26, %v15391_v40 }
0x1ef6   :  { %17587 = vmatpush3.msra.mxu1 %v15341_v55  ;;  %17590 = vmatprep.mubr.f32.mxu1 %v15379_v42 }
0x1ef7   :  { %17588 = vmatprep.subr.mxu1 %v15344_v13  ;;  %v15393_v33 = vand.u32 4294901760, %v15392_v51 }
0x1ef8   :  { %17589 = vmatpush3.msra.mxu1 %v15344_v13 }
0x1ef9   :  { %17556 = vmatmul.mubr.f32.vlgmr.msra.gmra.mxu0 %v15393_v33  ;;  %17591 = vmatmul.mubr.f32.vlgmr.msra.gmra.mxu1 %v15389_v25 }
0x1efa   :  { %17566 = vmatpush3.msra.mxu0 %v15429_v1  ;;  %17569 = vmatprep.mubr.f32.mxu0 %v15380_v34 }
0x1efb   :  { %17567 = vmatprep.subr.mxu0 %v15436_v11 }
0x1efc   :  { %17568 = vmatpush3.msra.mxu0 %v15436_v11 }
0x1efd   :  { %17570 = vmatmul.mubr.f32.vlgmr.msra.gmra.mxu0 %v15390_v26  ;;  %17579 = vmatprep.subr.mxu0 %v15430_v2 }
0x1efe   :  { %17580 = vmatpush3.msra.mxu0 %v15430_v2  ;;  %17583 = vmatprep.mubr.f32.mxu0 %v15379_v42 }
0x1eff   :  { %17581 = vmatprep.subr.mxu0 %v15437_v53 }
0x1f00   :  { %17582 = vmatpush3.msra.mxu0 %v15437_v53 }
0x1f01   :  { %17584 = vmatmul.mubr.f32.vlgmr.msra.gmra.mxu0 %v15389_v25 }
0x1fb1   :  { %v17564_v14 = vpop.f32.mrf.mxu1 }
0x1fb3   :  { %v15476_v35 = vpop.f32.mrf.mxu1 }
0x1fb5   :  { %v17578_v38 = vpop.f32.mrf.mxu1 }
0x1fb7   :  { %v15640_v44 = vpop.f32.mrf.mxu1 }
0x1fb9   :  { %v17557_v28 = vpop.f32.mrf.mxu0  ;;  %v17592_v10 = vpop.f32.mrf.mxu1 }
0x1fba   :  { %v15396_v36 = vadd.f32 %v17557_v28, %v15870_v31 }
0x1fbb   :  { %v15385_v30 = vpop.f32.mrf.mxu0  ;;  %v15804_v59 = vpop.f32.mrf.mxu1 }
0x1fbc   :  { %v15386_v39 = vadd.f32 %v15870_v31, %v15385_v30  ;;  %v15483_v61 = vadd.f32 %v17564_v14, %v15396_v36 }
0x1fbd   :  { %v17571_v37 = vpop.f32.mrf.mxu0 }
0x1fbe   :  { %v15566_v46 = vadd.f32 %v17571_v37, %v15483_v61  ;;  %v15477_v6 = vadd.f32 %v15476_v35, %v15386_v39 }
0x1fbf   :  { %v15558_v48 = vpop.f32.mrf.mxu0 }
0x1fc0   :  { %v15559_v27 = vadd.f32 %v15558_v48, %v15477_v6  ;;  %v15649_v49 = vadd.f32 %v17578_v38, %v15566_v46 }
0x1fc1   :  { %v17585_v50 = vpop.f32.mrf.mxu0 }
0x1fc2   :  { %v15732_v52 = vadd.f32 %v17585_v50, %v15649_v49  ;;  %v15641_v18 = vadd.f32 %v15640_v44, %v15559_v27 }
0x1fc3   :  { %v15725_v54 = vpop.f32.mrf.mxu0 }
0x1fc4   :  { %v15811_v56 = vadd.f32 %v17592_v10, %v15732_v52  ;;  %v15726_v58 = vadd.f32 %v15725_v54, %v15641_v18 }
0x1fc6   :  { %v15805_v45 = vadd.f32 %v15804_v59, %v15726_v58  ;;  %15816 = vst.msk [vmem:[#allocation18 + $0x8] sm:$0xff] %vm15814_vm4, %v15811_v56 }
0x1fc8   :  { %15815 = vst.msk [vmem:[#allocation18] sm:$0xff] %vm15814_vm4, %v15805_v45 }
0x1fc9   :  { %17892 = shalt.err (!%p17889_p11)
}
0x1fca   :  { %15828 = dma.vmem_to_hbm [thread:$0]  %s15823_s21, 256, %s19504_s19, [#allocation8], %s17918_s9, %s17918_s9, %s17919_s23  }
0x1fcb   :  { %17909 = dma.done.wait [#allocation8], 256  }
0x1fcc   :  { %17910 = vsyncadd [#allocation8], 4294967040 }
0x1fcd   :  { %15832 = vsyncpa [#allocation7], 1 }
0x1fce   :  { %15833 = vsyncpa [#allocation10], 1 }
0x1fcf   :  { %15834 = vsyncpa [#allocation13], 1 }
0x1fd0   :  { %15835 = vsyncpa [#allocation16], 1 }
0x1fd1   :  { %15836 = vsyncpa [#allocation8], 1 }

</bundles_post_ra>
